<compile_context>
chip_gen: v6e
topology: v6e:2x2x1
jax: 0.10.0
libtpu: 0.0.40
codegen_flags: <defaults>
</compile_context>

<pallas_src>
import jax
import jax.numpy as jnp
from jax.experimental import pallas as pl
from jax.experimental.pallas import tpu as pltpu

NN_LENGTH = 768
_VMEM_LIMIT_BYTES = 32 * 1024 * 1024  # well under v7x's 64 MiB physical VMEM


def _round_up(a, m):
    return ((a + m - 1) // m) * m


def _device_kind():
    try:
        return jax.devices()[0].device_kind.lower()
    except Exception:
        return ""


def _pick_batch_tile(B):
    """Batch (M) tile.  Multiples of 128 fill MXU M-passes; >=4 grid steps hide the
    x/out DMAs behind compute; an even step count keeps v7x's two TensorCores balanced."""
    kind = _device_kind()
    is_v5 = "v5" in kind
    is_v7 = "v7" in kind
    cap = 256 if is_v5 else 512

    if B <= cap:
        # Small batch: a single block (tb == B -> block equals the full array dim, so no
        # (8,128) divisibility constraint), except on v7x where splitting in two keeps
        # both TensorCores busy.
        if is_v7 and B >= 32:
            return max(16, _round_up(pl.cdiv(B, 2), 16))
        return B

    steps = max(4, pl.cdiv(B, cap))
    if is_v7 and steps % 2:
        steps += 1
    tb = pl.cdiv(B, steps)
    tb = _round_up(tb, 128) if tb >= 128 else _round_up(tb, 16)
    tb = min(cap, tb)
    if is_v7:
        actual = pl.cdiv(B, tb)
        if actual > 1 and actual % 2:
            # Nudge to an even step count: a slightly under-full last MXU pass beats a
            # 2:1 core imbalance (~33% wall).
            tb = min(cap, max(16, _round_up(pl.cdiv(B, actual + 1), 16)))
    return tb


def _mlp_kernel(x_ref, w1_ref, b1_ref, w2_ref, b2_ref, w3_ref, b3_ref, o_ref):
    # x arrives f32 (one HBM read); cast to bf16 in-kernel -> MXU-native operands,
    # f32 accumulation / bias / ReLU throughout.
    x = x_ref[...].astype(jnp.bfloat16)
    h = jnp.dot(x, w1_ref[...], preferred_element_type=jnp.float32)
    h = jnp.maximum(h + b1_ref[...], 0.0).astype(jnp.bfloat16)
    # dropout: identity at inference.  TODO(synk): stochastic (training) dropout not implemented.
    h = jnp.dot(h, w2_ref[...], preferred_element_type=jnp.float32)
    h = jnp.maximum(h + b2_ref[...], 0.0).astype(jnp.bfloat16)
    o = jnp.dot(h, w3_ref[...], preferred_element_type=jnp.float32) + b3_ref[...]
    o_ref[...] = o.astype(o_ref.dtype)


def _as_dtype(a, dt):
    # No-op when params were prepared once via prepare_params() (the intended path).
    return a if a.dtype == dt else a.astype(dt)


def regression_net_forward(x, params, *, tb=None):
    """x: (B, 768) float32.  params: see prepare_params() (bf16 (in,out) weights,
    f32 (1,768) biases).  Returns (B, 768) float32."""
    B, D = x.shape
    assert D == NN_LENGTH

    if tb is None:
        tb = _pick_batch_tile(B)
    if tb >= B:
        tb = B                            # single full-array block
    else:
        tb = max(16, (tb // 16) * 16)     # multiple of 16 (>= 8 sublanes for the f32 x block)
    grid = (pl.cdiv(B, tb),)

    w1 = _as_dtype(params["w1"], jnp.bfloat16)
    w2 = _as_dtype(params["w2"], jnp.bfloat16)
    w3 = _as_dtype(params["w3"], jnp.bfloat16)
    b1 = _as_dtype(params["b1"], jnp.float32)
    b2 = _as_dtype(params["b2"], jnp.float32)
    b3 = _as_dtype(params["b3"], jnp.float32)

    x_spec = pl.BlockSpec((tb, D), lambda i: (i, 0))
    o_spec = pl.BlockSpec((tb, D), lambda i: (i, 0))
    # Constant index_map -> weights/biases are DMA'd once and stay VMEM-resident.
    w_spec = pl.BlockSpec((D, D), lambda i: (0, 0))
    b_spec = pl.BlockSpec((1, D), lambda i: (0, 0))

    return pl.pallas_call(
        _mlp_kernel,
        out_shape=jax.ShapeDtypeStruct((B, D), jnp.float32),
        grid_spec=pltpu.PrefetchScalarGridSpec(
            num_scalar_prefetch=0,
            grid=grid,
            in_specs=[x_spec, w_spec, b_spec, w_spec, b_spec, w_spec, b_spec],
            out_specs=o_spec,
        ),
        compiler_params=pltpu.CompilerParams(
            dimension_semantics=("parallel",),
            vmem_limit_bytes=_VMEM_LIMIT_BYTES,
        ),
    )(x, w1, b1, w2, b2, w3, b3)


def init_params(key, D=NN_LENGTH):
    """f32 master params mimicking nn.Linear defaults (uniform +/- 1/sqrt(fan_in)).
    Weights stored pre-transposed as (in, out); biases as (1, D)."""
    ks = jax.random.split(key, 6)
    bound = 1.0 / jnp.sqrt(jnp.float32(D))

    def u(k, shape):
        return jax.random.uniform(k, shape, jnp.float32, -bound, bound)

    return {
        "w1": u(ks[0], (D, D)), "b1": u(ks[1], (1, D)),
        "w2": u(ks[2], (D, D)), "b2": u(ks[3], (1, D)),
        "w3": u(ks[4], (D, D)), "b3": u(ks[5], (1, D)),
    }


def prepare_params(params):
    """One-time conversion to the kernel's operand dtypes (do this at load time so the
    forward pass emits zero cast ops): bf16 weights, f32 (1, D) biases."""
    return {
        "w1": params["w1"].astype(jnp.bfloat16),
        "w2": params["w2"].astype(jnp.bfloat16),
        "w3": params["w3"].astype(jnp.bfloat16),
        "b1": params["b1"].astype(jnp.float32).reshape(1, NN_LENGTH),
        "b2": params["b2"].astype(jnp.float32).reshape(1, NN_LENGTH),
        "b3": params["b3"].astype(jnp.float32).reshape(1, NN_LENGTH),
    }


def reference_forward(x, params_f32, compute_dtype=jnp.float32):
    """Pure-JAX reference.  compute_dtype=bf16 emulates the kernel's operand casting
    (f32 accumulation); compute_dtype=f32 is the exact PyTorch-module math."""

    def dot(a, w):
        return jnp.dot(a.astype(compute_dtype), w.astype(compute_dtype),
                       preferred_element_type=jnp.float32)

    h = jnp.maximum(dot(x, params_f32["w1"]) + params_f32["b1"], 0.0)
    h = jnp.maximum(dot(h, params_f32["w2"]) + params_f32["b2"], 0.0)
    return dot(h, params_f32["w3"]) + params_f32["b3"]


if __name__ == "__main__":
    key = jax.random.PRNGKey(0)
    k_param, k_x = jax.random.split(key)

    B = 20  # deliberately not tile-aligned: exercises full-array-block and ragged paths
    master = init_params(k_param)
    params = prepare_params(master)  # one-time bf16 conversion; forward emits no casts
    x = jax.random.normal(k_x, (B, NN_LENGTH), jnp.float32)

    fwd = jax.jit(regression_net_forward, static_argnames=("tb",))

    # Default path: single full-array block (tb == B, grid = 1).
    out = jax.block_until_ready(fwd(x, params))
    assert out.shape == (B, NN_LENGTH)
    assert out.dtype == jnp.float32

    # Multi-step ragged-grid path (tb=16 over B=20 -> 2 blocks, last one ragged; this is
    # the code path large batches use in place of the old jnp.pad).
    out_ragged = jax.block_until_ready(fwd(x, params, tb=16))

    # Tight check against a bf16-operand / f32-accumulate reference (same math as kernel).
    ref_bf16 = reference_forward(x, master, compute_dtype=jnp.bfloat16)
    assert jnp.allclose(out, ref_bf16, atol=2e-3, rtol=2e-3), "mismatch vs bf16 reference"
    assert jnp.allclose(out_ragged, ref_bf16, atol=2e-3, rtol=2e-3), "ragged-grid mismatch"

    # Sanity check against the exact f32 module math (bf16 operand drift is small).
    ref_f32 = reference_forward(x, master, compute_dtype=jnp.float32)
    assert jnp.allclose(out, ref_f32, atol=2e-2, rtol=2e-2), "excessive drift vs f32 reference"

    print("KERNEL_OK")
</pallas_src>

<mosaic_0001>
module attributes {stable_mosaic.version = 11 : i64} {
  func.func @_mlp_kernel(%arg0: i32, %arg1: memref<20x768xf32, #tpu.memory_space<vmem>>, %arg2: memref<768x768xbf16, #tpu.memory_space<vmem>>, %arg3: memref<1x768xf32, #tpu.memory_space<vmem>>, %arg4: memref<768x768xbf16, #tpu.memory_space<vmem>>, %arg5: memref<1x768xf32, #tpu.memory_space<vmem>>, %arg6: memref<768x768xbf16, #tpu.memory_space<vmem>>, %arg7: memref<1x768xf32, #tpu.memory_space<vmem>>, %arg8: memref<20x768xf32, #tpu.memory_space<vmem>>) attributes {dimension_semantics = [#tpu.dimension_semantics<parallel>], iteration_bounds = array<i64: 1>, scalar_prefetch = 0 : i64, scratch_operands = 0 : i64, tpu.core_type = #tpu.core_type<tc>, window_params = [{transform_indices = @transform_0, window_bounds = array<i64: 20, 768>}, {pipeline_mode = #tpu.pipeline_mode<synchronous>, transform_indices = @transform_1, window_bounds = array<i64: 768, 768>}, {pipeline_mode = #tpu.pipeline_mode<synchronous>, transform_indices = @transform_2, window_bounds = array<i64: 1, 768>}, {pipeline_mode = #tpu.pipeline_mode<synchronous>, transform_indices = @transform_3, window_bounds = array<i64: 768, 768>}, {pipeline_mode = #tpu.pipeline_mode<synchronous>, transform_indices = @transform_4, window_bounds = array<i64: 1, 768>}, {pipeline_mode = #tpu.pipeline_mode<synchronous>, transform_indices = @transform_5, window_bounds = array<i64: 768, 768>}, {pipeline_mode = #tpu.pipeline_mode<synchronous>, transform_indices = @transform_6, window_bounds = array<i64: 1, 768>}, {transform_indices = @transform_7, window_bounds = array<i64: 20, 768>}]} {
    %c0 = arith.constant 0 : index
    %c0_0 = arith.constant 0 : index
    %0 = vector.load %arg1[%c0, %c0_0] : memref<20x768xf32, #tpu.memory_space<vmem>>, vector<20x768xf32>
    %1 = arith.truncf %0 : vector<20x768xf32> to vector<20x768xbf16>
    %c0_1 = arith.constant 0 : index
    %c0_2 = arith.constant 0 : index
    %2 = vector.load %arg2[%c0_1, %c0_2] : memref<768x768xbf16, #tpu.memory_space<vmem>>, vector<768x768xbf16>
    %cst = arith.constant dense<0.000000e+00> : vector<20x768xf32>
    %3 = tpu.matmul %1, %2, %cst {dimension_numbers = #tpu.dot_dimension_numbers<[1], [0], [0], [1], [0, 0, 1, 1], [], []>} : vector<20x768xbf16>, vector<768x768xbf16>, vector<20x768xf32> -> vector<20x768xf32>
    %c0_3 = arith.constant 0 : index
    %c0_4 = arith.constant 0 : index
    %4 = vector.load %arg3[%c0_3, %c0_4] : memref<1x768xf32, #tpu.memory_space<vmem>>, vector<1x768xf32>
    %5 = vector.broadcast %4 : vector<1x768xf32> to vector<20x768xf32>
    %6 = arith.addf %3, %5 : vector<20x768xf32>
    %cst_5 = arith.constant 0.000000e+00 : f32
    %7 = vector.broadcast %cst_5 : f32 to vector<20x768xf32>
    %8 = arith.maximumf %6, %7 : vector<20x768xf32>
    %9 = arith.truncf %8 : vector<20x768xf32> to vector<20x768xbf16>
    %c0_6 = arith.constant 0 : index
    %c0_7 = arith.constant 0 : index
    %10 = vector.load %arg4[%c0_6, %c0_7] : memref<768x768xbf16, #tpu.memory_space<vmem>>, vector<768x768xbf16>
    %cst_8 = arith.constant dense<0.000000e+00> : vector<20x768xf32>
    %11 = tpu.matmul %9, %10, %cst_8 {dimension_numbers = #tpu.dot_dimension_numbers<[1], [0], [0], [1], [0, 0, 1, 1], [], []>} : vector<20x768xbf16>, vector<768x768xbf16>, vector<20x768xf32> -> vector<20x768xf32>
    %c0_9 = arith.constant 0 : index
    %c0_10 = arith.constant 0 : index
    %12 = vector.load %arg5[%c0_9, %c0_10] : memref<1x768xf32, #tpu.memory_space<vmem>>, vector<1x768xf32>
    %13 = vector.broadcast %12 : vector<1x768xf32> to vector<20x768xf32>
    %14 = arith.addf %11, %13 : vector<20x768xf32>
    %cst_11 = arith.constant 0.000000e+00 : f32
    %15 = vector.broadcast %cst_11 : f32 to vector<20x768xf32>
    %16 = arith.maximumf %14, %15 : vector<20x768xf32>
    %17 = arith.truncf %16 : vector<20x768xf32> to vector<20x768xbf16>
    %c0_12 = arith.constant 0 : index
    %c0_13 = arith.constant 0 : index
    %18 = vector.load %arg6[%c0_12, %c0_13] : memref<768x768xbf16, #tpu.memory_space<vmem>>, vector<768x768xbf16>
    %cst_14 = arith.constant dense<0.000000e+00> : vector<20x768xf32>
    %19 = tpu.matmul %17, %18, %cst_14 {dimension_numbers = #tpu.dot_dimension_numbers<[1], [0], [0], [1], [0, 0, 1, 1], [], []>} : vector<20x768xbf16>, vector<768x768xbf16>, vector<20x768xf32> -> vector<20x768xf32>
    %c0_15 = arith.constant 0 : index
    %c0_16 = arith.constant 0 : index
    %20 = vector.load %arg7[%c0_15, %c0_16] : memref<1x768xf32, #tpu.memory_space<vmem>>, vector<1x768xf32>
    %21 = vector.broadcast %20 : vector<1x768xf32> to vector<20x768xf32>
    %22 = arith.addf %19, %21 : vector<20x768xf32>
    %c0_17 = arith.constant 0 : index
    %c0_18 = arith.constant 0 : index
    %23 = vector.load %arg8[%c0_17, %c0_18] : memref<20x768xf32, #tpu.memory_space<vmem>>, vector<20x768xf32>
    tpu.vector_store %arg8[%c0_17, %c0_18], %22 {strides = array<i32>} : memref<20x768xf32, #tpu.memory_space<vmem>>, vector<20x768xf32>,
    return
  }
  func.func @transform_0(%arg0: i32) -> (i32, i32) {
    %c0_i32 = arith.constant 0 : i32
    %c0_i32_0 = arith.constant 0 : i32
    return %arg0, %c0_i32 : i32, i32
  }
  func.func @transform_1(%arg0: i32) -> (i32, i32) {
    %c0_i32 = arith.constant 0 : i32
    %c0_i32_0 = arith.constant 0 : i32
    %c0_i32_1 = arith.constant 0 : i32
    return %c0_i32, %c0_i32_0 : i32, i32
  }
  func.func @transform_2(%arg0: i32) -> (i32, i32) {
    %c0_i32 = arith.constant 0 : i32
    %c0_i32_0 = arith.constant 0 : i32
    %c0_i32_1 = arith.constant 0 : i32
    return %c0_i32, %c0_i32_0 : i32, i32
  }
  func.func @transform_3(%arg0: i32) -> (i32, i32) {
    %c0_i32 = arith.constant 0 : i32
    %c0_i32_0 = arith.constant 0 : i32
    %c0_i32_1 = arith.constant 0 : i32
    return %c0_i32, %c0_i32_0 : i32, i32
  }
  func.func @transform_4(%arg0: i32) -> (i32, i32) {
    %c0_i32 = arith.constant 0 : i32
    %c0_i32_0 = arith.constant 0 : i32
    %c0_i32_1 = arith.constant 0 : i32
    return %c0_i32, %c0_i32_0 : i32, i32
  }
  func.func @transform_5(%arg0: i32) -> (i32, i32) {
    %c0_i32 = arith.constant 0 : i32
    %c0_i32_0 = arith.constant 0 : i32
    %c0_i32_1 = arith.constant 0 : i32
    return %c0_i32, %c0_i32_0 : i32, i32
  }
  func.func @transform_6(%arg0: i32) -> (i32, i32) {
    %c0_i32 = arith.constant 0 : i32
    %c0_i32_0 = arith.constant 0 : i32
    %c0_i32_1 = arith.constant 0 : i32
    return %c0_i32, %c0_i32_0 : i32, i32
  }
  func.func @transform_7(%arg0: i32) -> (i32, i32) {
    %c0_i32 = arith.constant 0 : i32
    %c0_i32_0 = arith.constant 0 : i32
    return %arg0, %c0_i32 : i32, i32
  }
}

</mosaic_0001>

<bundles_post_ra>
// kernel: regression_net_forward.1
= control target key start
LH: loop header
LB: loop body
LE: loop exit
PB: predicated region body
PF: predicated region fallthrough
CT: control target
= control target key end

     0   :  { %12 = vsyncpa [#allocation3], 0  ;;  %s9969_s0 = inlined_call_operand.hbm [shape: f32[20,768], index: 0, kind: input, shape index: {}]   ;;  %s9970_s1 = inlined_call_operand.hbm [shape: bf16[768,768], index: 1, kind: input, shape index: {}]   ;;  %s9971_s2 = inlined_call_operand.hbm [shape: f32[1,768], index: 2, kind: input, shape index: {}]   ;;  %s9972_s3 = inlined_call_operand.hbm [shape: bf16[768,768], index: 3, kind: input, shape index: {}]   ;;  %s9973_s4 = inlined_call_operand.hbm [shape: f32[1,768], index: 4, kind: input, shape index: {}]   ;;  %s9974_s5 = inlined_call_operand.hbm [shape: bf16[768,768], index: 5, kind: input, shape index: {}]   ;;  %s9975_s6 = inlined_call_operand.hbm [shape: f32[1,768], index: 6, kind: input, shape index: {}]   ;;  %s9976_s7 = inlined_call_operand.hbm [shape: f32[20,768], index: 7, kind: output, shape index: {}]  }
   0x1   :  { %13 = vsyncpa [#allocation6], 0 }
   0x2   :  { %14 = vsyncpa [#allocation9], 0 }
   0x3   :  { %15 = vsyncpa [#allocation12], 0 }
   0x4   :  { %16 = vsyncpa [#allocation4], 0  ;;  %s9277_s24 = smov [#allocation5]  }
   0x5   :  { %s34_s25 = sshll.u32 %s9277_s24, 4  ;;  %s35_s25 = int_to_ptr.vmem [resolvable:$true] %s34_s25 }
   0x6   :  { %s9115_s26 = scalar_lea.vmem %s35_s25, 36864  ;;  %p9120_p1 = scmp.lt.s32.totalorder %s35_s25, %s35_s25 }
   0x7   :  { %p9116_p0 = scmp.ne.s32.totalorder %s35_s25, %s9115_s26  ;;  %p9121_p2 = scmp.lt.s32.totalorder %s9115_s26, %s9115_s26 }
   0x9   :  { %p9122_p3 = por %p9121_p2, %p9120_p1 }
   0xb   :  { %p9123_p4 = pnand %p9122_p3, %p9116_p0 }
   0xd   :  { %9126 = shalt.err (!%p9123_p4)
}
   0xe   :  { %s9278_s27 = smov 384   ;;  %s9279_s28 = smov 24  }
   0xf   :  { %40 = dma.hbm_to_vmem [thread:$0]  %s9970_s1, 36864, %s35_s25, [#allocation6], %s9278_s27, %s9278_s27, %s9279_s28  }
  0x10   :  { %s9280_s8 = smov [#allocation8]   ;;  %s9281_s10 = smov [#allocation11]  }
  0x11   :  { %s56_s9 = sshll.u32 %s9280_s8, 4  ;;  %s78_s11 = sshll.u32 %s9281_s10, 4  ;;  %s57_s9 = int_to_ptr.vmem [resolvable:$true] %s56_s9  ;;  %s79_s11 = int_to_ptr.vmem [resolvable:$true] %s78_s11 }
  0x12   :  { %s9135_s12 = scalar_lea.vmem %s57_s9, 36864  ;;  %p9140_p6 = scmp.lt.s32.totalorder %s57_s9, %s57_s9 }
  0x13   :  { %p9136_p5 = scmp.ne.s32.totalorder %s57_s9, %s9135_s12  ;;  %p9141_p7 = scmp.lt.s32.totalorder %s9135_s12, %s9135_s12 }
  0x15   :  { %p9142_p8 = por %p9141_p7, %p9140_p6 }
  0x17   :  { %p9143_p9 = pnand %p9142_p8, %p9136_p5 }
  0x19   :  { %9146 = shalt.err (!%p9143_p9)
}
  0x1a   :  { %62 = dma.hbm_to_vmem [thread:$0]  %s9972_s3, 36864, %s57_s9, [#allocation9], %s9278_s27, %s9278_s27, %s9279_s28  }
  0x1b   :  { %s9155_s15 = scalar_lea.vmem %s79_s11, 36864  ;;  %p9160_p11 = scmp.lt.s32.totalorder %s79_s11, %s79_s11 }
  0x1c   :  { %p9156_p10 = scmp.ne.s32.totalorder %s79_s11, %s9155_s15  ;;  %p9161_p12 = scmp.lt.s32.totalorder %s9155_s15, %s9155_s15 }
  0x1e   :  { %p9162_p13 = por %p9161_p12, %p9160_p11 }
  0x20   :  { %p9163_p0 = pnand %p9162_p13, %p9156_p10 }
  0x22   :  { %9166 = shalt.err (!%p9163_p0)
}
  0x23   :  { %84 = dma.hbm_to_vmem [thread:$0]  %s9974_s5, 36864, %s79_s11, [#allocation12], %s9278_s27, %s9278_s27, %s9279_s28  }
  0x24   :  { %s9282_s17 = smov [#allocation2]  }
  0x25   :  { %s22_s18 = sshll.u32 %s9282_s17, 4  ;;  %s23_s18 = int_to_ptr.vmem [resolvable:$true] %s22_s18 }
  0x26   :  { %s9175_s19 = scalar_lea.vmem %s23_s18, 2304  ;;  %p9180_p2 = scmp.lt.s32.totalorder %s23_s18, %s23_s18 }
  0x27   :  { %p9176_p1 = scmp.ne.s32.totalorder %s23_s18, %s9175_s19  ;;  %p9181_p3 = scmp.lt.s32.totalorder %s9175_s19, %s9175_s19 }
  0x29   :  { %p9182_p4 = por %p9181_p3, %p9180_p2 }
  0x2b   :  { %p9183_p5 = pnand %p9182_p4, %p9176_p1 }
  0x2d   :  { %9186 = shalt.err (!%p9183_p5)
}
  0x2e   :  { %s9283_s3 = smov 768   ;;  %s9284_s20 = smov 48  }
  0x2f   :  { %28 = dma.hbm_to_vmem [thread:$0]  %s9969_s0, 2304, %s23_s18, [#allocation3], %s9283_s3, %s9283_s3, %s9284_s20  }
  0x30   :  { %s9285_s5 = smov [#allocation7]   ;;  %s9286_s24 = smov [#allocation10]  }
  0x31   :  { %s47_s23 = sshll.u32 %s9285_s5, 4  ;;  %s69_s25 = sshll.u32 %s9286_s24, 4  ;;  %s48_s23 = int_to_ptr.vmem [resolvable:$true] %s47_s23  ;;  %s70_s25 = int_to_ptr.vmem [resolvable:$true] %s69_s25 }
  0x32   :  { %s9195_s26 = scalar_lea.vmem %s48_s23, 96  ;;  %p9200_p7 = scmp.lt.s32.totalorder %s48_s23, %s48_s23 }
  0x33   :  { %p9196_p6 = scmp.ne.s32.totalorder %s48_s23, %s9195_s26  ;;  %p9201_p8 = scmp.lt.s32.totalorder %s9195_s26, %s9195_s26 }
  0x35   :  { %p9202_p9 = por %p9201_p8, %p9200_p7 }
  0x37   :  { %p9203_p10 = pnand %p9202_p9, %p9196_p6 }
  0x39   :  { %9206 = shalt.err (!%p9203_p10)
}
  0x3a   :  { %50 = dma.hbm_to_vmem [thread:$0]  %s9971_s2, 96, %s48_s23, [#allocation6]  }
  0x3b   :  { %s9215_s29 = scalar_lea.vmem %s70_s25, 96  ;;  %p9220_p12 = scmp.lt.s32.totalorder %s70_s25, %s70_s25 }
  0x3c   :  { %p9216_p11 = scmp.ne.s32.totalorder %s70_s25, %s9215_s29  ;;  %p9221_p13 = scmp.lt.s32.totalorder %s9215_s29, %s9215_s29 }
  0x3e   :  { %p9222_p0 = por %p9221_p13, %p9220_p12 }
  0x40   :  { %p9223_p1 = pnand %p9222_p0, %p9216_p11 }
  0x42   :  { %9226 = shalt.err (!%p9223_p1)
}
  0x43   :  { %72 = dma.hbm_to_vmem [thread:$0]  %s9973_s4, 96, %s70_s25, [#allocation9]  }
  0x44   :  { %s9287_s8 = smov [#allocation13]  }
  0x45   :  { %s91_s9 = sshll.u32 %s9287_s8, 4  ;;  %s92_s9 = int_to_ptr.vmem [resolvable:$true] %s91_s9 }
  0x46   :  { %s9235_s10 = scalar_lea.vmem %s92_s9, 96  ;;  %p9240_p3 = scmp.lt.s32.totalorder %s92_s9, %s92_s9 }
  0x47   :  { %p9236_p2 = scmp.ne.s32.totalorder %s92_s9, %s9235_s10  ;;  %p9241_p4 = scmp.lt.s32.totalorder %s9235_s10, %s9235_s10 }
  0x49   :  { %p9242_p5 = por %p9241_p4, %p9240_p3 }
  0x4b   :  { %p9243_p6 = pnand %p9242_p5, %p9236_p2 }
  0x4d   :  { %9246 = shalt.err (!%p9243_p6)
}
  0x4e   :  { %94 = dma.hbm_to_vmem [thread:$0]  %s9975_s6, 96, %s92_s9, [#allocation12]  }
  0x4f   :  { %9267 = dma.done.wait [#allocation3], 2304  }
  0x50   :  { %9268 = vsyncadd [#allocation3], 4294964992 }
  0x51   :  { %9269 = dma.done.wait [#allocation6], 36960  }
  0x52   :  { %9270 = vsyncadd [#allocation6], 4294930336 }
  0x53   :  { %9271 = dma.done.wait [#allocation9], 36960  }
  0x54   :  { %9272 = vsyncadd [#allocation9], 4294930336 }
  0x55   :  { %9273 = dma.done.wait [#allocation12], 36960  }
  0x56   :  { %9274 = vsyncadd [#allocation12], 4294930336  ;;  %v7809_v0 = vld [vmem:[#allocation5 + $0x154] ss:$24 sps:$4 sm:$0xff]   ;;  %v7811_v1 = vld [vmem:[#allocation5 + $0x150] ss:$24 sps:$4 sm:$0xff]  }
  0x57   :  { %1906 = vmatprep.subr.bf16.mxu0 %v7809_v0  ;;  %v7812_v2 = vld [vmem:[#allocation5 + $0x454] ss:$24 sps:$4 sm:$0xff]   ;;  %v7814_v3 = vld [vmem:[#allocation5 + $0x450] ss:$24 sps:$4 sm:$0xff]   ;;  %v7815_v4 = vld [vmem:[#allocation5 + $0x124] ss:$24 sps:$4 sm:$0xff]  }
  0x58   :  { %1907 = vmatpush1.bf16.msra.mxu0 %v7811_v1  ;;  %v7817_v5 = vld [vmem:[#allocation5 + $0x120] ss:$24 sps:$4 sm:$0xff]   ;;  %1957 = vmatprep.subr.bf16.mxu1 %v7812_v2  ;;  %v7818_v6 = vld [vmem:[#allocation5 + $0x424] ss:$24 sps:$4 sm:$0xff]   ;;  %v7821_v8 = vld [vmem:[#allocation5 + $0xf4] ss:$24 sps:$4 sm:$0xff]  }
  0x59   :  { %1958 = vmatpush1.bf16.msra.mxu1 %v7814_v3  ;;  %1908 = vmatprep.subr.bf16.mxu0 %v7815_v4  ;;  %v7820_v7 = vld [vmem:[#allocation5 + $0x420] ss:$24 sps:$4 sm:$0xff]   ;;  %v7823_v9 = vld [vmem:[#allocation5 + $0xf0] ss:$24 sps:$4 sm:$0xff]   ;;  %v7824_v10 = vld [vmem:[#allocation5 + $0x3f4] ss:$24 sps:$4 sm:$0xff]  }
  0x5a   :  { %1959 = vmatprep.subr.bf16.mxu1 %v7818_v6  ;;  %v7827_v11 = vld [vmem:[#allocation5 + $0xc4] ss:$24 sps:$4 sm:$0xff]   ;;  %v7826_v12 = vld [vmem:[#allocation5 + $0x3f0] ss:$24 sps:$4 sm:$0xff]   ;;  %v7829_v14 = vld [vmem:[#allocation5 + $0xc0] ss:$24 sps:$4 sm:$0xff]  }
  0x5b   :  { %v7830_v13 = vld [vmem:[#allocation5 + $0x3c4] ss:$24 sps:$4 sm:$0xff]   ;;  %v7833_v15 = vld [vmem:[#allocation5 + $0x94] ss:$24 sps:$4 sm:$0xff]   ;;  %v7832_v16 = vld [vmem:[#allocation5 + $0x3c0] ss:$24 sps:$4 sm:$0xff]  }
  0x5c   :  { %1909 = vmatpush1.bf16.msra.mxu0 %v7817_v5  ;;  %v7836_v17 = vld [vmem:[#allocation5 + $0x394] ss:$24 sps:$4 sm:$0xff]   ;;  %v7835_v18 = vld [vmem:[#allocation5 + $0x90] ss:$24 sps:$4 sm:$0xff]   ;;  %v7839_v19 = vld [vmem:[#allocation5 + $0x64] ss:$24 sps:$4 sm:$0xff]  }
  0x5d   :  { %1910 = vmatprep.subr.bf16.mxu0 %v7821_v8  ;;  %1960 = vmatpush1.bf16.msra.mxu1 %v7820_v7  ;;  %v7838_v20 = vld [vmem:[#allocation5 + $0x390] ss:$24 sps:$4 sm:$0xff]   ;;  %v7842_v21 = vld [vmem:[#allocation5 + $0x364] ss:$24 sps:$4 sm:$0xff]   ;;  %v7841_v22 = vld [vmem:[#allocation5 + $0x60] ss:$24 sps:$4 sm:$0xff]  }
  0x5e   :  { %1961 = vmatprep.subr.bf16.mxu1 %v7824_v10  ;;  %v7845_v23 = vld [vmem:[#allocation5 + $0x34] ss:$24 sps:$4 sm:$0xff]   ;;  %v7844_v24 = vld [vmem:[#allocation5 + $0x360] ss:$24 sps:$4 sm:$0xff]   ;;  %v7847_v26 = vld [vmem:[#allocation5 + $0x30] ss:$24 sps:$4 sm:$0xff]  }
  0x5f   :  { %v7848_v25 = vld [vmem:[#allocation5 + $0x334] ss:$24 sps:$4 sm:$0xff]   ;;  %v7851_v27 = vld [vmem:[#allocation5 + $0x4] ss:$24 sps:$4 sm:$0xff]   ;;  %v7850_v28 = vld [vmem:[#allocation5 + $0x330] ss:$24 sps:$4 sm:$0xff]  }
  0x60   :  { %1911 = vmatpush1.bf16.msra.mxu0 %v7823_v9  ;;  %v7854_v29 = vld [vmem:[#allocation5 + $0x304] ss:$24 sps:$4 sm:$0xff]   ;;  %v7853_v30 = vld [vmem:[#allocation5] ss:$24 sps:$4 sm:$0xff]   ;;  %v7857_v31 = vld [vmem:[#allocation5 + $0x2d4] ss:$24 sps:$4 sm:$0xff]  }
  0x61   :  { %1912 = vmatprep.subr.bf16.mxu0 %v7827_v11  ;;  %1962 = vmatpush1.bf16.msra.mxu1 %v7826_v12  ;;  %v7856_v32 = vld [vmem:[#allocation5 + $0x300] ss:$24 sps:$4 sm:$0xff]   ;;  %v7860_v33 = vld [vmem:[#allocation5 + $0x5d4] ss:$24 sps:$4 sm:$0xff]   ;;  %v7859_v34 = vld [vmem:[#allocation5 + $0x2d0] ss:$24 sps:$4 sm:$0xff]  }
  0x62   :  { %1963 = vmatprep.subr.bf16.mxu1 %v7830_v13  ;;  %v7863_v35 = vld [vmem:[#allocation5 + $0x2a4] ss:$24 sps:$4 sm:$0xff]   ;;  %v7862_v36 = vld [vmem:[#allocation5 + $0x5d0] ss:$24 sps:$4 sm:$0xff]   ;;  %v7865_v38 = vld [vmem:[#allocation5 + $0x2a0] ss:$24 sps:$4 sm:$0xff]  }
  0x63   :  { %v7866_v37 = vld [vmem:[#allocation5 + $0x5a4] ss:$24 sps:$4 sm:$0xff]   ;;  %v7869_v39 = vld [vmem:[#allocation5 + $0x274] ss:$24 sps:$4 sm:$0xff]   ;;  %v7868_v40 = vld [vmem:[#allocation5 + $0x5a0] ss:$24 sps:$4 sm:$0xff]  }
  0x64   :  { %1913 = vmatpush1.bf16.msra.mxu0 %v7829_v14  ;;  %v7872_v41 = vld [vmem:[#allocation5 + $0x574] ss:$24 sps:$4 sm:$0xff]   ;;  %v7871_v42 = vld [vmem:[#allocation5 + $0x270] ss:$24 sps:$4 sm:$0xff]   ;;  %v7875_v43 = vld [vmem:[#allocation5 + $0x244] ss:$24 sps:$4 sm:$0xff]  }
  0x65   :  { %1914 = vmatprep.subr.bf16.mxu0 %v7833_v15  ;;  %1964 = vmatpush1.bf16.msra.mxu1 %v7832_v16  ;;  %v7874_v44 = vld [vmem:[#allocation5 + $0x570] ss:$24 sps:$4 sm:$0xff]   ;;  %v7878_v45 = vld [vmem:[#allocation5 + $0x544] ss:$24 sps:$4 sm:$0xff]   ;;  %v7877_v48 = vld [vmem:[#allocation5 + $0x240] ss:$24 sps:$4 sm:$0xff]  }
  0x66   :  { %1965 = vmatprep.subr.bf16.mxu1 %v7836_v17  ;;  %v117_v46 = vld [vmem:[#allocation2 + $0x8] sm:$0xff]  ;;  %v123_v47 = vld [vmem:[#allocation2 + $0x38] sm:$0xff]  ;;  %v116_v5 = vld [vmem:[#allocation2] sm:$0xff]  ;;  %s9288_s4 = smov [#allocation14]  }
  0x67   :  { %v9353_v49 = vpack.c.bf16 %v123_v47, %v117_v46  ;;  %v7881_v50 = vld [vmem:[#allocation5 + $0x214] ss:$24 sps:$4 sm:$0xff]   ;;  %v7880_v51 = vld [vmem:[#allocation5 + $0x540] ss:$24 sps:$4 sm:$0xff]   ;;  %v7883_v56 = vld [vmem:[#allocation5 + $0x210] ss:$24 sps:$4 sm:$0xff]  }
  0x68   :  { %1915 = vmatpush1.bf16.msra.mxu0 %v7835_v18  ;;  %v119_v52 = vld [vmem:[#allocation2 + $0x18] sm:$0xff]  ;;  %v125_v53 = vld [vmem:[#allocation2 + $0x48] sm:$0xff]  ;;  %v122_v7 = vld [vmem:[#allocation2 + $0x30] sm:$0xff]  ;;  %s6886_s6 = sshll.u32 %s9288_s4, 4  ;;  %s6887_s6 = int_to_ptr.vmem [resolvable:$true] %s6886_s6 }
  0x69   :  { %1916 = vmatprep.subr.bf16.mxu0 %v7839_v19  ;;  %1966 = vmatpush1.bf16.msra.mxu1 %v7838_v20  ;;  %v7884_v54 = vld [vmem:[#allocation5 + $0x514] ss:$24 sps:$4 sm:$0xff]   ;;  %v9356_v55 = vpack.c.bf16 %v125_v53, %v119_v52  ;;  %v7887_v57 = vld [vmem:[#allocation5 + $0x1e4] ss:$24 sps:$4 sm:$0xff]   ;;  %v7886_v58 = vld [vmem:[#allocation5 + $0x510] ss:$24 sps:$4 sm:$0xff]   ;;  %v9359_v11 = vpack.c.bf16 %v122_v7, %v116_v5  ;;  %p9252_p8 = scmp.lt.s32.totalorder %s6887_s6, %s6887_s6 }
  0x6a   :  { %1967 = vmatprep.subr.bf16.mxu1 %v7842_v21  ;;  %1938 = vmatprep.mubr.bf16.mxu0 %v9353_v49  ;;  %v7890_v59 = vld [vmem:[#allocation5 + $0x4e4] ss:$24 sps:$4 sm:$0xff]   ;;  %v7889_v60 = vld [vmem:[#allocation5 + $0x1e0] ss:$24 sps:$4 sm:$0xff]   ;;  %v7893_v61 = vld [vmem:[#allocation5 + $0x1b4] ss:$24 sps:$4 sm:$0xff]  }
  0x6b   :  { %1989 = vmatprep.mubr.bf16.mxu1 %v9356_v55  ;;  %v7892_v62 = vld [vmem:[#allocation5 + $0x4e0] ss:$24 sps:$4 sm:$0xff]   ;;  %v7896_v63 = vld [vmem:[#allocation5 + $0x4b4] ss:$24 sps:$4 sm:$0xff]   ;;  %v7895_v0 = vld [vmem:[#allocation5 + $0x1b0] ss:$24 sps:$4 sm:$0xff]  }
  0x6c   :  { %1917 = vmatpush1.bf16.msra.mxu0 %v7841_v22  ;;  %v7898_v1 = vld [vmem:[#allocation5 + $0x4b0] ss:$24 sps:$4 sm:$0xff]   ;;  %v7899_v2 = vld [vmem:[#allocation5 + $0x184] ss:$24 sps:$4 sm:$0xff]   ;;  %v7901_v3 = vld [vmem:[#allocation5 + $0x180] ss:$24 sps:$4 sm:$0xff]  }
  0x6d   :  { %1918 = vmatprep.subr.bf16.mxu0 %v7845_v23  ;;  %1968 = vmatpush1.bf16.msra.mxu1 %v7844_v24  ;;  %v7902_v4 = vld [vmem:[#allocation5 + $0x484] ss:$24 sps:$4 sm:$0xff]   ;;  %v7904_v6 = vld [vmem:[#allocation5 + $0x480] ss:$24 sps:$4 sm:$0xff]   ;;  %v7907_v8 = vld [vmem:[#allocation5 + $0x754] ss:$24 sps:$4 sm:$0xff]  }
  0x6e   :  { %1969 = vmatprep.subr.bf16.mxu1 %v7848_v25  ;;  %v118_v9 = vld [vmem:[#allocation2 + $0x10] sm:$0xff]  ;;  %v124_v10 = vld [vmem:[#allocation2 + $0x40] sm:$0xff]  ;;  %s9247_s12 = scalar_lea.vmem %s6887_s6, 2304 }
  0x6f   :  { %v7910_v12 = vld [vmem:[#allocation5 + $0x15c] ss:$24 sps:$4 sm:$0xff]   ;;  %v7905_v13 = vld [vmem:[#allocation5 + $0x750] ss:$24 sps:$4 sm:$0xff]   ;;  %v9361_v14 = vpack.c.bf16 %v124_v10, %v118_v9  ;;  %v7916_v17 = vld [vmem:[#allocation5 + $0x12c] ss:$24 sps:$4 sm:$0xff]   ;;  %p9248_p7 = scmp.ne.s32.totalorder %s6887_s6, %s9247_s12  ;;  %p9253_p9 = scmp.lt.s32.totalorder %s9247_s12, %s9247_s12 }
  0x70   :  { %1919 = vmatpush1.bf16.msra.mxu0 %v7847_v26  ;;  %v7913_v15 = vld [vmem:[#allocation5 + $0x724] ss:$24 sps:$4 sm:$0xff]   ;;  %v7908_v16 = vld [vmem:[#allocation5 + $0x158] ss:$24 sps:$4 sm:$0xff]   ;;  %v7919_v19 = vld [vmem:[#allocation5 + $0x6f4] ss:$24 sps:$4 sm:$0xff]  }
  0x71   :  { %1920 = vmatprep.subr.bf16.mxu0 %v7851_v27  ;;  %1970 = vmatpush1.bf16.msra.mxu1 %v7850_v28  ;;  %v7911_v18 = vld [vmem:[#allocation5 + $0x720] ss:$24 sps:$4 sm:$0xff]   ;;  %v7922_v21 = vld [vmem:[#allocation5 + $0xfc] ss:$24 sps:$4 sm:$0xff]   ;;  %v7917_v22 = vld [vmem:[#allocation5 + $0x6f0] ss:$24 sps:$4 sm:$0xff]   ;;  %p9254_p10 = por %p9253_p9, %p9252_p8 }
  0x72   :  { %1971 = vmatprep.subr.bf16.mxu1 %v7854_v29  ;;  %v7914_v20 = vld [vmem:[#allocation5 + $0x128] ss:$24 sps:$4 sm:$0xff]   ;;  %v7925_v23 = vld [vmem:[#allocation5 + $0x6c4] ss:$24 sps:$4 sm:$0xff]   ;;  %v7920_v24 = vld [vmem:[#allocation5 + $0xf8] ss:$24 sps:$4 sm:$0xff]  }
  0x73   :  { %v7928_v25 = vld [vmem:[#allocation5 + $0xcc] ss:$24 sps:$4 sm:$0xff]   ;;  %v7923_v26 = vld [vmem:[#allocation5 + $0x6c0] ss:$24 sps:$4 sm:$0xff]   ;;  %v7934_v29 = vld [vmem:[#allocation5 + $0x9c] ss:$24 sps:$4 sm:$0xff]   ;;  %p9255_p11 = pnand %p9254_p10, %p9248_p7 }
  0x74   :  { %1921 = vmatpush1.bf16.msra.mxu0 %v7853_v30  ;;  %v7931_v27 = vld [vmem:[#allocation5 + $0x694] ss:$24 sps:$4 sm:$0xff]   ;;  %v7926_v28 = vld [vmem:[#allocation5 + $0xc8] ss:$24 sps:$4 sm:$0xff]   ;;  %v129_v30 = vld [vmem:[#allocation2 + $0x68] sm:$0xf] }
  0x75   :  { %1922 = vmatprep.subr.bf16.mxu0 %v7857_v31  ;;  %1972 = vmatpush1.bf16.msra.mxu1 %v7856_v32  ;;  %v7929_v31 = vld [vmem:[#allocation5 + $0x690] ss:$24 sps:$4 sm:$0xff]   ;;  %v9365_v32 = vpack.c.bf16 %v129_v30, %v129_v30  ;;  %v7949_v47 = vld [vmem:[#allocation5 + $0x604] ss:$24 sps:$4 sm:$0xff]   ;;  %v7971_v7 = vld [vmem:[#allocation5 + $0x840] ss:$24 sps:$4 sm:$0xff]  }
  0x76   :  { %1973 = vmatprep.subr.bf16.mxu1 %v7860_v33  ;;  %v7937_v33 = vld [vmem:[#allocation5 + $0x664] ss:$24 sps:$4 sm:$0xff]   ;;  %v7941_v46 = vld [vmem:[#allocation5 + $0x630] ss:$24 sps:$4 sm:$0xff]  }
  0x77   :  { %v7952_v52 = vld [vmem:[#allocation5 + $0xc] ss:$24 sps:$4 sm:$0xff]   ;;  %v7968_v5 = vld [vmem:[#allocation5 + $0x278] ss:$24 sps:$4 sm:$0xff]   ;;  %v7974_v9 = vld [vmem:[#allocation5 + $0x248] ss:$24 sps:$4 sm:$0xff]  }
  0x78   :  { %1923 = vmatpush2.bf16.msra.mxu0 %v7859_v34  ;;  %v128_v34 = vld [vmem:[#allocation2 + $0x60] sm:$0xf]  ;;  %v7982_v10 = vld [vmem:[#allocation5 + $0x21c] ss:$24 sps:$4 sm:$0xff]   ;;  %v7998_v30 = vld [vmem:[#allocation5 + $0x188] ss:$24 sps:$4 sm:$0xff]  }
  0x79   :  { %1924 = vmatprep.subr.bf16.mxu0 %v7863_v35  ;;  %1974 = vmatpush2.bf16.msra.mxu1 %v7862_v36  ;;  %v7932_v35 = vld [vmem:[#allocation5 + $0x98] ss:$24 sps:$4 sm:$0xff]   ;;  %v9368_v36 = vpack.c.bf16 %v128_v34, %v128_v34 }
  0x7a   :  { %1975 = vmatprep.subr.bf16.mxu1 %v7866_v37  ;;  %v7940_v37 = vld [vmem:[#allocation5 + $0x6c] ss:$24 sps:$4 sm:$0xff]   ;;  %v8001_v34 = vld [vmem:[#allocation5 + $0x458] ss:$24 sps:$4 sm:$0xff]  }
  0x7c   :  { %1925 = vmatpush2.bf16.msra.mxu0 %v7865_v38  ;;  %v7935_v38 = vld [vmem:[#allocation5 + $0x660] ss:$24 sps:$4 sm:$0xff]  }
  0x7d   :  { %1926 = vmatprep.subr.bf16.mxu0 %v7869_v39  ;;  %1976 = vmatpush2.bf16.msra.mxu1 %v7868_v40  ;;  %v131_v39 = vld [vmem:[#allocation2 + $0x78] sm:$0xf] }
  0x7e   :  { %1977 = vmatprep.subr.bf16.mxu1 %v7872_v41  ;;  %v7938_v40 = vld [vmem:[#allocation5 + $0x68] ss:$24 sps:$4 sm:$0xff]   ;;  %v7943_v41 = vld [vmem:[#allocation5 + $0x634] ss:$24 sps:$4 sm:$0xff]  }
  0x80   :  { %1927 = vmatpush2.bf16.msra.mxu0 %v7871_v42  ;;  %v9371_v42 = vpack.c.bf16 %v131_v39, %v131_v39  ;;  %v8007_v39 = vld [vmem:[#allocation5 + $0x428] ss:$24 sps:$4 sm:$0xff]  }
  0x81   :  { %1928 = vmatprep.subr.bf16.mxu0 %v7875_v43  ;;  %1978 = vmatpush2.bf16.msra.mxu1 %v7874_v44  ;;  %v130_v43 = vld [vmem:[#allocation2 + $0x70] sm:$0xf]  ;;  %v7946_v44 = vld [vmem:[#allocation5 + $0x3c] ss:$24 sps:$4 sm:$0xff]  }
  0x82   :  { %1979 = vmatprep.subr.bf16.mxu1 %v7878_v45  ;;  %v9374_v45 = vpack.c.bf16 %v130_v43, %v130_v43  ;;  %v8015_v43 = vld [vmem:[#allocation5 + $0x3fc] ss:$24 sps:$4 sm:$0xff]  }
  0x84   :  { %1929 = vmatpush2.bf16.msra.mxu0 %v7877_v48  ;;  %v7944_v48 = vld [vmem:[#allocation5 + $0x38] ss:$24 sps:$4 sm:$0xff]  }
  0x85   :  { %1930 = vmatprep.subr.bf16.mxu0 %v7881_v50  ;;  %1980 = vmatpush2.bf16.msra.mxu1 %v7880_v51  ;;  %v121_v50 = vld [vmem:[#allocation2 + $0x28] sm:$0xff]  ;;  %v127_v51 = vld [vmem:[#allocation2 + $0x58] sm:$0xff] }
  0x86   :  { %1981 = vmatprep.subr.bf16.mxu1 %v7884_v54  ;;  %v9378_v53 = vpack.c.bf16 %v127_v51, %v121_v50  ;;  %v7947_v54 = vld [vmem:[#allocation5 + $0x600] ss:$24 sps:$4 sm:$0xff]   ;;  %v8021_v50 = vld [vmem:[#allocation5 + $0x3cc] ss:$24 sps:$4 sm:$0xff]  }
  0x87   :  { %v8016_v51 = vld [vmem:[#allocation5 + $0x6f8] ss:$24 sps:$4 sm:$0xff]  }
  0x88   :  { %1931 = vmatpush2.bf16.msra.mxu0 %v7883_v56  ;;  %v7955_v56 = vld [vmem:[#allocation5 + $0x8d4] ss:$24 sps:$4 sm:$0xff]  }
  0x89   :  { %1932 = vmatprep.subr.bf16.mxu0 %v7887_v57  ;;  %1982 = vmatpush2.bf16.msra.mxu1 %v7886_v58  ;;  %v7950_v57 = vld [vmem:[#allocation5 + $0x8] ss:$24 sps:$4 sm:$0xff]   ;;  %v7958_v58 = vld [vmem:[#allocation5 + $0x2dc] ss:$24 sps:$4 sm:$0xff]  }
  0x8a   :  { %1983 = vmatprep.subr.bf16.mxu1 %v7890_v59  ;;  %v7953_v59 = vld [vmem:[#allocation5 + $0x8d0] ss:$24 sps:$4 sm:$0xff]  }
  0x8c   :  { %1933 = vmatpush2.bf16.msra.mxu0 %v7889_v60  ;;  %v7961_v60 = vld [vmem:[#allocation5 + $0x8a4] ss:$24 sps:$4 sm:$0xff]  }
  0x8d   :  { %1934 = vmatprep.subr.bf16.mxu0 %v7893_v61  ;;  %1984 = vmatpush2.bf16.msra.mxu1 %v7892_v62  ;;  %v7956_v61 = vld [vmem:[#allocation5 + $0x2d8] ss:$24 sps:$4 sm:$0xff]   ;;  %v7964_v62 = vld [vmem:[#allocation5 + $0x2ac] ss:$24 sps:$4 sm:$0xff]  }
  0x8e   :  { %1985 = vmatprep.subr.bf16.mxu1 %v7896_v63  ;;  %v7959_v63 = vld [vmem:[#allocation5 + $0x8a0] ss:$24 sps:$4 sm:$0xff]  }
  0x90   :  { %1935 = vmatpush2.bf16.msra.mxu0 %v7895_v0  ;;  %v7967_v0 = vld [vmem:[#allocation5 + $0x874] ss:$24 sps:$4 sm:$0xff]  }
  0x91   :  { %1936 = vmatprep.subr.bf16.mxu0 %v7899_v2  ;;  %1986 = vmatpush2.bf16.msra.mxu1 %v7898_v1  ;;  %v7962_v1 = vld [vmem:[#allocation5 + $0x2a8] ss:$24 sps:$4 sm:$0xff]   ;;  %v7970_v2 = vld [vmem:[#allocation5 + $0x27c] ss:$24 sps:$4 sm:$0xff]  }
  0x92   :  { %1987 = vmatprep.subr.bf16.mxu1 %v7902_v4  ;;  %v7973_v4 = vld [vmem:[#allocation5 + $0x844] ss:$24 sps:$4 sm:$0xff]  }
  0x94   :  { %1937 = vmatpush2.bf16.msra.mxu0 %v7901_v3  ;;  %v7965_v3 = vld [vmem:[#allocation5 + $0x870] ss:$24 sps:$4 sm:$0xff]  }
  0x95   :  { %2008 = vmatprep.subr.bf16.mxu0 %v7907_v8  ;;  %1988 = vmatpush2.bf16.msra.mxu1 %v7904_v6  ;;  %v7976_v6 = vld [vmem:[#allocation5 + $0x24c] ss:$24 sps:$4 sm:$0xff]  }
  0x96   :  { %2059 = vmatprep.subr.bf16.mxu1 %v7910_v12  ;;  %v7979_v8 = vld [vmem:[#allocation5 + $0x814] ss:$24 sps:$4 sm:$0xff]   ;;  %v7977_v12 = vld [vmem:[#allocation5 + $0x810] ss:$24 sps:$4 sm:$0xff]  }
  0x97   :  { %1939 = vmatmul.mubr.bf16.vlgmr.msra.gmra.mxu0 %v9359_v11 }
  0x98   :  { %2009 = vmatpush1.bf16.msra.mxu0 %v7905_v13  ;;  %1990 = vmatmul.mubr.bf16.vlgmr.msra.gmra.mxu1 %v9361_v14  ;;  %v7985_v13 = vld [vmem:[#allocation5 + $0x7e4] ss:$24 sps:$4 sm:$0xff]  }
  0x99   :  { %2010 = vmatprep.subr.bf16.mxu0 %v7913_v15  ;;  %2060 = vmatpush1.bf16.msra.mxu1 %v7908_v16  ;;  %v7980_v15 = vld [vmem:[#allocation5 + $0x218] ss:$24 sps:$4 sm:$0xff]   ;;  %v7988_v16 = vld [vmem:[#allocation5 + $0x1ec] ss:$24 sps:$4 sm:$0xff]  }
  0x9a   :  { %2061 = vmatprep.subr.bf16.mxu1 %v7916_v17  ;;  %1948 = vmatprep.mubr.bf16.mxu0 %v9365_v32  ;;  %v7983_v17 = vld [vmem:[#allocation5 + $0x7e0] ss:$24 sps:$4 sm:$0xff]  }
  0x9b   :  { %1999 = vmatprep.mubr.bf16.mxu1 %v9371_v42 }
  0x9c   :  { %2011 = vmatpush1.bf16.msra.mxu0 %v7911_v18  ;;  %v7991_v18 = vld [vmem:[#allocation5 + $0x7b4] ss:$24 sps:$4 sm:$0xff]  }
  0x9d   :  { %2012 = vmatprep.subr.bf16.mxu0 %v7919_v19  ;;  %2062 = vmatpush1.bf16.msra.mxu1 %v7914_v20  ;;  %v7986_v19 = vld [vmem:[#allocation5 + $0x1e8] ss:$24 sps:$4 sm:$0xff]   ;;  %v7994_v20 = vld [vmem:[#allocation5 + $0x1bc] ss:$24 sps:$4 sm:$0xff]  }
  0x9e   :  { %2063 = vmatprep.subr.bf16.mxu1 %v7922_v21  ;;  %v7989_v21 = vld [vmem:[#allocation5 + $0x7b0] ss:$24 sps:$4 sm:$0xff]  }
  0x9f   :  { %1949 = vmatmul.mubr.bf16.gmra.mxu0 %v9368_v36 }
  0xa0   :  { %2013 = vmatpush1.bf16.msra.mxu0 %v7917_v22  ;;  %2000 = vmatmul.mubr.bf16.gmra.mxu1 %v9374_v45  ;;  %v7992_v22 = vld [vmem:[#allocation5 + $0x1b8] ss:$24 sps:$4 sm:$0xff]  }
  0xa1   :  { %2014 = vmatprep.subr.bf16.mxu0 %v7925_v23  ;;  %2064 = vmatpush1.bf16.msra.mxu1 %v7920_v24  ;;  %v7997_v23 = vld [vmem:[#allocation5 + $0x784] ss:$24 sps:$4 sm:$0xff]   ;;  %v7995_v24 = vld [vmem:[#allocation5 + $0x780] ss:$24 sps:$4 sm:$0xff]  }
  0xa2   :  { %2065 = vmatprep.subr.bf16.mxu1 %v7928_v25  ;;  %2091 = vmatprep.mubr.bf16.mxu1 %v9353_v49  ;;  %v8000_v25 = vld [vmem:[#allocation5 + $0x18c] ss:$24 sps:$4 sm:$0xff]  }
  0xa3   :  { %2040 = vmatprep.mubr.bf16.mxu0 %v9378_v53 }
  0xa4   :  { %2015 = vmatpush1.bf16.msra.mxu0 %v7923_v26  ;;  %v120_v26 = vld [vmem:[#allocation2 + $0x20] sm:$0xff] }
  0xa5   :  { %2016 = vmatprep.subr.bf16.mxu0 %v7931_v27  ;;  %2066 = vmatpush1.bf16.msra.mxu1 %v7926_v28  ;;  %v126_v27 = vld [vmem:[#allocation2 + $0x50] sm:$0xff]  ;;  %v8003_v28 = vld [vmem:[#allocation5 + $0x45c] ss:$24 sps:$4 sm:$0xff]  }
  0xa6   :  { %2067 = vmatprep.subr.bf16.mxu1 %v7934_v29  ;;  %v133_v29 = vld [vmem:[#allocation2 + $0x88] sm:$0xf] }
  0xa8   :  { %2017 = vmatpush1.bf16.msra.mxu0 %v7929_v31  ;;  %v9381_v31 = vpack.c.bf16 %v126_v27, %v120_v26  ;;  %v8075_v26 = vld [vmem:[#allocation5 + $0x51c] ss:$24 sps:$4 sm:$0xff]   ;;  %v8070_v27 = vld [vmem:[#allocation5 + $0x848] ss:$24 sps:$4 sm:$0xff]  }
  0xa9   :  { %2018 = vmatprep.subr.bf16.mxu0 %v7937_v33  ;;  %2068 = vmatpush1.bf16.msra.mxu1 %v7932_v35  ;;  %v8006_v33 = vld [vmem:[#allocation5 + $0x75c] ss:$24 sps:$4 sm:$0xff]   ;;  %v9383_v35 = vpack.c.bf16 %v133_v29, %v133_v29  ;;  %v8073_v29 = vld [vmem:[#allocation5 + $0x518] ss:$24 sps:$4 sm:$0xff]  }
  0xaa   :  { %2069 = vmatprep.subr.bf16.mxu1 %v7940_v37  ;;  %v8009_v37 = vld [vmem:[#allocation5 + $0x42c] ss:$24 sps:$4 sm:$0xff]  }
  0xac   :  { %2019 = vmatpush1.bf16.msra.mxu0 %v7935_v38  ;;  %v8004_v38 = vld [vmem:[#allocation5 + $0x758] ss:$24 sps:$4 sm:$0xff]  }
  0xad   :  { %2020 = vmatprep.subr.bf16.mxu0 %v7943_v41  ;;  %2070 = vmatpush1.bf16.msra.mxu1 %v7938_v40  ;;  %v8012_v40 = vld [vmem:[#allocation5 + $0x72c] ss:$24 sps:$4 sm:$0xff]   ;;  %v132_v41 = vld [vmem:[#allocation2 + $0x80] sm:$0xf] }
  0xae   :  { %2071 = vmatprep.subr.bf16.mxu1 %v7946_v44  ;;  %v8010_v44 = vld [vmem:[#allocation5 + $0x728] ss:$24 sps:$4 sm:$0xff]  }
  0xb0   :  { %2021 = vmatpush1.bf16.msra.mxu0 %v7941_v46  ;;  %v9389_v46 = vpack.c.bf16 %v132_v41, %v132_v41  ;;  %v8085_v41 = vld [vmem:[#allocation5 + $0x4b8] ss:$24 sps:$4 sm:$0xff]  }
  0xb1   :  { %2022 = vmatprep.subr.bf16.mxu0 %v7949_v47  ;;  %2072 = vmatpush1.bf16.msra.mxu1 %v7944_v48  ;;  %v8018_v47 = vld [vmem:[#allocation5 + $0x6fc] ss:$24 sps:$4 sm:$0xff]   ;;  %v8013_v48 = vld [vmem:[#allocation5 + $0x3f8] ss:$24 sps:$4 sm:$0xff]  }
  0xb2   :  { %2073 = vmatprep.subr.bf16.mxu1 %v7952_v52  ;;  %v8024_v52 = vld [vmem:[#allocation5 + $0x6cc] ss:$24 sps:$4 sm:$0xff]  }
  0xb4   :  { %2023 = vmatpush1.bf16.msra.mxu0 %v7947_v54  ;;  %v8019_v54 = vld [vmem:[#allocation5 + $0x3c8] ss:$24 sps:$4 sm:$0xff]  }
  0xb5   :  { %2024 = vmatprep.subr.bf16.mxu0 %v7955_v56  ;;  %2074 = vmatpush1.bf16.msra.mxu1 %v7950_v57  ;;  %v8027_v56 = vld [vmem:[#allocation5 + $0x39c] ss:$24 sps:$4 sm:$0xff]   ;;  %v8022_v57 = vld [vmem:[#allocation5 + $0x6c8] ss:$24 sps:$4 sm:$0xff]  }
  0xb6   :  { %2075 = vmatprep.subr.bf16.mxu1 %v7958_v58  ;;  %v8030_v58 = vld [vmem:[#allocation5 + $0x69c] ss:$24 sps:$4 sm:$0xff]  }
  0xb8   :  { %2025 = vmatpush2.bf16.msra.mxu0 %v7953_v59  ;;  %v8025_v59 = vld [vmem:[#allocation5 + $0x398] ss:$24 sps:$4 sm:$0xff]  }
  0xb9   :  { %2026 = vmatprep.subr.bf16.mxu0 %v7961_v60  ;;  %2076 = vmatpush2.bf16.msra.mxu1 %v7956_v61  ;;  %v8033_v60 = vld [vmem:[#allocation5 + $0x36c] ss:$24 sps:$4 sm:$0xff]   ;;  %v8028_v61 = vld [vmem:[#allocation5 + $0x698] ss:$24 sps:$4 sm:$0xff]  }
  0xba   :  { %2077 = vmatprep.subr.bf16.mxu1 %v7964_v62  ;;  %v8036_v62 = vld [vmem:[#allocation5 + $0x66c] ss:$24 sps:$4 sm:$0xff]  }
  0xbc   :  { %2027 = vmatpush2.bf16.msra.mxu0 %v7959_v63  ;;  %v8031_v63 = vld [vmem:[#allocation5 + $0x368] ss:$24 sps:$4 sm:$0xff]  }
  0xbd   :  { %2028 = vmatprep.subr.bf16.mxu0 %v7967_v0  ;;  %2078 = vmatpush2.bf16.msra.mxu1 %v7962_v1  ;;  %v8039_v0 = vld [vmem:[#allocation5 + $0x33c] ss:$24 sps:$4 sm:$0xff]   ;;  %v8034_v1 = vld [vmem:[#allocation5 + $0x668] ss:$24 sps:$4 sm:$0xff]  }
  0xbe   :  { %2079 = vmatprep.subr.bf16.mxu1 %v7970_v2  ;;  %v8042_v2 = vld [vmem:[#allocation5 + $0x63c] ss:$24 sps:$4 sm:$0xff]  }
  0xc0   :  { %2029 = vmatpush2.bf16.msra.mxu0 %v7965_v3  ;;  %v8037_v3 = vld [vmem:[#allocation5 + $0x338] ss:$24 sps:$4 sm:$0xff]  }
  0xc1   :  { %2030 = vmatprep.subr.bf16.mxu0 %v7973_v4  ;;  %2080 = vmatpush2.bf16.msra.mxu1 %v7968_v5  ;;  %v8045_v4 = vld [vmem:[#allocation5 + $0x30c] ss:$24 sps:$4 sm:$0xff]   ;;  %v8040_v5 = vld [vmem:[#allocation5 + $0x638] ss:$24 sps:$4 sm:$0xff]  }
  0xc2   :  { %2081 = vmatprep.subr.bf16.mxu1 %v7976_v6  ;;  %v8048_v6 = vld [vmem:[#allocation5 + $0x60c] ss:$24 sps:$4 sm:$0xff]  }
  0xc4   :  { %2031 = vmatpush2.bf16.msra.mxu0 %v7971_v7  ;;  %v8043_v7 = vld [vmem:[#allocation5 + $0x308] ss:$24 sps:$4 sm:$0xff]  }
  0xc5   :  { %2032 = vmatprep.subr.bf16.mxu0 %v7979_v8  ;;  %2082 = vmatpush2.bf16.msra.mxu1 %v7974_v9  ;;  %v8051_v8 = vld [vmem:[#allocation5 + $0x5dc] ss:$24 sps:$4 sm:$0xff]   ;;  %v8046_v9 = vld [vmem:[#allocation5 + $0x608] ss:$24 sps:$4 sm:$0xff]  }
  0xc6   :  { %2083 = vmatprep.subr.bf16.mxu1 %v7982_v10  ;;  %v8054_v10 = vld [vmem:[#allocation5 + $0x8dc] ss:$24 sps:$4 sm:$0xff]  }
  0xc8   :  { %2033 = vmatpush2.bf16.msra.mxu0 %v7977_v12  ;;  %v8049_v12 = vld [vmem:[#allocation5 + $0x5d8] ss:$24 sps:$4 sm:$0xff]  }
  0xc9   :  { %2034 = vmatprep.subr.bf16.mxu0 %v7985_v13  ;;  %2084 = vmatpush2.bf16.msra.mxu1 %v7980_v15  ;;  %v8057_v13 = vld [vmem:[#allocation5 + $0x5ac] ss:$24 sps:$4 sm:$0xff]   ;;  %v8052_v15 = vld [vmem:[#allocation5 + $0x8d8] ss:$24 sps:$4 sm:$0xff]  }
  0xca   :  { %2085 = vmatprep.subr.bf16.mxu1 %v7988_v16  ;;  %v8060_v16 = vld [vmem:[#allocation5 + $0x8ac] ss:$24 sps:$4 sm:$0xff]  }
  0xcc   :  { %2035 = vmatpush2.bf16.msra.mxu0 %v7983_v17  ;;  %v8055_v17 = vld [vmem:[#allocation5 + $0x5a8] ss:$24 sps:$4 sm:$0xff]  }
  0xcd   :  { %2036 = vmatprep.subr.bf16.mxu0 %v7991_v18  ;;  %2086 = vmatpush2.bf16.msra.mxu1 %v7986_v19  ;;  %v8063_v18 = vld [vmem:[#allocation5 + $0x57c] ss:$24 sps:$4 sm:$0xff]   ;;  %v8058_v19 = vld [vmem:[#allocation5 + $0x8a8] ss:$24 sps:$4 sm:$0xff]  }
  0xce   :  { %2087 = vmatprep.subr.bf16.mxu1 %v7994_v20  ;;  %v8066_v20 = vld [vmem:[#allocation5 + $0x87c] ss:$24 sps:$4 sm:$0xff]  }
  0xd0   :  { %2037 = vmatpush2.bf16.msra.mxu0 %v7989_v21  ;;  %v8061_v21 = vld [vmem:[#allocation5 + $0x578] ss:$24 sps:$4 sm:$0xff]  }
  0xd1   :  { %2038 = vmatprep.subr.bf16.mxu0 %v7997_v23  ;;  %2088 = vmatpush2.bf16.msra.mxu1 %v7992_v22  ;;  %v8069_v22 = vld [vmem:[#allocation5 + $0x54c] ss:$24 sps:$4 sm:$0xff]   ;;  %v8064_v23 = vld [vmem:[#allocation5 + $0x878] ss:$24 sps:$4 sm:$0xff]  }
  0xd2   :  { %2089 = vmatprep.subr.bf16.mxu1 %v8000_v25  ;;  %v8067_v25 = vld [vmem:[#allocation5 + $0x548] ss:$24 sps:$4 sm:$0xff]  }
  0xd4   :  { %2039 = vmatpush2.bf16.msra.mxu0 %v7995_v24  ;;  %v8072_v24 = vld [vmem:[#allocation5 + $0x84c] ss:$24 sps:$4 sm:$0xff]  }
  0xd5   :  { %2110 = vmatprep.subr.bf16.mxu0 %v8003_v28  ;;  %2090 = vmatpush2.bf16.msra.mxu1 %v7998_v30  ;;  %v8078_v28 = vld [vmem:[#allocation5 + $0x81c] ss:$24 sps:$4 sm:$0xff]   ;;  %v8081_v30 = vld [vmem:[#allocation5 + $0x4ec] ss:$24 sps:$4 sm:$0xff]  }
  0xd6   :  { %2161 = vmatprep.subr.bf16.mxu1 %v8006_v33  ;;  %v8076_v33 = vld [vmem:[#allocation5 + $0x818] ss:$24 sps:$4 sm:$0xff]  }
  0xd7   :  { %2041 = vmatmul.mubr.bf16.vlgmr.msra.gmra.mxu0 %v9381_v31 }
  0xd8   :  { %2111 = vmatpush1.bf16.msra.mxu0 %v8001_v34  ;;  %2050 = vmatprep.mubr.bf16.mxu0 %v9383_v35  ;;  %v8084_v34 = vld [vmem:[#allocation5 + $0x7ec] ss:$24 sps:$4 sm:$0xff]  }
  0xd9   :  { %2092 = vmatmul.mubr.bf16.vlgmr.msra.gmra.mxu1 %v9359_v11  ;;  %2112 = vmatprep.subr.bf16.mxu0 %v8009_v37  ;;  %v8079_v37 = vld [vmem:[#allocation5 + $0x4e8] ss:$24 sps:$4 sm:$0xff]  }
  0xda   :  { %2162 = vmatpush1.bf16.msra.mxu1 %v8004_v38  ;;  %2101 = vmatprep.mubr.bf16.mxu1 %v9365_v32  ;;  %v8087_v38 = vld [vmem:[#allocation5 + $0x4bc] ss:$24 sps:$4 sm:$0xff]  }
  0xdb   :  { %2163 = vmatprep.subr.bf16.mxu1 %v8012_v40  ;;  %v8090_v40 = vld [vmem:[#allocation5 + $0x7bc] ss:$24 sps:$4 sm:$0xff]  }
  0xdc   :  { %2113 = vmatpush1.bf16.msra.mxu0 %v8007_v39  ;;  %v8082_v39 = vld [vmem:[#allocation5 + $0x7e8] ss:$24 sps:$4 sm:$0xff]  }
  0xdd   :  { %2114 = vmatprep.subr.bf16.mxu0 %v8015_v43  ;;  %v8093_v43 = vld [vmem:[#allocation5 + $0x48c] ss:$24 sps:$4 sm:$0xff]  }
  0xde   :  { %2164 = vmatpush1.bf16.msra.mxu1 %v8010_v44  ;;  %v8088_v44 = vld [vmem:[#allocation5 + $0x7b8] ss:$24 sps:$4 sm:$0xff]  }
  0xdf   :  { %2051 = vmatmul.mubr.bf16.gmra.mxu0 %v9389_v46  ;;  %2165 = vmatprep.subr.bf16.mxu1 %v8018_v47  ;;  %v8096_v47 = vld [vmem:[#allocation5 + $0x78c] ss:$24 sps:$4 sm:$0xff]  }
  0xe0   :  { %2115 = vmatpush1.bf16.msra.mxu0 %v8013_v48  ;;  %2142 = vmatprep.mubr.bf16.mxu0 %v9356_v55  ;;  %v8091_v48 = vld [vmem:[#allocation5 + $0x488] ss:$24 sps:$4 sm:$0xff]  }
  0xe1   :  { %2116 = vmatprep.subr.bf16.mxu0 %v8021_v50  ;;  %2102 = vmatmul.mubr.bf16.gmra.mxu1 %v9368_v36  ;;  %v8099_v50 = vld [vmem:[#allocation5 + $0x164] ss:$24 sps:$4 sm:$0xff]  }
  0xe2   :  { %2166 = vmatpush1.bf16.msra.mxu1 %v8016_v51  ;;  %2193 = vmatprep.mubr.bf16.mxu1 %v9378_v53  ;;  %v8094_v51 = vld [vmem:[#allocation5 + $0x788] ss:$24 sps:$4 sm:$0xff]  }
  0xe3   :  { %2167 = vmatprep.subr.bf16.mxu1 %v8024_v52  ;;  %v8102_v52 = vld [vmem:[#allocation5 + $0x464] ss:$24 sps:$4 sm:$0xff]  }
  0xe4   :  { %2117 = vmatpush1.bf16.msra.mxu0 %v8019_v54  ;;  %v8097_v54 = vld [vmem:[#allocation5 + $0x160] ss:$24 sps:$4 sm:$0xff]  }
  0xe5   :  { %2118 = vmatprep.subr.bf16.mxu0 %v8027_v56  ;;  %v8105_v56 = vld [vmem:[#allocation5 + $0x134] ss:$24 sps:$4 sm:$0xff]  }
  0xe6   :  { %2168 = vmatpush1.bf16.msra.mxu1 %v8022_v57  ;;  %v8100_v57 = vld [vmem:[#allocation5 + $0x460] ss:$24 sps:$4 sm:$0xff]  }
  0xe7   :  { %2169 = vmatprep.subr.bf16.mxu1 %v8030_v58  ;;  %v8108_v58 = vld [vmem:[#allocation5 + $0x434] ss:$24 sps:$4 sm:$0xff]  }
  0xe8   :  { %2119 = vmatpush1.bf16.msra.mxu0 %v8025_v59  ;;  %v8103_v59 = vld [vmem:[#allocation5 + $0x130] ss:$24 sps:$4 sm:$0xff]  }
  0xe9   :  { %2120 = vmatprep.subr.bf16.mxu0 %v8033_v60  ;;  %v8111_v60 = vld [vmem:[#allocation5 + $0x104] ss:$24 sps:$4 sm:$0xff]  }
  0xea   :  { %2170 = vmatpush1.bf16.msra.mxu1 %v8028_v61  ;;  %v8106_v61 = vld [vmem:[#allocation5 + $0x430] ss:$24 sps:$4 sm:$0xff]  }
  0xeb   :  { %2171 = vmatprep.subr.bf16.mxu1 %v8036_v62  ;;  %v8114_v62 = vld [vmem:[#allocation5 + $0x404] ss:$24 sps:$4 sm:$0xff]  }
  0xec   :  { %2121 = vmatpush1.bf16.msra.mxu0 %v8031_v63  ;;  %v8109_v63 = vld [vmem:[#allocation5 + $0x100] ss:$24 sps:$4 sm:$0xff]  }
  0xed   :  { %2122 = vmatprep.subr.bf16.mxu0 %v8039_v0  ;;  %v8117_v0 = vld [vmem:[#allocation5 + $0xd4] ss:$24 sps:$4 sm:$0xff]  }
  0xee   :  { %2172 = vmatpush1.bf16.msra.mxu1 %v8034_v1  ;;  %v8112_v1 = vld [vmem:[#allocation5 + $0x400] ss:$24 sps:$4 sm:$0xff]  }
  0xef   :  { %2173 = vmatprep.subr.bf16.mxu1 %v8042_v2  ;;  %v8120_v2 = vld [vmem:[#allocation5 + $0x3d4] ss:$24 sps:$4 sm:$0xff]  }
  0xf0   :  { %2123 = vmatpush1.bf16.msra.mxu0 %v8037_v3  ;;  %v8115_v3 = vld [vmem:[#allocation5 + $0xd0] ss:$24 sps:$4 sm:$0xff]  }
  0xf1   :  { %2124 = vmatprep.subr.bf16.mxu0 %v8045_v4  ;;  %v8123_v4 = vld [vmem:[#allocation5 + $0xa4] ss:$24 sps:$4 sm:$0xff]  }
  0xf2   :  { %2174 = vmatpush1.bf16.msra.mxu1 %v8040_v5  ;;  %v8118_v5 = vld [vmem:[#allocation5 + $0x3d0] ss:$24 sps:$4 sm:$0xff]  }
  0xf3   :  { %2175 = vmatprep.subr.bf16.mxu1 %v8048_v6  ;;  %v8126_v6 = vld [vmem:[#allocation5 + $0x3a4] ss:$24 sps:$4 sm:$0xff]  }
  0xf4   :  { %2125 = vmatpush1.bf16.msra.mxu0 %v8043_v7  ;;  %v8121_v7 = vld [vmem:[#allocation5 + $0xa0] ss:$24 sps:$4 sm:$0xff]  }
  0xf5   :  { %2126 = vmatprep.subr.bf16.mxu0 %v8051_v8  ;;  %v8129_v8 = vld [vmem:[#allocation5 + $0x74] ss:$24 sps:$4 sm:$0xff]  }
  0xf6   :  { %2176 = vmatpush1.bf16.msra.mxu1 %v8046_v9  ;;  %v8124_v9 = vld [vmem:[#allocation5 + $0x3a0] ss:$24 sps:$4 sm:$0xff]  }
  0xf7   :  { %2177 = vmatprep.subr.bf16.mxu1 %v8054_v10  ;;  %v8132_v10 = vld [vmem:[#allocation5 + $0x374] ss:$24 sps:$4 sm:$0xff]  }
  0xf8   :  { %2127 = vmatpush2.bf16.msra.mxu0 %v8049_v12  ;;  %v8135_v12 = vld [vmem:[#allocation5 + $0x44] ss:$24 sps:$4 sm:$0xff]  }
  0xf9   :  { %2128 = vmatprep.subr.bf16.mxu0 %v8057_v13  ;;  %v8130_v13 = vld [vmem:[#allocation5 + $0x370] ss:$24 sps:$4 sm:$0xff]  }
  0xfa   :  { %2178 = vmatpush2.bf16.msra.mxu1 %v8052_v15  ;;  %v8138_v15 = vld [vmem:[#allocation5 + $0x344] ss:$24 sps:$4 sm:$0xff]  }
  0xfb   :  { %2179 = vmatprep.subr.bf16.mxu1 %v8060_v16  ;;  %v8141_v16 = vld [vmem:[#allocation5 + $0x14] ss:$24 sps:$4 sm:$0xff]  }
  0xfc   :  { %2129 = vmatpush2.bf16.msra.mxu0 %v8055_v17  ;;  %v8136_v17 = vld [vmem:[#allocation5 + $0x340] ss:$24 sps:$4 sm:$0xff]  }
  0xfd   :  { %2130 = vmatprep.subr.bf16.mxu0 %v8063_v18  ;;  %v8144_v18 = vld [vmem:[#allocation5 + $0x314] ss:$24 sps:$4 sm:$0xff]  }
  0xfe   :  { %2180 = vmatpush2.bf16.msra.mxu1 %v8058_v19  ;;  %v8139_v19 = vld [vmem:[#allocation5 + $0x10] ss:$24 sps:$4 sm:$0xff]  }
  0xff   :  { %2181 = vmatprep.subr.bf16.mxu1 %v8066_v20  ;;  %v8147_v20 = vld [vmem:[#allocation5 + $0x2e4] ss:$24 sps:$4 sm:$0xff]  }
 0x100   :  { %2131 = vmatpush2.bf16.msra.mxu0 %v8061_v21  ;;  %v8142_v21 = vld [vmem:[#allocation5 + $0x310] ss:$24 sps:$4 sm:$0xff]  }
 0x101   :  { %2132 = vmatprep.subr.bf16.mxu0 %v8069_v22  ;;  %v8150_v22 = vld [vmem:[#allocation5 + $0x5e4] ss:$24 sps:$4 sm:$0xff]  }
 0x102   :  { %2182 = vmatpush2.bf16.msra.mxu1 %v8064_v23  ;;  %v8145_v23 = vld [vmem:[#allocation5 + $0x2e0] ss:$24 sps:$4 sm:$0xff]  }
 0x103   :  { %2183 = vmatprep.subr.bf16.mxu1 %v8072_v24  ;;  %v8153_v24 = vld [vmem:[#allocation5 + $0x2b4] ss:$24 sps:$4 sm:$0xff]  }
 0x104   :  { %2133 = vmatpush2.bf16.msra.mxu0 %v8067_v25  ;;  %v8148_v25 = vld [vmem:[#allocation5 + $0x5e0] ss:$24 sps:$4 sm:$0xff]  }
 0x105   :  { %2134 = vmatprep.subr.bf16.mxu0 %v8075_v26  ;;  %v8156_v26 = vld [vmem:[#allocation5 + $0x5b4] ss:$24 sps:$4 sm:$0xff]  }
 0x106   :  { %2184 = vmatpush2.bf16.msra.mxu1 %v8070_v27  ;;  %v8151_v27 = vld [vmem:[#allocation5 + $0x2b0] ss:$24 sps:$4 sm:$0xff]  }
 0x107   :  { %2185 = vmatprep.subr.bf16.mxu1 %v8078_v28  ;;  %v8159_v28 = vld [vmem:[#allocation5 + $0x284] ss:$24 sps:$4 sm:$0xff]  }
 0x108   :  { %2135 = vmatpush2.bf16.msra.mxu0 %v8073_v29  ;;  %v8154_v29 = vld [vmem:[#allocation5 + $0x5b0] ss:$24 sps:$4 sm:$0xff]  }
 0x109   :  { %2136 = vmatprep.subr.bf16.mxu0 %v8081_v30  ;;  %v8162_v30 = vld [vmem:[#allocation5 + $0x584] ss:$24 sps:$4 sm:$0xff]  }
 0x10a   :  { %2186 = vmatpush2.bf16.msra.mxu1 %v8076_v33  ;;  %v8157_v33 = vld [vmem:[#allocation5 + $0x280] ss:$24 sps:$4 sm:$0xff]  }
 0x10b   :  { %2187 = vmatprep.subr.bf16.mxu1 %v8084_v34  ;;  %v8160_v34 = vld [vmem:[#allocation5 + $0x580] ss:$24 sps:$4 sm:$0xff]  }
 0x10c   :  { %2137 = vmatpush2.bf16.msra.mxu0 %v8079_v37  ;;  %v8165_v37 = vld [vmem:[#allocation5 + $0x254] ss:$24 sps:$4 sm:$0xff]  }
 0x10d   :  { %2138 = vmatprep.subr.bf16.mxu0 %v8087_v38  ;;  %v8163_v38 = vld [vmem:[#allocation5 + $0x250] ss:$24 sps:$4 sm:$0xff]  }
 0x10e   :  { %2188 = vmatpush2.bf16.msra.mxu1 %v8082_v39  ;;  %v8168_v39 = vld [vmem:[#allocation5 + $0x554] ss:$24 sps:$4 sm:$0xff]  }
 0x10f   :  { %2189 = vmatprep.subr.bf16.mxu1 %v8090_v40  ;;  %v8166_v40 = vld [vmem:[#allocation5 + $0x550] ss:$24 sps:$4 sm:$0xff]  }
 0x110   :  { %2139 = vmatpush2.bf16.msra.mxu0 %v8085_v41  ;;  %v8171_v41 = vld [vmem:[#allocation5 + $0x224] ss:$24 sps:$4 sm:$0xff]  }
 0x111   :  { %2140 = vmatprep.subr.bf16.mxu0 %v8093_v43  ;;  %v8174_v43 = vld [vmem:[#allocation5 + $0x524] ss:$24 sps:$4 sm:$0xff]  }
 0x112   :  { %2190 = vmatpush2.bf16.msra.mxu1 %v8088_v44  ;;  %v8169_v44 = vld [vmem:[#allocation5 + $0x220] ss:$24 sps:$4 sm:$0xff]  }
 0x113   :  { %2191 = vmatprep.subr.bf16.mxu1 %v8096_v47  ;;  %v8172_v47 = vld [vmem:[#allocation5 + $0x520] ss:$24 sps:$4 sm:$0xff]  }
 0x114   :  { %2141 = vmatpush2.bf16.msra.mxu0 %v8091_v48  ;;  %v8177_v48 = vld [vmem:[#allocation5 + $0x1f4] ss:$24 sps:$4 sm:$0xff]  }
 0x115   :  { %2212 = vmatprep.subr.bf16.mxu0 %v8099_v50  ;;  %v8180_v50 = vld [vmem:[#allocation5 + $0x4f4] ss:$24 sps:$4 sm:$0xff]  }
 0x116   :  { %2192 = vmatpush2.bf16.msra.mxu1 %v8094_v51  ;;  %v8175_v51 = vld [vmem:[#allocation5 + $0x1f0] ss:$24 sps:$4 sm:$0xff]  }
 0x117   :  { %2143 = vmatmul.mubr.bf16.vlgmr.msra.gmra.mxu0 %v9361_v14  ;;  %2263 = vmatprep.subr.bf16.mxu1 %v8102_v52  ;;  %v8183_v52 = vld [vmem:[#allocation5 + $0x1c4] ss:$24 sps:$4 sm:$0xff]  }
 0x118   :  { %2213 = vmatpush1.bf16.msra.mxu0 %v8097_v54  ;;  %2152 = vmatprep.mubr.bf16.mxu0 %v9371_v42  ;;  %v8178_v54 = vld [vmem:[#allocation5 + $0x4f0] ss:$24 sps:$4 sm:$0xff]  }
 0x119   :  { %2194 = vmatmul.mubr.bf16.vlgmr.msra.gmra.mxu1 %v9381_v31  ;;  %2214 = vmatprep.subr.bf16.mxu0 %v8105_v56  ;;  %v8186_v56 = vld [vmem:[#allocation5 + $0x4c4] ss:$24 sps:$4 sm:$0xff]  }
 0x11a   :  { %2264 = vmatpush1.bf16.msra.mxu1 %v8100_v57  ;;  %2203 = vmatprep.mubr.bf16.mxu1 %v9383_v35  ;;  %v8181_v57 = vld [vmem:[#allocation5 + $0x1c0] ss:$24 sps:$4 sm:$0xff]  }
 0x11b   :  { %2265 = vmatprep.subr.bf16.mxu1 %v8108_v58  ;;  %v8189_v58 = vld [vmem:[#allocation5 + $0x194] ss:$24 sps:$4 sm:$0xff]  }
 0x11c   :  { %2215 = vmatpush1.bf16.msra.mxu0 %v8103_v59  ;;  %v8184_v59 = vld [vmem:[#allocation5 + $0x4c0] ss:$24 sps:$4 sm:$0xff]  }
 0x11d   :  { %2216 = vmatprep.subr.bf16.mxu0 %v8111_v60  ;;  %v8192_v60 = vld [vmem:[#allocation5 + $0x494] ss:$24 sps:$4 sm:$0xff]  }
 0x11e   :  { %2266 = vmatpush1.bf16.msra.mxu1 %v8106_v61  ;;  %v8187_v61 = vld [vmem:[#allocation5 + $0x190] ss:$24 sps:$4 sm:$0xff]  }
 0x11f   :  { %2267 = vmatprep.subr.bf16.mxu1 %v8114_v62  ;;  %2153 = vmatmul.mubr.bf16.gmra.mxu0 %v9374_v45  ;;  %v8195_v62 = vld [vmem:[#allocation5 + $0x764] ss:$24 sps:$4 sm:$0xff]  }
 0x120   :  { %2217 = vmatpush1.bf16.msra.mxu0 %v8109_v63  ;;  %2244 = vmatprep.mubr.bf16.mxu0 %v9353_v49  ;;  %v8127_v49 = vld [vmem:[#allocation5 + $0x70] ss:$24 sps:$4 sm:$0xff]  }
 0x121   :  { %2218 = vmatprep.subr.bf16.mxu0 %v8117_v0  ;;  %2204 = vmatmul.mubr.bf16.gmra.mxu1 %v9389_v46  ;;  %v8190_v63 = vld [vmem:[#allocation5 + $0x490] ss:$24 sps:$4 sm:$0xff]  }
 0x122   :  { %2268 = vmatpush1.bf16.msra.mxu1 %v8112_v1  ;;  %2295 = vmatprep.mubr.bf16.mxu1 %v9356_v55  ;;  %v8133_v55 = vld [vmem:[#allocation5 + $0x40] ss:$24 sps:$4 sm:$0xff]  }
 0x123   :  { %2269 = vmatprep.subr.bf16.mxu1 %v8120_v2  ;;  %v8207_v0 = vld [vmem:[#allocation8 + $0x154] ss:$24 sps:$4 sm:$0xff]  }
 0x124   :  { %2219 = vmatpush1.bf16.msra.mxu0 %v8115_v3  ;;  %v8193_v1 = vld [vmem:[#allocation5 + $0x760] ss:$24 sps:$4 sm:$0xff]   ;;  %v8198_v2 = vld [vmem:[#allocation5 + $0x734] ss:$24 sps:$4 sm:$0xff]  }
 0x125   :  { %2220 = vmatprep.subr.bf16.mxu0 %v8123_v4  ;;  %v8205_v3 = vld [vmem:[#allocation8 + $0x150] ss:$24 sps:$4 sm:$0xff]   ;;  %v8213_v4 = vld [vmem:[#allocation8 + $0x124] ss:$24 sps:$4 sm:$0xff]  }
 0x126   :  { %2270 = vmatpush1.bf16.msra.mxu1 %v8118_v5  ;;  %v8196_v5 = vld [vmem:[#allocation5 + $0x730] ss:$24 sps:$4 sm:$0xff]  }
 0x127   :  { %2271 = vmatprep.subr.bf16.mxu1 %v8126_v6  ;;  %v8201_v6 = vld [vmem:[#allocation5 + $0x704] ss:$24 sps:$4 sm:$0xff]  }
 0x128   :  { %2221 = vmatpush1.bf16.msra.mxu0 %v8121_v7  ;;  %v8211_v7 = vld [vmem:[#allocation8 + $0x120] ss:$24 sps:$4 sm:$0xff]  }
 0x129   :  { %2222 = vmatprep.subr.bf16.mxu0 %v8129_v8  ;;  %v8219_v8 = vld [vmem:[#allocation8 + $0xf4] ss:$24 sps:$4 sm:$0xff]  }
 0x12a   :  { %2272 = vmatpush1.bf16.msra.mxu1 %v8124_v9  ;;  %v8199_v9 = vld [vmem:[#allocation5 + $0x700] ss:$24 sps:$4 sm:$0xff]  }
 0x12b   :  { %2273 = vmatprep.subr.bf16.mxu1 %v8132_v10 }
 0x12c   :  { %2223 = vmatpush1.bf16.msra.mxu0 %v8127_v49  ;;  %v8204_v49 = vld [vmem:[#allocation5 + $0x6d4] ss:$24 sps:$4 sm:$0xff]  }
 0x12d   :  { %2224 = vmatprep.subr.bf16.mxu0 %v8135_v12  ;;  %v8225_v12 = vld [vmem:[#allocation8 + $0xc4] ss:$24 sps:$4 sm:$0xff]  }
 0x12e   :  { %2274 = vmatpush1.bf16.msra.mxu1 %v8130_v13  ;;  %v8202_v13 = vld [vmem:[#allocation5 + $0x6d0] ss:$24 sps:$4 sm:$0xff]  }
 0x12f   :  { %2275 = vmatprep.subr.bf16.mxu1 %v8138_v15 }
 0x130   :  { %2225 = vmatpush1.bf16.msra.mxu0 %v8133_v55  ;;  %v8231_v55 = vld [vmem:[#allocation8 + $0x94] ss:$24 sps:$4 sm:$0xff]  }
 0x131   :  { %2226 = vmatprep.subr.bf16.mxu0 %v8141_v16  ;;  %v8208_v16 = vld [vmem:[#allocation5 + $0x6a0] ss:$24 sps:$4 sm:$0xff]  }
 0x132   :  { %2276 = vmatpush1.bf16.msra.mxu1 %v8136_v17 }
 0x133   :  { %2277 = vmatprep.subr.bf16.mxu1 %v8144_v18 }
 0x134   :  { %2227 = vmatpush1.bf16.msra.mxu0 %v8139_v19  ;;  %v8216_v19 = vld [vmem:[#allocation5 + $0x674] ss:$24 sps:$4 sm:$0xff]  }
 0x135   :  { %2228 = vmatprep.subr.bf16.mxu0 %v8147_v20  ;;  %v8229_v20 = vld [vmem:[#allocation8 + $0x90] ss:$24 sps:$4 sm:$0xff]  }
 0x136   :  { %2278 = vmatpush1.bf16.msra.mxu1 %v8142_v21  ;;  %v8214_v21 = vld [vmem:[#allocation5 + $0x670] ss:$24 sps:$4 sm:$0xff]  }
 0x137   :  { %2279 = vmatprep.subr.bf16.mxu1 %v8150_v22 }
 0x138   :  { %2229 = vmatpush2.bf16.msra.mxu0 %v8145_v23  ;;  %v8235_v23 = vld [vmem:[#allocation8 + $0x60] ss:$24 sps:$4 sm:$0xff]  }
 0x139   :  { %2230 = vmatprep.subr.bf16.mxu0 %v8153_v24  ;;  %v8243_v24 = vld [vmem:[#allocation8 + $0x34] ss:$24 sps:$4 sm:$0xff]  }
 0x13a   :  { %2280 = vmatpush2.bf16.msra.mxu1 %v8148_v25 }
 0x13b   :  { %2281 = vmatprep.subr.bf16.mxu1 %v8156_v26  ;;  %v8220_v26 = vld [vmem:[#allocation5 + $0x640] ss:$24 sps:$4 sm:$0xff]  }
 0x13c   :  { %2231 = vmatpush2.bf16.msra.mxu0 %v8151_v27 }
 0x13d   :  { %2232 = vmatprep.subr.bf16.mxu0 %v8159_v28 }
 0x13e   :  { %2282 = vmatpush2.bf16.msra.mxu1 %v8154_v29  ;;  %v8228_v29 = vld [vmem:[#allocation5 + $0x614] ss:$24 sps:$4 sm:$0xff]  }
 0x13f   :  { %2283 = vmatprep.subr.bf16.mxu1 %v8162_v30  ;;  %v8241_v30 = vld [vmem:[#allocation8 + $0x30] ss:$24 sps:$4 sm:$0xff]  }
 0x140   :  { %2233 = vmatpush2.bf16.msra.mxu0 %v8157_v33  ;;  %v8249_v33 = vld [vmem:[#allocation8 + $0x4] ss:$24 sps:$4 sm:$0xff]  }
 0x141   :  { %2234 = vmatprep.subr.bf16.mxu0 %v8165_v37 }
 0x142   :  { %2284 = vmatpush2.bf16.msra.mxu1 %v8160_v34 }
 0x143   :  { %2285 = vmatprep.subr.bf16.mxu1 %v8168_v39 }
 0x144   :  { %2235 = vmatpush2.bf16.msra.mxu0 %v8163_v38  ;;  %v8226_v38 = vld [vmem:[#allocation5 + $0x610] ss:$24 sps:$4 sm:$0xff]  }
 0x145   :  { %2236 = vmatprep.subr.bf16.mxu0 %v8171_v41  ;;  %v8234_v41 = vld [vmem:[#allocation5 + $0x8e4] ss:$24 sps:$4 sm:$0xff]  }
 0x146   :  { %2286 = vmatpush2.bf16.msra.mxu1 %v8166_v40 }
 0x147   :  { %2287 = vmatprep.subr.bf16.mxu1 %v8174_v43  ;;  %v8247_v43 = vld [vmem:[#allocation8] ss:$24 sps:$4 sm:$0xff]  }
 0x148   :  { %2237 = vmatpush2.bf16.msra.mxu0 %v8169_v44  ;;  %v8255_v44 = vld [vmem:[#allocation8 + $0x2d4] ss:$24 sps:$4 sm:$0xff]  }
 0x149   :  { %2238 = vmatprep.subr.bf16.mxu0 %v8177_v48  ;;  %v8232_v48 = vld [vmem:[#allocation5 + $0x8e0] ss:$24 sps:$4 sm:$0xff]  }
 0x14a   :  { %2288 = vmatpush2.bf16.msra.mxu1 %v8172_v47 }
 0x14b   :  { %2289 = vmatprep.subr.bf16.mxu1 %v8180_v50 }
 0x14c   :  { %2239 = vmatpush2.bf16.msra.mxu0 %v8175_v51  ;;  %v8240_v51 = vld [vmem:[#allocation5 + $0x8b4] ss:$24 sps:$4 sm:$0xff]  }
 0x14d   :  { %2240 = vmatprep.subr.bf16.mxu0 %v8183_v52  ;;  %v8253_v52 = vld [vmem:[#allocation8 + $0x2d0] ss:$24 sps:$4 sm:$0xff]  }
 0x14e   :  { %2290 = vmatpush2.bf16.msra.mxu1 %v8178_v54  ;;  %v8261_v54 = vld [vmem:[#allocation8 + $0x2a4] ss:$24 sps:$4 sm:$0xff]  }
 0x14f   :  { %2291 = vmatprep.subr.bf16.mxu1 %v8186_v56  ;;  %v8238_v56 = vld [vmem:[#allocation5 + $0x8b0] ss:$24 sps:$4 sm:$0xff]  }
 0x150   :  { %2241 = vmatpush2.bf16.msra.mxu0 %v8181_v57  ;;  %v8246_v57 = vld [vmem:[#allocation5 + $0x884] ss:$24 sps:$4 sm:$0xff]  }
 0x151   :  { %2242 = vmatprep.subr.bf16.mxu0 %v8189_v58  ;;  %v8259_v58 = vld [vmem:[#allocation8 + $0x2a0] ss:$24 sps:$4 sm:$0xff]  }
 0x152   :  { %2292 = vmatpush2.bf16.msra.mxu1 %v8184_v59  ;;  %v8267_v59 = vld [vmem:[#allocation8 + $0x274] ss:$24 sps:$4 sm:$0xff]  }
 0x153   :  { %2293 = vmatprep.subr.bf16.mxu1 %v8192_v60  ;;  %v8244_v60 = vld [vmem:[#allocation5 + $0x880] ss:$24 sps:$4 sm:$0xff]  }
 0x154   :  { %2243 = vmatpush2.bf16.msra.mxu0 %v8187_v61  ;;  %v8252_v61 = vld [vmem:[#allocation5 + $0x854] ss:$24 sps:$4 sm:$0xff]  }
 0x155   :  { %2314 = vmatprep.subr.bf16.mxu0 %v8195_v62  ;;  %v8265_v62 = vld [vmem:[#allocation8 + $0x270] ss:$24 sps:$4 sm:$0xff]  }
 0x156   :  { %2294 = vmatpush2.bf16.msra.mxu1 %v8190_v63  ;;  %v8273_v63 = vld [vmem:[#allocation8 + $0x244] ss:$24 sps:$4 sm:$0xff]  }
 0x157   :  { %2245 = vmatmul.mubr.bf16.vlgmr.msra.gmra.mxu0 %v9359_v11  ;;  %4155 = vmatprep.subr.bf16.mxu1 %v8207_v0  ;;  %v9407_v10 = vpop.f32.mrf.mxu0  ;;  %v8217_v11 = vld [vmem:[#allocation8 + $0xf0] ss:$24 sps:$4 sm:$0xff]  }
 0x158   :  { %2315 = vmatpush1.bf16.msra.mxu0 %v8193_v1  ;;  %2254 = vmatprep.mubr.bf16.mxu0 %v9365_v32  ;;  %v9411_v32 = vpop.f32.mrf.mxu1  ;;  %v8250_v0 = vld [vmem:[#allocation5 + $0x850] ss:$24 sps:$4 sm:$0xff]   ;;  %v8258_v1 = vld [vmem:[#allocation5 + $0x824] ss:$24 sps:$4 sm:$0xff]  }
 0x159   :  { %2296 = vmatmul.mubr.bf16.vlgmr.msra.gmra.mxu1 %v9361_v14  ;;  %2316 = vmatprep.subr.bf16.mxu0 %v8198_v2  ;;  %v9409_v15 = vpop.f32.mrf.mxu0  ;;  %v8210_v14 = vld [vmem:[#allocation5 + $0x6a4] ss:$24 sps:$4 sm:$0xff]  }
 0x15a   :  { %4156 = vmatpush1.bf16.msra.mxu1 %v8205_v3  ;;  %2305 = vmatprep.mubr.bf16.mxu1 %v9371_v42  ;;  %v8223_v42 = vld [vmem:[#allocation8 + $0xc0] ss:$24 sps:$4 sm:$0xff]   ;;  %v9418_v18 = vpop.f32.mrf.mxu1  ;;  %v8279_v3 = vld [vmem:[#allocation8 + $0x214] ss:$24 sps:$4 sm:$0xff]  }
 0x15b   :  { %4157 = vmatprep.subr.bf16.mxu1 %v8213_v4  ;;  %v9416_v17 = vpop.f32.mrf.mxu0  ;;  %v8271_v2 = vld [vmem:[#allocation8 + $0x240] ss:$24 sps:$4 sm:$0xff]  }
 0x15c   :  { %2317 = vmatpush1.bf16.msra.mxu0 %v8196_v5  ;;  %v8256_v4 = vld [vmem:[#allocation5 + $0x820] ss:$24 sps:$4 sm:$0xff]   ;;  %v8264_v5 = vld [vmem:[#allocation5 + $0x7f4] ss:$24 sps:$4 sm:$0xff]  }
 0x15d   :  { %2318 = vmatprep.subr.bf16.mxu0 %v8201_v6  ;;  %v9420_v22 = vpop.f32.mrf.mxu0  ;;  %v8277_v6 = vld [vmem:[#allocation8 + $0x210] ss:$24 sps:$4 sm:$0xff]  }
 0x15e   :  { %4158 = vmatpush1.bf16.msra.mxu1 %v8211_v7  ;;  %v8282_v7 = vld [vmem:[#allocation8 + $0x1e4] ss:$24 sps:$4 sm:$0xff]  }
 0x15f   :  { %4159 = vmatprep.subr.bf16.mxu1 %v8219_v8  ;;  %2255 = vmatmul.mubr.bf16.gmra.mxu0 %v9368_v36  ;;  %v8237_v36 = vld [vmem:[#allocation8 + $0x64] ss:$24 sps:$4 sm:$0xff]   ;;  %v9424_v25 = vpop.f32.mrf.mxu0  ;;  %v436_v8 = vlaneseq }
 0x160   :  { %2319 = vmatpush1.bf16.msra.mxu0 %v8199_v9  ;;  %2346 = vmatprep.mubr.bf16.mxu0 %v9378_v53  ;;  %v9422_v53 = vpop.f32.mrf.mxu1  ;;  %v8262_v9 = vld [vmem:[#allocation5 + $0x7f0] ss:$24 sps:$4 sm:$0xff]  }
 0x161   :  { %2320 = vmatprep.subr.bf16.mxu0 %v8204_v49  ;;  %2306 = vmatmul.mubr.bf16.gmra.mxu1 %v9374_v45  ;;  %v8222_v45 = vld [vmem:[#allocation5 + $0x644] ss:$24 sps:$4 sm:$0xff]   ;;  %v9428_v28 = vpop.f32.mrf.mxu0 }
 0x162   :  { %4160 = vmatpush1.bf16.msra.mxu1 %v8217_v11  ;;  %v9426_v27 = vpop.f32.mrf.mxu1  ;;  %v8270_v49 = vld [vmem:[#allocation5 + $0x7c4] ss:$24 sps:$4 sm:$0xff]  }
 0x163   :  { %4161 = vmatprep.subr.bf16.mxu1 %v8225_v12  ;;  %v1954_v34 = vpop.f32.mrf.mxu0  ;;  %v8280_v11 = vld [vmem:[#allocation8 + $0x1e0] ss:$24 sps:$4 sm:$0xff]   ;;  %v8285_v12 = vld [vmem:[#allocation8 + $0x1b4] ss:$24 sps:$4 sm:$0xff]  }
 0x164   :  { %2321 = vmatpush1.bf16.msra.mxu0 %v8202_v13  ;;  %v9430_v37 = vpop.f32.mrf.mxu1  ;;  %v9434_v13 = vshrl.u32 %v436_v8, 7 }
 0x165   :  { %2322 = vmatprep.subr.bf16.mxu0 %v8210_v14  ;;  %v1955_v39 = vpop.f32.mrf.mxu0  ;;  %v8268_v14 = vld [vmem:[#allocation5 + $0x7c0] ss:$24 sps:$4 sm:$0xff]  }
 0x166   :  { %4162 = vmatpush1.bf16.msra.mxu1 %v8223_v42  ;;  %v9432_v40 = vpop.f32.mrf.mxu1  ;;  %v8276_v42 = vld [vmem:[#allocation5 + $0x794] ss:$24 sps:$4 sm:$0xff]  }
 0x167   :  { %4163 = vmatprep.subr.bf16.mxu1 %v8231_v55  ;;  %v8283_v55 = vld [vmem:[#allocation8 + $0x1b0] ss:$24 sps:$4 sm:$0xff]  }
 0x168   :  { %2323 = vmatpush1.bf16.msra.mxu0 %v8208_v16  ;;  %v2005_v47 = vpop.f32.mrf.mxu1  ;;  %v9436_v16 = vld [vmem:[#allocation7] sm:$0x3f] }
 0x169   :  { %2324 = vmatprep.subr.bf16.mxu0 %v8216_v19  ;;  %v8288_v19 = vld [vmem:[#allocation8 + $0x184] ss:$24 sps:$4 sm:$0xff]   ;;  %v8297_v47 = vld [vmem:[#allocation8 + $0x3f4] ss:$24 sps:$4 sm:$0xff]  }
 0x16a   :  { %4164 = vmatpush1.bf16.msra.mxu1 %v8229_v20  ;;  %v2006_v50 = vpop.f32.mrf.mxu1  ;;  %v9439_v20 = vsub.s32 1, %v9434_v13 }
 0x16b   :  { %4165 = vmatprep.subr.bf16.mxu1 %v8237_v36  ;;  %v8274_v36 = vld [vmem:[#allocation5 + $0x790] ss:$24 sps:$4 sm:$0xff]  }
 0x16c   :  { %2325 = vmatpush1.bf16.msra.mxu0 %v8214_v21  ;;  %v9442_v21 = vsub.s32 0, %v9434_v13  ;;  %v8295_v50 = vld [vmem:[#allocation8 + $0x3f0] ss:$24 sps:$4 sm:$0xff]  }
 0x16d   :  { %2326 = vmatprep.subr.bf16.mxu0 %v8222_v45  ;;  %v8286_v45 = vld [vmem:[#allocation8 + $0x180] ss:$24 sps:$4 sm:$0xff]  }
 0x16e   :  { %4166 = vmatpush1.bf16.msra.mxu1 %v8235_v23  ;;  %v8291_v23 = vld [vmem:[#allocation8 + $0x454] ss:$24 sps:$4 sm:$0xff]  }
 0x16f   :  { %4167 = vmatprep.subr.bf16.mxu1 %v8243_v24  ;;  %v443_v24 = vrot.slane %v9436_v16, %v9439_v20 }
 0x170   :  { %2327 = vmatpush1.bf16.msra.mxu0 %v8220_v26  ;;  %v439_v26 = vrot.slane %v9436_v16, %v9442_v21 }
 0x171   :  { %2328 = vmatprep.subr.bf16.mxu0 %v8228_v29  ;;  %v8289_v29 = vld [vmem:[#allocation8 + $0x450] ss:$24 sps:$4 sm:$0xff]  }
 0x172   :  { %4168 = vmatpush1.bf16.msra.mxu1 %v8241_v30  ;;  %v8294_v30 = vld [vmem:[#allocation8 + $0x424] ss:$24 sps:$4 sm:$0xff]   ;;  %v1945_v34 = vadd.f32 %v9416_v17, %v439_v26  ;;  %v1941_v39 = vadd.f32 %v9407_v10, %v439_v26 }
 0x173   :  { %4169 = vmatprep.subr.bf16.mxu1 %v8249_v33  ;;  %v1943_v33 = vadd.f32 %v9409_v15, %v443_v24 }
 0x174   :  { %2329 = vmatpush1.bf16.msra.mxu0 %v8226_v38  ;;  %v8292_v38 = vld [vmem:[#allocation8 + $0x420] ss:$24 sps:$4 sm:$0xff]   ;;  %v1996_v17 = vadd.f32 %v9422_v53, %v1945_v34  ;;  %v1992_v10 = vadd.f32 %v9411_v32, %v1941_v39  ;;  %v8312_v34 = vld [vmem:[#allocation8 + $0x304] ss:$24 sps:$4 sm:$0xff]  }
 0x175   :  { %2330 = vmatprep.subr.bf16.mxu0 %v8234_v41  ;;  %v1994_v15 = vadd.f32 %v9418_v18, %v1943_v33  ;;  %v8300_v18 = vld [vmem:[#allocation8 + $0x3c4] ss:$24 sps:$4 sm:$0xff]   ;;  %v8298_v32 = vld [vmem:[#allocation8 + $0x3c0] ss:$24 sps:$4 sm:$0xff]   ;;  %v8397_v33 = vld [vmem:[#allocation8 + $0x6f0] ss:$24 sps:$4 sm:$0xff]  }
 0x176   :  { %4170 = vmatpush1.bf16.msra.mxu1 %v8247_v43  ;;  %v1947_v43 = vadd.f32 %v9420_v22, %v443_v24  ;;  %v8310_v39 = vld [vmem:[#allocation8 + $0x300] ss:$24 sps:$4 sm:$0xff]  }
 0x177   :  { %4171 = vmatprep.subr.bf16.mxu1 %v8255_v44 }
 0x178   :  { %2331 = vmatpush2.bf16.msra.mxu0 %v8232_v48 }
 0x179   :  { %2332 = vmatprep.subr.bf16.mxu0 %v8240_v51 }
 0x17a   :  { %4172 = vmatpush2.bf16.msra.mxu1 %v8253_v52 }
 0x17b   :  { %4173 = vmatprep.subr.bf16.mxu1 %v8261_v54 }
 0x17c   :  { %2333 = vmatpush2.bf16.msra.mxu0 %v8238_v56  ;;  %v1951_v56 = vadd.f32 %v9424_v25, %v439_v26  ;;  %v8303_v25 = vld [vmem:[#allocation8 + $0x394] ss:$24 sps:$4 sm:$0xff]   ;;  %v8307_v26 = vld [vmem:[#allocation8 + $0x330] ss:$24 sps:$4 sm:$0xff]  }
 0x17d   :  { %2334 = vmatprep.subr.bf16.mxu0 %v8246_v57 }
 0x17e   :  { %4174 = vmatpush2.bf16.msra.mxu1 %v8259_v58 }
 0x17f   :  { %4175 = vmatprep.subr.bf16.mxu1 %v8267_v59 }
 0x180   :  { %2335 = vmatpush2.bf16.msra.mxu0 %v8244_v60 }
 0x181   :  { %2336 = vmatprep.subr.bf16.mxu0 %v8252_v61 }
 0x182   :  { %4176 = vmatpush2.bf16.msra.mxu1 %v8265_v62 }
 0x183   :  { %4177 = vmatprep.subr.bf16.mxu1 %v8273_v63 }
 0x184   :  { %2337 = vmatpush2.bf16.msra.mxu0 %v8250_v0  ;;  %v2002_v0 = vadd.f32 %v9430_v37, %v1951_v56  ;;  %v8385_v37 = vld [vmem:[#allocation8 + $0x750] ss:$24 sps:$4 sm:$0xff]  }
 0x185   :  { %2338 = vmatprep.subr.bf16.mxu0 %v8258_v1  ;;  %v8421_v56 = vld [vmem:[#allocation8 + $0x630] ss:$24 sps:$4 sm:$0xff]  }
 0x186   :  { %4178 = vmatpush2.bf16.msra.mxu1 %v8271_v2 }
 0x187   :  { %4179 = vmatprep.subr.bf16.mxu1 %v8279_v3 }
 0x188   :  { %2339 = vmatpush2.bf16.msra.mxu0 %v8256_v4 }
 0x189   :  { %2340 = vmatprep.subr.bf16.mxu0 %v8264_v5 }
 0x18a   :  { %4180 = vmatpush2.bf16.msra.mxu1 %v8277_v6  ;;  %v8301_v6 = vld [vmem:[#allocation8 + $0x390] ss:$24 sps:$4 sm:$0xff]  }
 0x18b   :  { %4181 = vmatprep.subr.bf16.mxu1 %v8282_v7 }
 0x18c   :  { %2341 = vmatpush2.bf16.msra.mxu0 %v8262_v9  ;;  %v8387_v9 = vld [vmem:[#allocation8 + $0x754] ss:$24 sps:$4 sm:$0xff]  }
 0x18d   :  { %2342 = vmatprep.subr.bf16.mxu0 %v8270_v49 }
 0x18e   :  { %4182 = vmatpush2.bf16.msra.mxu1 %v8280_v11  ;;  %v8306_v11 = vld [vmem:[#allocation8 + $0x364] ss:$24 sps:$4 sm:$0xff]  }
 0x18f   :  { %4183 = vmatprep.subr.bf16.mxu1 %v8285_v12 }
 0x190   :  { %2343 = vmatpush2.bf16.msra.mxu0 %v8268_v14 }
 0x191   :  { %2344 = vmatprep.subr.bf16.mxu0 %v8276_v42 }
 0x192   :  { %4184 = vmatpush2.bf16.msra.mxu1 %v8283_v55 }
 0x193   :  { %4185 = vmatprep.subr.bf16.mxu1 %v8288_v19 }
 0x194   :  { %2345 = vmatpush2.bf16.msra.mxu0 %v8274_v36  ;;  %v8393_v36 = vld [vmem:[#allocation8 + $0x724] ss:$24 sps:$4 sm:$0xff]  }
 0x195   :  { %4206 = vmatprep.subr.bf16.mxu0 %v8291_v23  ;;  %v8309_v23 = vld [vmem:[#allocation8 + $0x334] ss:$24 sps:$4 sm:$0xff]  }
 0x196   :  { %4186 = vmatpush2.bf16.msra.mxu1 %v8286_v45  ;;  %v8304_v45 = vld [vmem:[#allocation8 + $0x360] ss:$24 sps:$4 sm:$0xff]  }
 0x197   :  { %v2042_v41 = vpop.f32.mrf.mxu0  ;;  %2347 = vmatmul.mubr.bf16.vlgmr.msra.gmra.mxu0 %v9381_v31  ;;  %v1998_v31 = vadd.f32 %v9426_v27, %v1947_v43  ;;  %4257 = vmatprep.subr.bf16.mxu1 %v8387_v9  ;;  %v8403_v43 = vld [vmem:[#allocation8 + $0x6c0] ss:$24 sps:$4 sm:$0xff]   ;;  %v8453_v9 = vld [vmem:[#allocation8 + $0x844] ss:$24 sps:$4 sm:$0xff]  }
 0x198   :  { %2356 = vmatprep.mubr.bf16.mxu0 %v9383_v35  ;;  %4207 = vmatpush1.bf16.msra.mxu0 %v8289_v29  ;;  %v1953_v35 = vadd.f32 %v9428_v28, %v443_v24  ;;  %v2043_v57 = vadd.f32 %v2042_v41, %v1992_v10  ;;  %v8391_v24 = vld [vmem:[#allocation8 + $0x720] ss:$24 sps:$4 sm:$0xff]   ;;  %v8315_v41 = vld [vmem:[#allocation8 + $0x5d4] ss:$24 sps:$4 sm:$0xff]  }
 0x199   :  { %v2044_v44 = vpop.f32.mrf.mxu0  ;;  %4208 = vmatprep.subr.bf16.mxu0 %v8294_v30  ;;  %v9454_v48 = vpop.f32.mrf.mxu1  ;;  %v8399_v30 = vld [vmem:[#allocation8 + $0x6f4] ss:$24 sps:$4 sm:$0xff]   ;;  %v8316_v10 = vld [vmem:[#allocation8 + $0x5a0] ss:$24 sps:$4 sm:$0xff]  }
 0x19a   :  { %v2045_v22 = vadd.f32 %v2044_v44, %v1994_v15  ;;  %v2004_v28 = vadd.f32 %v9432_v40, %v1953_v35  ;;  %v2365_v1 = vmax.f32 %v2043_v57, 0.0  ;;  %v8411_v44 = vld [vmem:[#allocation8 + $0x694] ss:$24 sps:$4 sm:$0xff]   ;;  %v8318_v15 = vld [vmem:[#allocation8 + $0x5a4] ss:$24 sps:$4 sm:$0xff]  }
 0x19b   :  { %v2046_v51 = vpop.f32.mrf.mxu0  ;;  %v9459_v52 = vpop.f32.mrf.mxu1  ;;  %v8423_v35 = vld [vmem:[#allocation8 + $0x634] ss:$24 sps:$4 sm:$0xff]   ;;  %v8429_v57 = vld [vmem:[#allocation8 + $0x604] ss:$24 sps:$4 sm:$0xff]  }
 0x19c   :  { %v2047_v54 = vadd.f32 %v2046_v51, %v1996_v17  ;;  %4209 = vmatpush1.bf16.msra.mxu0 %v8292_v38  ;;  %v2366_v62 = vmax.f32 %v2045_v22, 0.0  ;;  %v8405_v38 = vld [vmem:[#allocation8 + $0x6c4] ss:$24 sps:$4 sm:$0xff]   ;;  %v8409_v17 = vld [vmem:[#allocation8 + $0x690] ss:$24 sps:$4 sm:$0xff]  }
 0x19d   :  { %v2048_v58 = vpop.f32.mrf.mxu0  ;;  %4210 = vmatprep.subr.bf16.mxu0 %v8297_v47  ;;  %v9464_v53 = vpop.f32.mrf.mxu1  ;;  %v8313_v47 = vld [vmem:[#allocation8 + $0x5d0] ss:$24 sps:$4 sm:$0xff]   ;;  %v8321_v51 = vld [vmem:[#allocation8 + $0x574] ss:$24 sps:$4 sm:$0xff]  }
 0x19e   :  { %v2049_v59 = vadd.f32 %v2048_v58, %v1998_v31  ;;  %v2371_v60 = vmax.f32 %v2047_v54, 0.0  ;;  %v8415_v31 = vld [vmem:[#allocation8 + $0x660] ss:$24 sps:$4 sm:$0xff]   ;;  %v8319_v22 = vld [vmem:[#allocation8 + $0x570] ss:$24 sps:$4 sm:$0xff]  }
 0x19f   :  { %v2052_v61 = vpop.f32.mrf.mxu0  ;;  %2357 = vmatmul.mubr.bf16.gmra.mxu0 %v9389_v46  ;;  %v9467_v27 = vpop.f32.mrf.mxu1  ;;  %v8324_v54 = vld [vmem:[#allocation8 + $0x544] ss:$24 sps:$4 sm:$0xff]   ;;  %v8322_v58 = vld [vmem:[#allocation8 + $0x540] ss:$24 sps:$4 sm:$0xff]  }
 0x1a0   :  { %v2372_v63 = vmax.f32 %v2049_v59, 0.0  ;;  %4211 = vmatpush1.bf16.msra.mxu0 %v8295_v50  ;;  %v9475_v46 = vpack.c.bf16 %v2371_v60, %v2365_v1  ;;  %v2053_v7 = vadd.f32 %v2052_v61, %v2002_v0  ;;  %v8417_v50 = vld [vmem:[#allocation8 + $0x664] ss:$24 sps:$4 sm:$0xff]   ;;  %v8427_v59 = vld [vmem:[#allocation8 + $0x600] ss:$24 sps:$4 sm:$0xff]  }
 0x1a1   :  { %v2054_v2 = vpop.f32.mrf.mxu0  ;;  %4212 = vmatprep.subr.bf16.mxu0 %v8300_v18  ;;  %v9471_v3 = vpop.f32.mrf.mxu1  ;;  %v8327_v18 = vld [vmem:[#allocation8 + $0x514] ss:$24 sps:$4 sm:$0xff]   ;;  %v8325_v60 = vld [vmem:[#allocation8 + $0x510] ss:$24 sps:$4 sm:$0xff]   ;;  %v8330_v61 = vld [vmem:[#allocation8 + $0x4e4] ss:$24 sps:$4 sm:$0xff]  }
 0x1a2   :  { %v9473_v4 = vpack.c.bf16 %v2372_v63, %v2366_v62  ;;  %v2055_v5 = vadd.f32 %v2054_v2, %v2004_v28  ;;  %v2377_v55 = vmax.f32 %v2053_v7, 0.0  ;;  %v8433_v28 = vld [vmem:[#allocation8 + $0x8d0] ss:$24 sps:$4 sm:$0xff]   ;;  %v8441_v62 = vld [vmem:[#allocation8 + $0x8a4] ss:$24 sps:$4 sm:$0xff]   ;;  %v9488_v7 = vsub.s32 3, %v9434_v13 }
 0x1a3   :  { %v2056_v8 = vpop.f32.mrf.mxu0  ;;  %v9477_v40 = vpop.f32.mrf.mxu1  ;;  %v8328_v63 = vld [vmem:[#allocation8 + $0x4e0] ss:$24 sps:$4 sm:$0xff]   ;;  %v8447_v1 = vld [vmem:[#allocation8 + $0x874] ss:$24 sps:$4 sm:$0xff]   ;;  %v8331_v2 = vld [vmem:[#allocation8 + $0x4b0] ss:$24 sps:$4 sm:$0xff]  }
 0x1a4   :  { %v2378_v49 = vmax.f32 %v2055_v5, 0.0  ;;  %4187 = vmatprep.mubr.bf16.mxu1 %v9473_v4  ;;  %4213 = vmatpush1.bf16.msra.mxu0 %v8298_v32  ;;  %v9484_v29 = vpack.c.bf16 %v2377_v55, %v2377_v55  ;;  %v8435_v32 = vld [vmem:[#allocation8 + $0x8d4] ss:$24 sps:$4 sm:$0xff]   ;;  %v8439_v0 = vld [vmem:[#allocation8 + $0x8a0] ss:$24 sps:$4 sm:$0xff]   ;;  %v9491_v8 = vsub.s32 2, %v9434_v13 }
 0x1a5   :  { %4188 = vmatmul.mubr.bf16.vlgmr.msra.gmra.mxu1 %v9475_v46  ;;  %4214 = vmatprep.subr.bf16.mxu0 %v8303_v25  ;;  %v2057_v12 = vpop.f32.mrf.mxu0  ;;  %v2107_v14 = vpop.f32.mrf.mxu1  ;;  %v8333_v25 = vld [vmem:[#allocation8 + $0x4b4] ss:$24 sps:$4 sm:$0xff]   ;;  %v8336_v5 = vld [vmem:[#allocation8 + $0x484] ss:$24 sps:$4 sm:$0xff]  }
 0x1a6   :  { %v9481_v42 = vpack.c.bf16 %v2378_v49, %v2378_v49  ;;  %4258 = vmatpush1.bf16.msra.mxu1 %v8385_v37  ;;  %v8334_v49 = vld [vmem:[#allocation8 + $0x480] ss:$24 sps:$4 sm:$0xff]   ;;  %v8339_v37 = vld [vmem:[#allocation8 + $0x15c] ss:$24 sps:$4 sm:$0xff]   ;;  %v451_v12 = vrot.slane %v9436_v16, %v9488_v7  ;;  %v447_v14 = vrot.slane %v9436_v16, %v9491_v8 }
 0x1a7   :  { %v2108_v19 = vpop.f32.mrf.mxu1  ;;  %4259 = vmatprep.subr.bf16.mxu1 %v8393_v36  ;;  %v8459_v55 = vld [vmem:[#allocation8 + $0x814] ss:$24 sps:$4 sm:$0xff]  }
 0x1a8   :  { %4197 = vmatprep.mubr.bf16.mxu1 %v9481_v42  ;;  %4215 = vmatpush1.bf16.msra.mxu0 %v8301_v6  ;;  %v8445_v6 = vld [vmem:[#allocation8 + $0x870] ss:$24 sps:$4 sm:$0xff]   ;;  %v2096_v36 = vadd.f32 %v9459_v52, %v451_v12  ;;  %v2104_v52 = vadd.f32 %v9471_v3, %v447_v14 }
 0x1a9   :  { %4216 = vmatprep.subr.bf16.mxu0 %v8306_v11  ;;  %v8451_v11 = vld [vmem:[#allocation8 + $0x840] ss:$24 sps:$4 sm:$0xff]   ;;  %v8457_v19 = vld [vmem:[#allocation8 + $0x810] ss:$24 sps:$4 sm:$0xff]  }
 0x1aa   :  { %4260 = vmatpush1.bf16.msra.mxu1 %v8391_v24  ;;  %v8465_v24 = vld [vmem:[#allocation8 + $0x7e4] ss:$24 sps:$4 sm:$0xff]  }
 0x1ab   :  { %4261 = vmatprep.subr.bf16.mxu1 %v8399_v30 }
 0x1ac   :  { %4217 = vmatpush1.bf16.msra.mxu0 %v8304_v45  ;;  %v2094_v45 = vadd.f32 %v9454_v48, %v447_v14 }
 0x1ad   :  { %4198 = vmatmul.mubr.bf16.gmra.mxu1 %v9484_v29  ;;  %4218 = vmatprep.subr.bf16.mxu0 %v8309_v23 }
 0x1ae   :  { %4262 = vmatpush1.bf16.msra.mxu1 %v8397_v33 }
 0x1af   :  { %4263 = vmatprep.subr.bf16.mxu1 %v8405_v38 }
 0x1b0   :  { %4219 = vmatpush1.bf16.msra.mxu0 %v8307_v26  ;;  %v8463_v26 = vld [vmem:[#allocation8 + $0x7e0] ss:$24 sps:$4 sm:$0xff]  }
 0x1b1   :  { %4220 = vmatprep.subr.bf16.mxu0 %v8312_v34  ;;  %v2098_v34 = vadd.f32 %v9464_v53, %v447_v14  ;;  %v8340_v14 = vld [vmem:[#allocation8 + $0x128] ss:$24 sps:$4 sm:$0xff]  }
 0x1b2   :  { %4264 = vmatpush1.bf16.msra.mxu1 %v8403_v43  ;;  %v8471_v43 = vld [vmem:[#allocation8 + $0x7b4] ss:$24 sps:$4 sm:$0xff]  }
 0x1b3   :  { %4265 = vmatprep.subr.bf16.mxu1 %v8411_v44  ;;  %v2100_v44 = vadd.f32 %v9467_v27, %v451_v12  ;;  %v8475_v27 = vld [vmem:[#allocation8 + $0x780] ss:$24 sps:$4 sm:$0xff]  }
 0x1b4   :  { %4221 = vmatpush1.bf16.msra.mxu0 %v8310_v39 }
 0x1b5   :  { %4222 = vmatprep.subr.bf16.mxu0 %v8315_v41 }
 0x1b6   :  { %4266 = vmatpush1.bf16.msra.mxu1 %v8409_v17 }
 0x1b7   :  { %4267 = vmatprep.subr.bf16.mxu1 %v8417_v50  ;;  %v2106_v50 = vadd.f32 %v9477_v40, %v451_v12 }
 0x1b8   :  { %4223 = vmatpush2.bf16.msra.mxu0 %v8313_v47  ;;  %v8469_v47 = vld [vmem:[#allocation8 + $0x7b0] ss:$24 sps:$4 sm:$0xff]  }
 0x1b9   :  { %4224 = vmatprep.subr.bf16.mxu0 %v8318_v15 }
 0x1ba   :  { %4268 = vmatpush1.bf16.msra.mxu1 %v8415_v31 }
 0x1bb   :  { %4269 = vmatprep.subr.bf16.mxu1 %v8423_v35 }
 0x1bc   :  { %4225 = vmatpush2.bf16.msra.mxu0 %v8316_v10 }
 0x1bd   :  { %4226 = vmatprep.subr.bf16.mxu0 %v8321_v51 }
 0x1be   :  { %4270 = vmatpush1.bf16.msra.mxu1 %v8421_v56 }
 0x1bf   :  { %4271 = vmatprep.subr.bf16.mxu1 %v8429_v57 }
 0x1c0   :  { %4227 = vmatpush2.bf16.msra.mxu0 %v8319_v22 }
 0x1c1   :  { %4228 = vmatprep.subr.bf16.mxu0 %v8324_v54  ;;  %v8477_v54 = vld [vmem:[#allocation8 + $0x784] ss:$24 sps:$4 sm:$0xff]  }
 0x1c2   :  { %4272 = vmatpush1.bf16.msra.mxu1 %v8427_v59 }
 0x1c3   :  { %4273 = vmatprep.subr.bf16.mxu1 %v8435_v32 }
 0x1c4   :  { %4229 = vmatpush2.bf16.msra.mxu0 %v8322_v58 }
 0x1c5   :  { %4230 = vmatprep.subr.bf16.mxu0 %v8327_v18 }
 0x1c6   :  { %4274 = vmatpush2.bf16.msra.mxu1 %v8433_v28 }
 0x1c7   :  { %4275 = vmatprep.subr.bf16.mxu1 %v8441_v62 }
 0x1c8   :  { %4231 = vmatpush2.bf16.msra.mxu0 %v8325_v60 }
 0x1c9   :  { %4232 = vmatprep.subr.bf16.mxu0 %v8330_v61 }
 0x1ca   :  { %4276 = vmatpush2.bf16.msra.mxu1 %v8439_v0  ;;  %v8337_v0 = vld [vmem:[#allocation8 + $0x158] ss:$24 sps:$4 sm:$0xff]  }
 0x1cb   :  { %4277 = vmatprep.subr.bf16.mxu1 %v8447_v1 }
 0x1cc   :  { %4233 = vmatpush2.bf16.msra.mxu0 %v8328_v63  ;;  %v8483_v63 = vld [vmem:[#allocation8 + $0x45c] ss:$24 sps:$4 sm:$0xff]  }
 0x1cd   :  { %4234 = vmatprep.subr.bf16.mxu0 %v8333_v25 }
 0x1ce   :  { %4278 = vmatpush2.bf16.msra.mxu1 %v8445_v6 }
 0x1cf   :  { %4279 = vmatprep.subr.bf16.mxu1 %v8453_v9 }
 0x1d0   :  { %4235 = vmatpush2.bf16.msra.mxu0 %v8331_v2 }
 0x1d1   :  { %4236 = vmatprep.subr.bf16.mxu0 %v8336_v5  ;;  %v8342_v5 = vld [vmem:[#allocation8 + $0x12c] ss:$24 sps:$4 sm:$0xff]  }
 0x1d2   :  { %4280 = vmatpush2.bf16.msra.mxu1 %v8451_v11 }
 0x1d3   :  { %4281 = vmatprep.subr.bf16.mxu1 %v8459_v55  ;;  %v8345_v55 = vld [vmem:[#allocation8 + $0xfc] ss:$24 sps:$4 sm:$0xff]  }
 0x1d4   :  { %4237 = vmatpush2.bf16.msra.mxu0 %v8334_v49 }
 0x1d5   :  { %4308 = vmatprep.subr.bf16.mxu0 %v8339_v37 }
 0x1d6   :  { %4282 = vmatpush2.bf16.msra.mxu1 %v8457_v19 }
 0x1d7   :  { %v2144_v23 = vpop.f32.mrf.mxu0  ;;  %4283 = vmatprep.subr.bf16.mxu1 %v8465_v24  ;;  %v8351_v24 = vld [vmem:[#allocation8 + $0x9c] ss:$24 sps:$4 sm:$0xff]  }
 0x1d8   :  { %v2145_v38 = vadd.f32 %v2144_v23, %v2094_v45  ;;  %v8348_v45 = vld [vmem:[#allocation8 + $0xcc] ss:$24 sps:$4 sm:$0xff]   ;;  %v8346_v23 = vld [vmem:[#allocation8 + $0xc8] ss:$24 sps:$4 sm:$0xff]  }
 0x1d9   :  { %v2146_v30 = vpop.f32.mrf.mxu0  ;;  %v2195_v33 = vpop.f32.mrf.mxu1 }
 0x1da   :  { %v2147_v16 = vadd.f32 %v2146_v30, %v2096_v36  ;;  %4284 = vmatpush2.bf16.msra.mxu1 %v8463_v26  ;;  %v2196_v31 = vadd.f32 %v2195_v33, %v2145_v38  ;;  %v8343_v36 = vld [vmem:[#allocation8 + $0xf8] ss:$24 sps:$4 sm:$0xff]   ;;  %v8354_v30 = vld [vmem:[#allocation8 + $0x6c] ss:$24 sps:$4 sm:$0xff]   ;;  %v8352_v33 = vld [vmem:[#allocation8 + $0x68] ss:$24 sps:$4 sm:$0xff]  }
 0x1db   :  { %v2148_v39 = vpop.f32.mrf.mxu0  ;;  %v2197_v41 = vpop.f32.mrf.mxu1  ;;  %4285 = vmatprep.subr.bf16.mxu1 %v8471_v43  ;;  %v8349_v26 = vld [vmem:[#allocation8 + $0x98] ss:$24 sps:$4 sm:$0xff]   ;;  %v8360_v38 = vld [vmem:[#allocation8 + $0xc] ss:$24 sps:$4 sm:$0xff]  }
 0x1dc   :  { %v2149_v48 = vadd.f32 %v2148_v39, %v2098_v34  ;;  %v2198_v10 = vadd.f32 %v2197_v41, %v2147_v16  ;;  %v2367_v61 = vmax.f32 %v2196_v31, 0.0  ;;  %v8357_v34 = vld [vmem:[#allocation8 + $0x3c] ss:$24 sps:$4 sm:$0xff]   ;;  %v8355_v16 = vld [vmem:[#allocation8 + $0x38] ss:$24 sps:$4 sm:$0xff]  }
 0x1dd   :  { %v2150_v15 = vpop.f32.mrf.mxu0  ;;  %v2199_v17 = vpop.f32.mrf.mxu1  ;;  %v8358_v39 = vld [vmem:[#allocation8 + $0x8] ss:$24 sps:$4 sm:$0xff]   ;;  %v8363_v41 = vld [vmem:[#allocation8 + $0x2dc] ss:$24 sps:$4 sm:$0xff]   ;;  %v8361_v43 = vld [vmem:[#allocation8 + $0x2d8] ss:$24 sps:$4 sm:$0xff]  }
 0x1de   :  { %v2151_v51 = vadd.f32 %v2150_v15, %v2100_v44  ;;  %v2200_v53 = vadd.f32 %v2199_v17, %v2149_v48  ;;  %4286 = vmatpush2.bf16.msra.mxu1 %v8469_v47  ;;  %v2368_v59 = vmax.f32 %v2198_v10, 0.0  ;;  %v8366_v44 = vld [vmem:[#allocation8 + $0x2ac] ss:$24 sps:$4 sm:$0xff]   ;;  %v8369_v48 = vld [vmem:[#allocation8 + $0x27c] ss:$24 sps:$4 sm:$0xff]  }
 0x1df   :  { %v2201_v35 = vpop.f32.mrf.mxu1  ;;  %v2154_v22 = vpop.f32.mrf.mxu0  ;;  %4287 = vmatprep.subr.bf16.mxu1 %v8477_v54  ;;  %v8367_v47 = vld [vmem:[#allocation8 + $0x278] ss:$24 sps:$4 sm:$0xff]   ;;  %v8372_v15 = vld [vmem:[#allocation8 + $0x24c] ss:$24 sps:$4 sm:$0xff]   ;;  %v8370_v17 = vld [vmem:[#allocation8 + $0x248] ss:$24 sps:$4 sm:$0xff]  }
 0x1e0   :  { %v2202_v56 = vadd.f32 %v2201_v35, %v2151_v51  ;;  %v2155_v57 = vadd.f32 %v2154_v22, %v2104_v52  ;;  %v2373_v58 = vmax.f32 %v2200_v53, 0.0  ;;  %v8364_v52 = vld [vmem:[#allocation8 + $0x2a8] ss:$24 sps:$4 sm:$0xff]   ;;  %v8375_v10 = vld [vmem:[#allocation8 + $0x21c] ss:$24 sps:$4 sm:$0xff]   ;;  %v9520_v51 = vsub.s32 5, %v9434_v13 }
 0x1e1   :  { %v2156_v3 = vpop.f32.mrf.mxu0  ;;  %v2205_v18 = vpop.f32.mrf.mxu1  ;;  %v8373_v53 = vld [vmem:[#allocation8 + $0x218] ss:$24 sps:$4 sm:$0xff]   ;;  %v8378_v22 = vld [vmem:[#allocation8 + $0x1ec] ss:$24 sps:$4 sm:$0xff]  }
 0x1e2   :  { %v2374_v32 = vmax.f32 %v2202_v56, 0.0  ;;  %v2157_v60 = vadd.f32 %v2156_v3, %v2106_v50  ;;  %v2206_v40 = vadd.f32 %v2205_v18, %v2155_v57  ;;  %4288 = vmatpush2.bf16.msra.mxu1 %v8475_v27  ;;  %v9505_v2 = vpack.c.bf16 %v2373_v58, %v2367_v61  ;;  %v9105_v31 = vld [vmem:[#allocation7] sm:$0x3f]  ;;  %v8376_v27 = vld [vmem:[#allocation8 + $0x1e8] ss:$24 sps:$4 sm:$0xff]  }
 0x1e3   :  { %v2207_v28 = vpop.f32.mrf.mxu1  ;;  %v2158_v62 = vpop.f32.mrf.mxu0  ;;  %4359 = vmatprep.subr.bf16.mxu1 %v8483_v63  ;;  %v9517_v50 = vsub.s32 4, %v9434_v13  ;;  %v9526_v54 = vrot.slane %v9105_v31, %v9520_v51  ;;  %v8381_v13 = vld [vmem:[#allocation8 + $0x1bc] ss:$24 sps:$4 sm:$0xff]   ;;  %v8384_v63 = vld [vmem:[#allocation8 + $0x18c] ss:$24 sps:$4 sm:$0xff]  }
 0x1e4   :  { %v9503_v25 = vpack.c.bf16 %v2374_v32, %v2368_v59  ;;  %v2208_v1 = vadd.f32 %v2207_v28, %v2157_v60  ;;  %v2379_v37 = vmax.f32 %v2206_v40, 0.0  ;;  %v8379_v40 = vld [vmem:[#allocation8 + $0x1b8] ss:$24 sps:$4 sm:$0xff]  }
 0x1e5   :  { %v2159_v6 = vpop.f32.mrf.mxu0  ;;  %v2209_v9 = vpop.f32.mrf.mxu1  ;;  %v9523_v35 = vrot.slane %v9105_v31, %v9517_v50  ;;  %v8442_v31 = vld [vmem:[#allocation8 + $0x8a8] ss:$24 sps:$4 sm:$0xff]  }
 0x1e6   :  { %4238 = vmatprep.mubr.bf16.mxu0 %v9503_v25  ;;  %v2380_v49 = vmax.f32 %v2208_v1, 0.0  ;;  %v9512_v19 = vpack.c.bf16 %v2379_v37, %v2379_v37  ;;  %v8390_v9 = vld [vmem:[#allocation8 + $0x75c] ss:$24 sps:$4 sm:$0xff]  }
 0x1e7   :  { %4239 = vmatmul.mubr.bf16.vlgmr.msra.gmra.mxu0 %v9505_v2  ;;  %v2210_v11 = vpop.f32.mrf.mxu1 }
 0x1e8   :  { %v9509_v12 = vpack.c.bf16 %v2380_v49, %v2380_v49  ;;  %4309 = vmatpush1.bf16.msra.mxu0 %v8337_v0 }
 0x1e9   :  { %4310 = vmatprep.subr.bf16.mxu0 %v8342_v5  ;;  %v8382_v5 = vld [vmem:[#allocation8 + $0x188] ss:$24 sps:$4 sm:$0xff]  }
 0x1ea   :  { %4248 = vmatprep.mubr.bf16.mxu0 %v9509_v12 }
 0x1ec   :  { %4311 = vmatpush1.bf16.msra.mxu0 %v8340_v14  ;;  %v8388_v14 = vld [vmem:[#allocation8 + $0x758] ss:$24 sps:$4 sm:$0xff]  }
 0x1ed   :  { %4312 = vmatprep.subr.bf16.mxu0 %v8345_v55 }
 0x1ef   :  { %4249 = vmatmul.mubr.bf16.gmra.mxu0 %v9512_v19 }
 0x1f0   :  { %4313 = vmatpush1.bf16.msra.mxu0 %v8343_v36  ;;  %4340 = vmatprep.mubr.bf16.mxu0 %v9473_v4 }
 0x1f1   :  { %4314 = vmatprep.subr.bf16.mxu0 %v8348_v45  ;;  %v8396_v45 = vld [vmem:[#allocation8 + $0x72c] ss:$24 sps:$4 sm:$0xff]  }
 0x1f4   :  { %4315 = vmatpush1.bf16.msra.mxu0 %v8346_v23 }
 0x1f5   :  { %4316 = vmatprep.subr.bf16.mxu0 %v8351_v24 }
 0x1f8   :  { %4317 = vmatpush1.bf16.msra.mxu0 %v8349_v26 }
 0x1f9   :  { %4318 = vmatprep.subr.bf16.mxu0 %v8354_v30  ;;  %v8394_v30 = vld [vmem:[#allocation8 + $0x728] ss:$24 sps:$4 sm:$0xff]  }
 0x1fc   :  { %4319 = vmatpush1.bf16.msra.mxu0 %v8352_v33  ;;  %v8402_v33 = vld [vmem:[#allocation8 + $0x6fc] ss:$24 sps:$4 sm:$0xff]  }
 0x1fd   :  { %4320 = vmatprep.subr.bf16.mxu0 %v8357_v34  ;;  %v8400_v34 = vld [vmem:[#allocation8 + $0x6f8] ss:$24 sps:$4 sm:$0xff]  }
 0x200   :  { %4321 = vmatpush1.bf16.msra.mxu0 %v8355_v16  ;;  %v8408_v16 = vld [vmem:[#allocation8 + $0x6cc] ss:$24 sps:$4 sm:$0xff]  }
 0x201   :  { %4322 = vmatprep.subr.bf16.mxu0 %v8360_v38  ;;  %v8406_v38 = vld [vmem:[#allocation8 + $0x6c8] ss:$24 sps:$4 sm:$0xff]  }
 0x204   :  { %4323 = vmatpush1.bf16.msra.mxu0 %v8358_v39  ;;  %v8414_v39 = vld [vmem:[#allocation8 + $0x69c] ss:$24 sps:$4 sm:$0xff]  }
 0x205   :  { %4324 = vmatprep.subr.bf16.mxu0 %v8363_v41  ;;  %v8412_v41 = vld [vmem:[#allocation8 + $0x698] ss:$24 sps:$4 sm:$0xff]  }
 0x208   :  { %4325 = vmatpush2.bf16.msra.mxu0 %v8361_v43  ;;  %v8420_v43 = vld [vmem:[#allocation8 + $0x66c] ss:$24 sps:$4 sm:$0xff]  }
 0x209   :  { %4326 = vmatprep.subr.bf16.mxu0 %v8366_v44  ;;  %v8418_v44 = vld [vmem:[#allocation8 + $0x668] ss:$24 sps:$4 sm:$0xff]  }
 0x20c   :  { %4327 = vmatpush2.bf16.msra.mxu0 %v8364_v52  ;;  %v8426_v52 = vld [vmem:[#allocation8 + $0x63c] ss:$24 sps:$4 sm:$0xff]  }
 0x20d   :  { %4328 = vmatprep.subr.bf16.mxu0 %v8369_v48  ;;  %v8424_v48 = vld [vmem:[#allocation8 + $0x638] ss:$24 sps:$4 sm:$0xff]  }
 0x210   :  { %4329 = vmatpush2.bf16.msra.mxu0 %v8367_v47  ;;  %v8432_v47 = vld [vmem:[#allocation8 + $0x60c] ss:$24 sps:$4 sm:$0xff]  }
 0x211   :  { %4330 = vmatprep.subr.bf16.mxu0 %v8372_v15  ;;  %v8430_v15 = vld [vmem:[#allocation8 + $0x608] ss:$24 sps:$4 sm:$0xff]  }
 0x214   :  { %4331 = vmatpush2.bf16.msra.mxu0 %v8370_v17  ;;  %v8438_v17 = vld [vmem:[#allocation8 + $0x8dc] ss:$24 sps:$4 sm:$0xff]  }
 0x215   :  { %4332 = vmatprep.subr.bf16.mxu0 %v8375_v10  ;;  %v8436_v10 = vld [vmem:[#allocation8 + $0x8d8] ss:$24 sps:$4 sm:$0xff]  }
 0x217   :  { %v2246_v56 = vpop.f32.mrf.mxu0 }
 0x218   :  { %v2247_v57 = vadd.f32 %v2246_v56, %v9523_v35  ;;  %4333 = vmatpush2.bf16.msra.mxu0 %v8373_v53  ;;  %v8444_v53 = vld [vmem:[#allocation8 + $0x8ac] ss:$24 sps:$4 sm:$0xff]   ;;  %v8448_v56 = vld [vmem:[#allocation8 + $0x878] ss:$24 sps:$4 sm:$0xff]  }
 0x219   :  { %v2248_v58 = vpop.f32.mrf.mxu0  ;;  %v2297_v3 = vpop.f32.mrf.mxu1  ;;  %4334 = vmatprep.subr.bf16.mxu0 %v8378_v22  ;;  %v8450_v22 = vld [vmem:[#allocation8 + $0x87c] ss:$24 sps:$4 sm:$0xff]  }
 0x21a   :  { %v2249_v18 = vadd.f32 %v2248_v58, %v9526_v54  ;;  %v9530_v59 = vadd.f32 %v2297_v3, %v2247_v57  ;;  %v8456_v57 = vld [vmem:[#allocation8 + $0x84c] ss:$24 sps:$4 sm:$0xff]   ;;  %v8462_v58 = vld [vmem:[#allocation8 + $0x81c] ss:$24 sps:$4 sm:$0xff]   ;;  %v8460_v3 = vld [vmem:[#allocation8 + $0x818] ss:$24 sps:$4 sm:$0xff]  }
 0x21b   :  { %v9532_v32 = vpop.f32.mrf.mxu0  ;;  %v2299_v60 = vpop.f32.mrf.mxu1 }
 0x21c   :  { %v9534_v61 = vadd.f32 %v2299_v60, %v2249_v18  ;;  %4335 = vmatpush2.bf16.msra.mxu0 %v8376_v27  ;;  %v8454_v27 = vld [vmem:[#allocation8 + $0x848] ss:$24 sps:$4 sm:$0xff]   ;;  %v2251_v18 = vadd.f32 %v9532_v32, %v9523_v35  ;;  %v8472_v32 = vld [vmem:[#allocation8 + $0x7b8] ss:$24 sps:$4 sm:$0xff]  }
 0x21d   :  { %v9536_v28 = vpop.f32.mrf.mxu0  ;;  %v9538_v62 = vpop.f32.mrf.mxu1  ;;  %4336 = vmatprep.subr.bf16.mxu0 %v8381_v13  ;;  %v8468_v13 = vld [vmem:[#allocation8 + $0x7ec] ss:$24 sps:$4 sm:$0xff]  }
 0x21f   :  { %v9540_v0 = vpop.f32.mrf.mxu1  ;;  %v2256_v1 = vpop.f32.mrf.mxu0 }
 0x220   :  { %4337 = vmatpush2.bf16.msra.mxu0 %v8379_v40  ;;  %v2257_v6 = vadd.f32 %v2256_v1, %v9523_v35  ;;  %v2253_v40 = vadd.f32 %v9536_v28, %v9526_v54 }
 0x221   :  { %4338 = vmatprep.subr.bf16.mxu0 %v8384_v63  ;;  %v9543_v49 = vpop.f32.mrf.mxu0  ;;  %v2307_v37 = vpop.f32.mrf.mxu1  ;;  %v8466_v63 = vld [vmem:[#allocation8 + $0x7e8] ss:$24 sps:$4 sm:$0xff]  }
 0x222   :  { %v9545_v11 = vadd.f32 %v2307_v37, %v2257_v6  ;;  %v2302_v6 = vadd.f32 %v9538_v62, %v2251_v18  ;;  %v2304_v37 = vadd.f32 %v9540_v0, %v2253_v40  ;;  %v8496_v18 = vld [vmem:[#allocation8 + $0x400] ss:$24 sps:$4 sm:$0xff]   ;;  %v8504_v40 = vld [vmem:[#allocation8 + $0x3d4] ss:$24 sps:$4 sm:$0xff]  }
 0x223   :  { %v2260_v55 = vpop.f32.mrf.mxu0  ;;  %v9547_v36 = vpop.f32.mrf.mxu1 }
 0x224   :  { %4339 = vmatpush2.bf16.msra.mxu0 %v8382_v5  ;;  %v8474_v5 = vld [vmem:[#allocation8 + $0x7bc] ss:$24 sps:$4 sm:$0xff]  }
 0x225   :  { %4410 = vmatprep.subr.bf16.mxu0 %v8390_v9  ;;  %v2261_v23 = vpop.f32.mrf.mxu0  ;;  %v2311_v24 = vpop.f32.mrf.mxu1 }
 0x226   :  { %v8480_v23 = vld [vmem:[#allocation8 + $0x78c] ss:$24 sps:$4 sm:$0xff]  }
 0x227   :  { %4341 = vmatmul.mubr.bf16.vlgmr.msra.gmra.mxu0 %v9475_v46  ;;  %v2312_v26 = vpop.f32.mrf.mxu1 }
 0x228   :  { %4350 = vmatprep.mubr.bf16.mxu0 %v9481_v42  ;;  %4411 = vmatpush1.bf16.msra.mxu0 %v8388_v14  ;;  %v2259_v14 = vadd.f32 %v9543_v49, %v9526_v54 }
 0x229   :  { %4412 = vmatprep.subr.bf16.mxu0 %v8396_v45 }
 0x22a   :  { %v2310_v62 = vadd.f32 %v9547_v36, %v2259_v14  ;;  %v8484_v36 = vld [vmem:[#allocation8 + $0x460] ss:$24 sps:$4 sm:$0xff]  }
 0x22b   :  { %v8505_v14 = vld [vmem:[#allocation8 + $0x398] ss:$24 sps:$4 sm:$0xff]  }
 0x22c   :  { %4413 = vmatpush1.bf16.msra.mxu0 %v8394_v30 }
 0x22d   :  { %4414 = vmatprep.subr.bf16.mxu0 %v8402_v33 }
 0x22f   :  { %4351 = vmatmul.mubr.bf16.gmra.mxu0 %v9484_v29 }
 0x230   :  { %4415 = vmatpush1.bf16.msra.mxu0 %v8400_v34  ;;  %v8478_v34 = vld [vmem:[#allocation8 + $0x788] ss:$24 sps:$4 sm:$0xff]  }
 0x231   :  { %4416 = vmatprep.subr.bf16.mxu0 %v8408_v16 }
 0x234   :  { %4417 = vmatpush1.bf16.msra.mxu0 %v8406_v38  ;;  %v8481_v38 = vld [vmem:[#allocation8 + $0x458] ss:$24 sps:$4 sm:$0xff]  }
 0x235   :  { %4418 = vmatprep.subr.bf16.mxu0 %v8414_v39 }
 0x238   :  { %4419 = vmatpush1.bf16.msra.mxu0 %v8412_v41 }
 0x239   :  { %4420 = vmatprep.subr.bf16.mxu0 %v8420_v43  ;;  %v8489_v43 = vld [vmem:[#allocation8 + $0x42c] ss:$24 sps:$4 sm:$0xff]  }
 0x23c   :  { %4421 = vmatpush1.bf16.msra.mxu0 %v8418_v44 }
 0x23d   :  { %4422 = vmatprep.subr.bf16.mxu0 %v8426_v52 }
 0x240   :  { %4423 = vmatpush1.bf16.msra.mxu0 %v8424_v48 }
 0x241   :  { %4424 = vmatprep.subr.bf16.mxu0 %v8432_v47  ;;  %v8492_v47 = vld [vmem:[#allocation8 + $0x434] ss:$24 sps:$4 sm:$0xff]  }
 0x244   :  { %4425 = vmatpush1.bf16.msra.mxu0 %v8430_v15 }
 0x245   :  { %4426 = vmatprep.subr.bf16.mxu0 %v8438_v17 }
 0x248   :  { %4427 = vmatpush2.bf16.msra.mxu0 %v8436_v10 }
 0x249   :  { %4428 = vmatprep.subr.bf16.mxu0 %v8444_v53 }
 0x24c   :  { %4429 = vmatpush2.bf16.msra.mxu0 %v8442_v31  ;;  %v8495_v31 = vld [vmem:[#allocation8 + $0x3fc] ss:$24 sps:$4 sm:$0xff]  }
 0x24d   :  { %4430 = vmatprep.subr.bf16.mxu0 %v8450_v22  ;;  %v8490_v22 = vld [vmem:[#allocation8 + $0x430] ss:$24 sps:$4 sm:$0xff]  }
 0x250   :  { %4431 = vmatpush2.bf16.msra.mxu0 %v8448_v56 }
 0x251   :  { %4432 = vmatprep.subr.bf16.mxu0 %v8456_v57  ;;  %v8498_v57 = vld [vmem:[#allocation8 + $0x404] ss:$24 sps:$4 sm:$0xff]  }
 0x254   :  { %4433 = vmatpush2.bf16.msra.mxu0 %v8454_v27  ;;  %v8493_v27 = vld [vmem:[#allocation8 + $0x3f8] ss:$24 sps:$4 sm:$0xff]  }
 0x255   :  { %4434 = vmatprep.subr.bf16.mxu0 %v8462_v58 }
 0x257   :  { %v2348_v60 = vpop.f32.mrf.mxu0 }
 0x258   :  { %4435 = vmatpush2.bf16.msra.mxu0 %v8460_v3  ;;  %v2349_v28 = vadd.f32 %v2348_v60, %v9530_v59  ;;  %v8486_v59 = vld [vmem:[#allocation8 + $0x464] ss:$24 sps:$4 sm:$0xff]  }
 0x259   :  { %v2350_v1 = vpop.f32.mrf.mxu0  ;;  %4436 = vmatprep.subr.bf16.mxu0 %v8468_v13  ;;  %v8501_v13 = vld [vmem:[#allocation8 + $0x3cc] ss:$24 sps:$4 sm:$0xff]  }
 0x25a   :  { %v2351_v55 = vadd.f32 %v2350_v1, %v9534_v61  ;;  %v2369_v54 = vmax.f32 %v2349_v28, 0.0  ;;  %v8516_v28 = vld [vmem:[#allocation8 + $0x374] ss:$24 sps:$4 sm:$0xff]  }
 0x25b   :  { %v2352_v9 = vpop.f32.mrf.mxu0 }
 0x25c   :  { %v2353_v35 = vadd.f32 %v2352_v9, %v2302_v6  ;;  %4437 = vmatpush2.bf16.msra.mxu0 %v8466_v63  ;;  %v2370_v33 = vmax.f32 %v2351_v55, 0.0  ;;  %v8499_v63 = vld [vmem:[#allocation8 + $0x3c8] ss:$24 sps:$4 sm:$0xff]  }
 0x25d   :  { %v2354_v45 = vpop.f32.mrf.mxu0  ;;  %4438 = vmatprep.subr.bf16.mxu0 %v8474_v5  ;;  %v8507_v5 = vld [vmem:[#allocation8 + $0x39c] ss:$24 sps:$4 sm:$0xff]   ;;  %v8502_v6 = vld [vmem:[#allocation8 + $0x3d0] ss:$24 sps:$4 sm:$0xff]  }
 0x25e   :  { %v2355_v24 = vadd.f32 %v2354_v45, %v2304_v37  ;;  %v2375_v26 = vmax.f32 %v2353_v35, 0.0  ;;  %v8510_v37 = vld [vmem:[#allocation8 + $0x3a4] ss:$24 sps:$4 sm:$0xff]   ;;  %v8511_v45 = vld [vmem:[#allocation8 + $0x368] ss:$24 sps:$4 sm:$0xff]  }
 0x25f   :  { %v2358_v30 = vpop.f32.mrf.mxu0  ;;  %v8513_v35 = vld [vmem:[#allocation8 + $0x36c] ss:$24 sps:$4 sm:$0xff]  }
 0x260   :  { %v2376_v0 = vmax.f32 %v2355_v24, 0.0  ;;  %4439 = vmatpush2.bf16.msra.mxu0 %v8472_v32  ;;  %v9565_v39 = vpack.c.bf16 %v2375_v26, %v2369_v54  ;;  %v2359_v41 = vadd.f32 %v2358_v30, %v9545_v11  ;;  %v8487_v11 = vld [vmem:[#allocation8 + $0x428] ss:$24 sps:$4 sm:$0xff]   ;;  %v8517_v26 = vld [vmem:[#allocation8 + $0x338] ss:$24 sps:$4 sm:$0xff]  }
 0x261   :  { %v2360_v49 = vpop.f32.mrf.mxu0  ;;  %4440 = vmatprep.subr.bf16.mxu0 %v8480_v23  ;;  %v8508_v32 = vld [vmem:[#allocation8 + $0x3a0] ss:$24 sps:$4 sm:$0xff]   ;;  %v8519_v23 = vld [vmem:[#allocation8 + $0x33c] ss:$24 sps:$4 sm:$0xff]   ;;  %v8514_v24 = vld [vmem:[#allocation8 + $0x370] ss:$24 sps:$4 sm:$0xff]  }
 0x262   :  { %v9563_v61 = vpack.c.bf16 %v2376_v0, %v2370_v33  ;;  %v2361_v16 = vadd.f32 %v2360_v49, %v2310_v62  ;;  %v2381_v10 = vmax.f32 %v2359_v41, 0.0  ;;  %v8525_v30 = vld [vmem:[#allocation8 + $0x30c] ss:$24 sps:$4 sm:$0xff]   ;;  %v8520_v62 = vld [vmem:[#allocation8 + $0x340] ss:$24 sps:$4 sm:$0xff]  }
 0x263   :  { %v2362_v44 = vpop.f32.mrf.mxu0  ;;  %v8528_v33 = vld [vmem:[#allocation8 + $0x314] ss:$24 sps:$4 sm:$0xff]   ;;  %v8523_v0 = vld [vmem:[#allocation8 + $0x308] ss:$24 sps:$4 sm:$0xff]   ;;  %v8534_v49 = vld [vmem:[#allocation8 + $0x5e4] ss:$24 sps:$4 sm:$0xff]  }
 0x264   :  { %v2382_v52 = vmax.f32 %v2361_v16, 0.0  ;;  %4441 = vmatpush2.bf16.msra.mxu0 %v8478_v34  ;;  %4289 = vmatprep.mubr.bf16.mxu1 %v9563_v61  ;;  %v9582_v58 = vpack.c.bf16 %v2381_v10, %v2381_v10  ;;  %v8531_v34 = vld [vmem:[#allocation8 + $0x5dc] ss:$24 sps:$4 sm:$0xff]   ;;  %v8526_v54 = vld [vmem:[#allocation8 + $0x310] ss:$24 sps:$4 sm:$0xff]  }
 0x265   :  { %4442 = vmatprep.mubr.bf16.mxu0 %v9563_v61  ;;  %v9570_v48 = vpop.f32.mrf.mxu1  ;;  %4290 = vmatmul.mubr.bf16.vlgmr.msra.gmra.mxu1 %v9565_v39  ;;  %v2363_v15 = vpop.f32.mrf.mxu0  ;;  %v8529_v16 = vld [vmem:[#allocation8 + $0x5d8] ss:$24 sps:$4 sm:$0xff]   ;;  %v8540_v41 = vld [vmem:[#allocation8 + $0x5b4] ss:$24 sps:$4 sm:$0xff]  }
 0x266   :  { %v9573_v17 = vpack.c.bf16 %v2382_v52, %v2382_v52  ;;  %4360 = vmatpush1.bf16.msra.mxu1 %v8481_v38  ;;  %4512 = vmatprep.subr.bf16.mxu0 %v8486_v59  ;;  %v8537_v38 = vld [vmem:[#allocation8 + $0x5ac] ss:$24 sps:$4 sm:$0xff]   ;;  %v8532_v59 = vld [vmem:[#allocation8 + $0x5e0] ss:$24 sps:$4 sm:$0xff]   ;;  %v8543_v44 = vld [vmem:[#allocation8 + $0x57c] ss:$24 sps:$4 sm:$0xff]  }
 0x267   :  { %4443 = vmatmul.mubr.bf16.vlgmr.msra.gmra.mxu0 %v9565_v39  ;;  %v9576_v53 = vpop.f32.mrf.mxu1  ;;  %4361 = vmatprep.subr.bf16.mxu1 %v8489_v43  ;;  %v8535_v43 = vld [vmem:[#allocation8 + $0x5a8] ss:$24 sps:$4 sm:$0xff]   ;;  %v8549_v15 = vld [vmem:[#allocation8 + $0x54c] ss:$24 sps:$4 sm:$0xff]  }
 0x268   :  { %4513 = vmatpush1.bf16.msra.mxu0 %v8484_v36  ;;  %4299 = vmatprep.mubr.bf16.mxu1 %v9573_v17  ;;  %v8538_v52 = vld [vmem:[#allocation8 + $0x5b0] ss:$24 sps:$4 sm:$0xff]   ;;  %v8546_v36 = vld [vmem:[#allocation8 + $0x584] ss:$24 sps:$4 sm:$0xff]   ;;  %v8552_v10 = vld [vmem:[#allocation8 + $0x554] ss:$24 sps:$4 sm:$0xff]  }
 0x269   :  { %4452 = vmatprep.mubr.bf16.mxu0 %v9573_v17  ;;  %v9580_v56 = vpop.f32.mrf.mxu1  ;;  %4514 = vmatprep.subr.bf16.mxu0 %v8492_v47  ;;  %v8541_v47 = vld [vmem:[#allocation8 + $0x578] ss:$24 sps:$4 sm:$0xff]  }
 0x26a   :  { %4362 = vmatpush1.bf16.msra.mxu1 %v8487_v11  ;;  %v8544_v11 = vld [vmem:[#allocation8 + $0x580] ss:$24 sps:$4 sm:$0xff]  }
 0x26b   :  { %v9584_v3 = vpop.f32.mrf.mxu1  ;;  %4363 = vmatprep.subr.bf16.mxu1 %v8495_v31  ;;  %v8547_v31 = vld [vmem:[#allocation8 + $0x548] ss:$24 sps:$4 sm:$0xff]  }
 0x26c   :  { %4515 = vmatpush1.bf16.msra.mxu0 %v8490_v22  ;;  %v8555_v22 = vld [vmem:[#allocation8 + $0x51c] ss:$24 sps:$4 sm:$0xff]  }
 0x26d   :  { %v9586_v60 = vpop.f32.mrf.mxu1  ;;  %4300 = vmatmul.mubr.bf16.gmra.mxu1 %v9582_v58  ;;  %4516 = vmatprep.subr.bf16.mxu0 %v8498_v57  ;;  %v8550_v57 = vld [vmem:[#allocation8 + $0x550] ss:$24 sps:$4 sm:$0xff]  }
 0x26e   :  { %4364 = vmatpush1.bf16.msra.mxu1 %v8493_v27  ;;  %4391 = vmatprep.mubr.bf16.mxu1 %v9503_v25  ;;  %v8558_v27 = vld [vmem:[#allocation8 + $0x524] ss:$24 sps:$4 sm:$0xff]  }
 0x26f   :  { %4453 = vmatmul.mubr.bf16.gmra.mxu0 %v9582_v58  ;;  %v9591_v1 = vpop.f32.mrf.mxu1  ;;  %4365 = vmatprep.subr.bf16.mxu1 %v8501_v13  ;;  %v8553_v13 = vld [vmem:[#allocation8 + $0x518] ss:$24 sps:$4 sm:$0xff]  }
 0x270   :  { %4517 = vmatpush1.bf16.msra.mxu0 %v8496_v18  ;;  %4544 = vmatprep.mubr.bf16.mxu0 %v9503_v25  ;;  %v8522_v25 = vld [vmem:[#allocation8 + $0x344] ss:$24 sps:$4 sm:$0xff]  }
 0x271   :  { %v4203_v9 = vpop.f32.mrf.mxu1  ;;  %4518 = vmatprep.subr.bf16.mxu0 %v8504_v40  ;;  %v8561_v18 = vld [vmem:[#allocation8 + $0x4ec] ss:$24 sps:$4 sm:$0xff]   ;;  %v8556_v40 = vld [vmem:[#allocation8 + $0x520] ss:$24 sps:$4 sm:$0xff]  }
 0x272   :  { %4366 = vmatpush1.bf16.msra.mxu1 %v8499_v63  ;;  %v8564_v63 = vld [vmem:[#allocation8 + $0x4f4] ss:$24 sps:$4 sm:$0xff]   ;;  %v8562_v9 = vld [vmem:[#allocation8 + $0x4f0] ss:$24 sps:$4 sm:$0xff]  }
 0x273   :  { %v4204_v55 = vpop.f32.mrf.mxu1  ;;  %4367 = vmatprep.subr.bf16.mxu1 %v8507_v5  ;;  %v8559_v5 = vld [vmem:[#allocation8 + $0x4e8] ss:$24 sps:$4 sm:$0xff]  }
 0x274   :  { %4519 = vmatpush1.bf16.msra.mxu0 %v8502_v6  ;;  %v8567_v6 = vld [vmem:[#allocation8 + $0x4bc] ss:$24 sps:$4 sm:$0xff]   ;;  %v8573_v55 = vld [vmem:[#allocation8 + $0x48c] ss:$24 sps:$4 sm:$0xff]  }
 0x275   :  { %4520 = vmatprep.subr.bf16.mxu0 %v8510_v37  ;;  %v8570_v37 = vld [vmem:[#allocation8 + $0x4c4] ss:$24 sps:$4 sm:$0xff]  }
 0x276   :  { %4368 = vmatpush1.bf16.msra.mxu1 %v8505_v14  ;;  %v8565_v14 = vld [vmem:[#allocation8 + $0x4b8] ss:$24 sps:$4 sm:$0xff]  }
 0x277   :  { %4369 = vmatprep.subr.bf16.mxu1 %v8513_v35  ;;  %v8568_v35 = vld [vmem:[#allocation8 + $0x4c0] ss:$24 sps:$4 sm:$0xff]  }
 0x278   :  { %4521 = vmatpush1.bf16.msra.mxu0 %v8508_v32  ;;  %v8576_v32 = vld [vmem:[#allocation8 + $0x494] ss:$24 sps:$4 sm:$0xff]  }
 0x279   :  { %4522 = vmatprep.subr.bf16.mxu0 %v8516_v28  ;;  %v8571_v28 = vld [vmem:[#allocation8 + $0x488] ss:$24 sps:$4 sm:$0xff]  }
 0x27a   :  { %4370 = vmatpush1.bf16.msra.mxu1 %v8511_v45  ;;  %v9594_v45 = vld [vmem:[#allocation10] sm:$0x3f] }
 0x27b   :  { %4371 = vmatprep.subr.bf16.mxu1 %v8519_v23  ;;  %v8579_v23 = vld [vmem:[#allocation8 + $0x164] ss:$24 sps:$4 sm:$0xff]  }
 0x27c   :  { %4523 = vmatpush1.bf16.msra.mxu0 %v8514_v24  ;;  %v8574_v24 = vld [vmem:[#allocation8 + $0x490] ss:$24 sps:$4 sm:$0xff]  }
 0x27d   :  { %4524 = vmatprep.subr.bf16.mxu0 %v8522_v25  ;;  %v8639_v25 = vld [vmem:[#allocation11 + $0x154] ss:$24 sps:$4 sm:$0xff]  }
 0x27e   :  { %4372 = vmatpush1.bf16.msra.mxu1 %v8517_v26  ;;  %v2688_v26 = vrot.slane %v9594_v45, %v9442_v21 }
 0x27f   :  { %4373 = vmatprep.subr.bf16.mxu1 %v8525_v30  ;;  %v8577_v30 = vld [vmem:[#allocation8 + $0x160] ss:$24 sps:$4 sm:$0xff]  }
 0x280   :  { %4525 = vmatpush1.bf16.msra.mxu0 %v8520_v62  ;;  %v8582_v62 = vld [vmem:[#allocation8 + $0x134] ss:$24 sps:$4 sm:$0xff]  }
 0x281   :  { %4526 = vmatprep.subr.bf16.mxu0 %v8528_v33  ;;  %v2692_v33 = vrot.slane %v9594_v45, %v9439_v20 }
 0x282   :  { %4374 = vmatpush1.bf16.msra.mxu1 %v8523_v0  ;;  %v8637_v0 = vld [vmem:[#allocation11 + $0x150] ss:$24 sps:$4 sm:$0xff]  }
 0x283   :  { %4375 = vmatprep.subr.bf16.mxu1 %v8531_v34  ;;  %v8645_v34 = vld [vmem:[#allocation11 + $0x124] ss:$24 sps:$4 sm:$0xff]  }
 0x284   :  { %4527 = vmatpush1.bf16.msra.mxu0 %v8526_v54  ;;  %v4190_v54 = vadd.f32 %v9570_v48, %v2688_v26  ;;  %v8651_v48 = vld [vmem:[#allocation11 + $0xf4] ss:$24 sps:$4 sm:$0xff]  }
 0x285   :  { %4528 = vmatprep.subr.bf16.mxu0 %v8534_v49  ;;  %v8580_v49 = vld [vmem:[#allocation8 + $0x130] ss:$24 sps:$4 sm:$0xff]  }
 0x286   :  { %4376 = vmatpush2.bf16.msra.mxu1 %v8529_v16 }
 0x287   :  { %4377 = vmatprep.subr.bf16.mxu1 %v8537_v38  ;;  %v8585_v38 = vld [vmem:[#allocation8 + $0x104] ss:$24 sps:$4 sm:$0xff]  }
 0x288   :  { %4529 = vmatpush2.bf16.msra.mxu0 %v8532_v59  ;;  %v4192_v59 = vadd.f32 %v9576_v53, %v2692_v33  ;;  %v4196_v53 = vadd.f32 %v9584_v3, %v2692_v33 }
 0x289   :  { %4530 = vmatprep.subr.bf16.mxu0 %v8540_v41 }
 0x28a   :  { %4378 = vmatpush2.bf16.msra.mxu1 %v8535_v43  ;;  %v8643_v43 = vld [vmem:[#allocation11 + $0x120] ss:$24 sps:$4 sm:$0xff]  }
 0x28b   :  { %4379 = vmatprep.subr.bf16.mxu1 %v8543_v44 }
 0x28c   :  { %4531 = vmatpush2.bf16.msra.mxu0 %v8538_v52  ;;  %v4194_v52 = vadd.f32 %v9580_v56, %v2688_v26  ;;  %v4200_v56 = vadd.f32 %v9586_v60, %v2688_v26  ;;  %v8663_v60 = vld [vmem:[#allocation11 + $0x94] ss:$24 sps:$4 sm:$0xff]  }
 0x28d   :  { %4532 = vmatprep.subr.bf16.mxu0 %v8546_v36  ;;  %v8598_v26 = vld [vmem:[#allocation8 + $0x10] ss:$24 sps:$4 sm:$0xff]  }
 0x28e   :  { %4380 = vmatpush2.bf16.msra.mxu1 %v8541_v47 }
 0x28f   :  { %4381 = vmatprep.subr.bf16.mxu1 %v8549_v15  ;;  %v8588_v15 = vld [vmem:[#allocation8 + $0xd4] ss:$24 sps:$4 sm:$0xff]  }
 0x290   :  { %4533 = vmatpush2.bf16.msra.mxu0 %v8544_v11 }
 0x291   :  { %4534 = vmatprep.subr.bf16.mxu0 %v8552_v10 }
 0x292   :  { %4382 = vmatpush2.bf16.msra.mxu1 %v8547_v31  ;;  %v8657_v31 = vld [vmem:[#allocation11 + $0xc4] ss:$24 sps:$4 sm:$0xff]  }
 0x293   :  { %4383 = vmatprep.subr.bf16.mxu1 %v8555_v22 }
 0x294   :  { %4535 = vmatpush2.bf16.msra.mxu0 %v8550_v57  ;;  %v8586_v57 = vld [vmem:[#allocation8 + $0xd0] ss:$24 sps:$4 sm:$0xff]  }
 0x295   :  { %4536 = vmatprep.subr.bf16.mxu0 %v8558_v27  ;;  %v8591_v27 = vld [vmem:[#allocation8 + $0xa4] ss:$24 sps:$4 sm:$0xff]  }
 0x296   :  { %4384 = vmatpush2.bf16.msra.mxu1 %v8553_v13  ;;  %v4202_v13 = vadd.f32 %v9591_v1, %v2692_v33  ;;  %v8592_v1 = vld [vmem:[#allocation8 + $0x70] ss:$24 sps:$4 sm:$0xff]  }
 0x297   :  { %4385 = vmatprep.subr.bf16.mxu1 %v8561_v18  ;;  %v8687_v33 = vld [vmem:[#allocation11 + $0x2d4] ss:$24 sps:$4 sm:$0xff]  }
 0x298   :  { %4537 = vmatpush2.bf16.msra.mxu0 %v8556_v40  ;;  %v8655_v40 = vld [vmem:[#allocation11 + $0xc0] ss:$24 sps:$4 sm:$0xff]  }
 0x299   :  { %4538 = vmatprep.subr.bf16.mxu0 %v8564_v63 }
 0x29a   :  { %4386 = vmatpush2.bf16.msra.mxu1 %v8559_v5 }
 0x29b   :  { %4387 = vmatprep.subr.bf16.mxu1 %v8567_v6  ;;  %v8589_v6 = vld [vmem:[#allocation8 + $0xa0] ss:$24 sps:$4 sm:$0xff]  }
 0x29c   :  { %4539 = vmatpush2.bf16.msra.mxu0 %v8562_v9 }
 0x29d   :  { %4540 = vmatprep.subr.bf16.mxu0 %v8570_v37 }
 0x29e   :  { %4388 = vmatpush2.bf16.msra.mxu1 %v8565_v14  ;;  %v8669_v14 = vld [vmem:[#allocation11 + $0x64] ss:$24 sps:$4 sm:$0xff]  }
 0x29f   :  { %4389 = vmatprep.subr.bf16.mxu1 %v8573_v55  ;;  %v8597_v55 = vld [vmem:[#allocation8 + $0x44] ss:$24 sps:$4 sm:$0xff]  }
 0x2a0   :  { %4541 = vmatpush2.bf16.msra.mxu0 %v8568_v35  ;;  %v8667_v35 = vld [vmem:[#allocation11 + $0x60] ss:$24 sps:$4 sm:$0xff]  }
 0x2a1   :  { %4542 = vmatprep.subr.bf16.mxu0 %v8576_v32  ;;  %v8675_v32 = vld [vmem:[#allocation11 + $0x34] ss:$24 sps:$4 sm:$0xff]  }
 0x2a2   :  { %4390 = vmatpush2.bf16.msra.mxu1 %v8571_v28  ;;  %v8595_v28 = vld [vmem:[#allocation8 + $0x40] ss:$24 sps:$4 sm:$0xff]  }
 0x2a3   :  { %4461 = vmatprep.subr.bf16.mxu1 %v8579_v23  ;;  %v8600_v23 = vld [vmem:[#allocation8 + $0x14] ss:$24 sps:$4 sm:$0xff]  }
 0x2a4   :  { %4543 = vmatpush2.bf16.msra.mxu0 %v8574_v24  ;;  %v8673_v24 = vld [vmem:[#allocation11 + $0x30] ss:$24 sps:$4 sm:$0xff]  }
 0x2a5   :  { %4392 = vmatmul.mubr.bf16.vlgmr.msra.gmra.mxu1 %v9505_v2  ;;  %6404 = vmatprep.subr.bf16.mxu0 %v8639_v25  ;;  %v8681_v25 = vld [vmem:[#allocation11 + $0x4] ss:$24 sps:$4 sm:$0xff]  }
 0x2a6   :  { %4401 = vmatprep.mubr.bf16.mxu1 %v9509_v12  ;;  %4462 = vmatpush1.bf16.msra.mxu1 %v8577_v30  ;;  %v8603_v30 = vld [vmem:[#allocation8 + $0x2e4] ss:$24 sps:$4 sm:$0xff]  }
 0x2a7   :  { %4545 = vmatmul.mubr.bf16.vlgmr.msra.gmra.mxu0 %v9505_v2  ;;  %v4240_v16 = vpop.f32.mrf.mxu0  ;;  %4463 = vmatprep.subr.bf16.mxu1 %v8582_v62  ;;  %v8583_v2 = vld [vmem:[#allocation8 + $0x100] ss:$24 sps:$4 sm:$0xff]  }
 0x2a8   :  { %v9605_v41 = vadd.f32 %v4240_v16, %v4190_v54  ;;  %4554 = vmatprep.mubr.bf16.mxu0 %v9509_v12  ;;  %6405 = vmatpush1.bf16.msra.mxu0 %v8637_v0  ;;  %v8649_v12 = vld [vmem:[#allocation11 + $0xf0] ss:$24 sps:$4 sm:$0xff]   ;;  %v8679_v62 = vld [vmem:[#allocation11] ss:$24 sps:$4 sm:$0xff]  }
 0x2a9   :  { %v4242_v44 = vpop.f32.mrf.mxu0  ;;  %6406 = vmatprep.subr.bf16.mxu0 %v8645_v34  ;;  %v8601_v0 = vld [vmem:[#allocation8 + $0x2e0] ss:$24 sps:$4 sm:$0xff]   ;;  %v8606_v34 = vld [vmem:[#allocation8 + $0x2b4] ss:$24 sps:$4 sm:$0xff]   ;;  %v8604_v16 = vld [vmem:[#allocation8 + $0x2b0] ss:$24 sps:$4 sm:$0xff]  }
 0x2aa   :  { %v9609_v36 = vadd.f32 %v4242_v44, %v4192_v59  ;;  %4464 = vmatpush1.bf16.msra.mxu1 %v8580_v49  ;;  %v8685_v54 = vld [vmem:[#allocation11 + $0x2d0] ss:$24 sps:$4 sm:$0xff]   ;;  %v8693_v49 = vld [vmem:[#allocation11 + $0x2a4] ss:$24 sps:$4 sm:$0xff]   ;;  %v8691_v59 = vld [vmem:[#allocation11 + $0x2a0] ss:$24 sps:$4 sm:$0xff]  }
 0x2ab   :  { %v4244_v47 = vpop.f32.mrf.mxu0  ;;  %4465 = vmatprep.subr.bf16.mxu1 %v8585_v38  ;;  %v8609_v38 = vld [vmem:[#allocation8 + $0x284] ss:$24 sps:$4 sm:$0xff]   ;;  %v8607_v44 = vld [vmem:[#allocation8 + $0x280] ss:$24 sps:$4 sm:$0xff]  }
 0x2ac   :  { %v9612_v11 = vadd.f32 %v4244_v47, %v4194_v52  ;;  %6407 = vmatpush1.bf16.msra.mxu0 %v8643_v43  ;;  %v8699_v43 = vld [vmem:[#allocation11 + $0x274] ss:$24 sps:$4 sm:$0xff]   ;;  %v8697_v52 = vld [vmem:[#allocation11 + $0x270] ss:$24 sps:$4 sm:$0xff]  }
 0x2ad   :  { %4402 = vmatmul.mubr.bf16.gmra.mxu1 %v9512_v19  ;;  %v4246_v10 = vpop.f32.mrf.mxu0  ;;  %6408 = vmatprep.subr.bf16.mxu0 %v8651_v48  ;;  %v8612_v48 = vld [vmem:[#allocation8 + $0x254] ss:$24 sps:$4 sm:$0xff]   ;;  %v8610_v47 = vld [vmem:[#allocation8 + $0x250] ss:$24 sps:$4 sm:$0xff]  }
 0x2ae   :  { %v9616_v22 = vadd.f32 %v4246_v10, %v4196_v53  ;;  %4466 = vmatpush1.bf16.msra.mxu1 %v8583_v2  ;;  %4493 = vmatprep.mubr.bf16.mxu1 %v9473_v4  ;;  %v8594_v4 = vld [vmem:[#allocation8 + $0x74] ss:$24 sps:$4 sm:$0xff]   ;;  %v8703_v53 = vld [vmem:[#allocation11 + $0x240] ss:$24 sps:$4 sm:$0xff]  }
 0x2af   :  { %4555 = vmatmul.mubr.bf16.gmra.mxu0 %v9512_v19  ;;  %v4250_v3 = vpop.f32.mrf.mxu0  ;;  %4467 = vmatprep.subr.bf16.mxu1 %v8588_v15  ;;  %v8661_v19 = vld [vmem:[#allocation11 + $0x90] ss:$24 sps:$4 sm:$0xff]   ;;  %v8705_v2 = vld [vmem:[#allocation11 + $0x244] ss:$24 sps:$4 sm:$0xff]  }
 0x2b0   :  { %v9621_v18 = vadd.f32 %v4250_v3, %v4200_v56  ;;  %6409 = vmatpush1.bf16.msra.mxu0 %v8649_v12  ;;  %v8615_v15 = vld [vmem:[#allocation8 + $0x224] ss:$24 sps:$4 sm:$0xff]   ;;  %v8613_v10 = vld [vmem:[#allocation8 + $0x220] ss:$24 sps:$4 sm:$0xff]   ;;  %v8616_v3 = vld [vmem:[#allocation8 + $0x1f0] ss:$24 sps:$4 sm:$0xff]  }
 0x2b1   :  { %v4252_v63 = vpop.f32.mrf.mxu0  ;;  %6410 = vmatprep.subr.bf16.mxu0 %v8657_v31  ;;  %v8711_v12 = vld [vmem:[#allocation11 + $0x214] ss:$24 sps:$4 sm:$0xff]   ;;  %v8709_v56 = vld [vmem:[#allocation11 + $0x210] ss:$24 sps:$4 sm:$0xff]  }
 0x2b2   :  { %v9623_v5 = vadd.f32 %v4252_v63, %v4202_v13  ;;  %4468 = vmatpush1.bf16.msra.mxu1 %v8586_v57  ;;  %v8618_v31 = vld [vmem:[#allocation8 + $0x1f4] ss:$24 sps:$4 sm:$0xff]   ;;  %v8712_v13 = vld [vmem:[#allocation11 + $0x1e0] ss:$24 sps:$4 sm:$0xff]  }
 0x2b3   :  { %4469 = vmatprep.subr.bf16.mxu1 %v8591_v27  ;;  %v4254_v9 = vpop.f32.mrf.mxu0  ;;  %v8714_v57 = vld [vmem:[#allocation11 + $0x1e4] ss:$24 sps:$4 sm:$0xff]  }
 0x2b4   :  { %6411 = vmatpush1.bf16.msra.mxu0 %v8655_v40  ;;  %v8621_v27 = vld [vmem:[#allocation8 + $0x1c4] ss:$24 sps:$4 sm:$0xff]   ;;  %v8619_v63 = vld [vmem:[#allocation8 + $0x1c0] ss:$24 sps:$4 sm:$0xff]   ;;  %v8622_v9 = vld [vmem:[#allocation8 + $0x190] ss:$24 sps:$4 sm:$0xff]  }
 0x2b5   :  { %v4255_v37 = vpop.f32.mrf.mxu0  ;;  %6412 = vmatprep.subr.bf16.mxu0 %v8663_v60  ;;  %v8717_v40 = vld [vmem:[#allocation11 + $0x1b4] ss:$24 sps:$4 sm:$0xff]  }
 0x2b6   :  { %4470 = vmatpush1.bf16.msra.mxu1 %v8589_v6  ;;  %v8624_v60 = vld [vmem:[#allocation8 + $0x194] ss:$24 sps:$4 sm:$0xff]   ;;  %v8718_v37 = vld [vmem:[#allocation11 + $0x180] ss:$24 sps:$4 sm:$0xff]  }
 0x2b7   :  { %4471 = vmatprep.subr.bf16.mxu1 %v8594_v4  ;;  %v8715_v6 = vld [vmem:[#allocation11 + $0x1b0] ss:$24 sps:$4 sm:$0xff]   ;;  %v8720_v4 = vld [vmem:[#allocation11 + $0x184] ss:$24 sps:$4 sm:$0xff]  }
 0x2b8   :  { %6413 = vmatpush1.bf16.msra.mxu0 %v8661_v19  ;;  %v8627_v19 = vld [vmem:[#allocation8 + $0x764] ss:$24 sps:$4 sm:$0xff]  }
 0x2b9   :  { %6414 = vmatprep.subr.bf16.mxu0 %v8669_v14  ;;  %v8625_v14 = vld [vmem:[#allocation8 + $0x760] ss:$24 sps:$4 sm:$0xff]  }
 0x2ba   :  { %4472 = vmatpush1.bf16.msra.mxu1 %v8592_v1  ;;  %v8630_v1 = vld [vmem:[#allocation8 + $0x734] ss:$24 sps:$4 sm:$0xff]  }
 0x2bb   :  { %4473 = vmatprep.subr.bf16.mxu1 %v8597_v55  ;;  %v8628_v55 = vld [vmem:[#allocation8 + $0x730] ss:$24 sps:$4 sm:$0xff]  }
 0x2bc   :  { %6415 = vmatpush1.bf16.msra.mxu0 %v8667_v35 }
 0x2bd   :  { %6416 = vmatprep.subr.bf16.mxu0 %v8675_v32  ;;  %v8633_v32 = vld [vmem:[#allocation8 + $0x704] ss:$24 sps:$4 sm:$0xff]  }
 0x2be   :  { %4474 = vmatpush1.bf16.msra.mxu1 %v8595_v28 }
 0x2bf   :  { %4475 = vmatprep.subr.bf16.mxu1 %v8600_v23  ;;  %v8631_v23 = vld [vmem:[#allocation8 + $0x700] ss:$24 sps:$4 sm:$0xff]  }
 0x2c0   :  { %6417 = vmatpush1.bf16.msra.mxu0 %v8673_v24 }
 0x2c1   :  { %6418 = vmatprep.subr.bf16.mxu0 %v8681_v25  ;;  %v8636_v25 = vld [vmem:[#allocation8 + $0x6d4] ss:$24 sps:$4 sm:$0xff]  }
 0x2c2   :  { %4476 = vmatpush1.bf16.msra.mxu1 %v8598_v26 }
 0x2c3   :  { %4477 = vmatprep.subr.bf16.mxu1 %v8603_v30  ;;  %v8642_v30 = vld [vmem:[#allocation8 + $0x6a4] ss:$24 sps:$4 sm:$0xff]  }
 0x2c4   :  { %6419 = vmatpush1.bf16.msra.mxu0 %v8679_v62 }
 0x2c5   :  { %6420 = vmatprep.subr.bf16.mxu0 %v8687_v33  ;;  %v8640_v33 = vld [vmem:[#allocation8 + $0x6a0] ss:$24 sps:$4 sm:$0xff]  }
 0x2c6   :  { %4478 = vmatpush2.bf16.msra.mxu1 %v8601_v0 }
 0x2c7   :  { %4479 = vmatprep.subr.bf16.mxu1 %v8606_v34  ;;  %v8648_v34 = vld [vmem:[#allocation8 + $0x674] ss:$24 sps:$4 sm:$0xff]  }
 0x2c8   :  { %6421 = vmatpush2.bf16.msra.mxu0 %v8685_v54 }
 0x2c9   :  { %6422 = vmatprep.subr.bf16.mxu0 %v8693_v49  ;;  %v8646_v49 = vld [vmem:[#allocation8 + $0x670] ss:$24 sps:$4 sm:$0xff]  }
 0x2ca   :  { %4480 = vmatpush2.bf16.msra.mxu1 %v8604_v16  ;;  %v8652_v16 = vld [vmem:[#allocation8 + $0x640] ss:$24 sps:$4 sm:$0xff]  }
 0x2cb   :  { %4481 = vmatprep.subr.bf16.mxu1 %v8609_v38  ;;  %v8658_v38 = vld [vmem:[#allocation8 + $0x610] ss:$24 sps:$4 sm:$0xff]  }
 0x2cc   :  { %6423 = vmatpush2.bf16.msra.mxu0 %v8691_v59  ;;  %v8666_v59 = vld [vmem:[#allocation8 + $0x8e4] ss:$24 sps:$4 sm:$0xff]  }
 0x2cd   :  { %6424 = vmatprep.subr.bf16.mxu0 %v8699_v43  ;;  %v8664_v43 = vld [vmem:[#allocation8 + $0x8e0] ss:$24 sps:$4 sm:$0xff]  }
 0x2ce   :  { %4482 = vmatpush2.bf16.msra.mxu1 %v8607_v44  ;;  %v8672_v44 = vld [vmem:[#allocation8 + $0x8b4] ss:$24 sps:$4 sm:$0xff]  }
 0x2cf   :  { %4483 = vmatprep.subr.bf16.mxu1 %v8612_v48  ;;  %v8670_v48 = vld [vmem:[#allocation8 + $0x8b0] ss:$24 sps:$4 sm:$0xff]  }
 0x2d0   :  { %6425 = vmatpush2.bf16.msra.mxu0 %v8697_v52  ;;  %v8678_v52 = vld [vmem:[#allocation8 + $0x884] ss:$24 sps:$4 sm:$0xff]  }
 0x2d1   :  { %6426 = vmatprep.subr.bf16.mxu0 %v8705_v2  ;;  %v8676_v2 = vld [vmem:[#allocation8 + $0x880] ss:$24 sps:$4 sm:$0xff]  }
 0x2d2   :  { %4484 = vmatpush2.bf16.msra.mxu1 %v8610_v47  ;;  %v8684_v47 = vld [vmem:[#allocation8 + $0x854] ss:$24 sps:$4 sm:$0xff]  }
 0x2d3   :  { %4485 = vmatprep.subr.bf16.mxu1 %v8615_v15  ;;  %v8682_v15 = vld [vmem:[#allocation8 + $0x850] ss:$24 sps:$4 sm:$0xff]  }
 0x2d4   :  { %6427 = vmatpush2.bf16.msra.mxu0 %v8703_v53  ;;  %v8690_v53 = vld [vmem:[#allocation8 + $0x824] ss:$24 sps:$4 sm:$0xff]  }
 0x2d5   :  { %6428 = vmatprep.subr.bf16.mxu0 %v8711_v12  ;;  %v8688_v12 = vld [vmem:[#allocation8 + $0x820] ss:$24 sps:$4 sm:$0xff]  }
 0x2d6   :  { %4486 = vmatpush2.bf16.msra.mxu1 %v8613_v10  ;;  %v8696_v10 = vld [vmem:[#allocation8 + $0x7f4] ss:$24 sps:$4 sm:$0xff]  }
 0x2d7   :  { %4487 = vmatprep.subr.bf16.mxu1 %v8618_v31  ;;  %v8694_v31 = vld [vmem:[#allocation8 + $0x7f0] ss:$24 sps:$4 sm:$0xff]  }
 0x2d8   :  { %6429 = vmatpush2.bf16.msra.mxu0 %v8709_v56  ;;  %v8702_v56 = vld [vmem:[#allocation8 + $0x7c4] ss:$24 sps:$4 sm:$0xff]  }
 0x2d9   :  { %6430 = vmatprep.subr.bf16.mxu0 %v8714_v57  ;;  %v8700_v57 = vld [vmem:[#allocation8 + $0x7c0] ss:$24 sps:$4 sm:$0xff]  }
 0x2da   :  { %4488 = vmatpush2.bf16.msra.mxu1 %v8616_v3  ;;  %v8708_v3 = vld [vmem:[#allocation8 + $0x794] ss:$24 sps:$4 sm:$0xff]  }
 0x2db   :  { %4489 = vmatprep.subr.bf16.mxu1 %v8621_v27  ;;  %v8706_v27 = vld [vmem:[#allocation8 + $0x790] ss:$24 sps:$4 sm:$0xff]  }
 0x2dc   :  { %6431 = vmatpush2.bf16.msra.mxu0 %v8712_v13  ;;  %v8723_v13 = vld [vmem:[#allocation11 + $0x454] ss:$24 sps:$4 sm:$0xff]  }
 0x2dd   :  { %6432 = vmatprep.subr.bf16.mxu0 %v8717_v40  ;;  %v8721_v40 = vld [vmem:[#allocation11 + $0x450] ss:$24 sps:$4 sm:$0xff]  }
 0x2de   :  { %4490 = vmatpush2.bf16.msra.mxu1 %v8619_v63  ;;  %v8726_v63 = vld [vmem:[#allocation11 + $0x424] ss:$24 sps:$4 sm:$0xff]  }
 0x2df   :  { %4491 = vmatprep.subr.bf16.mxu1 %v8624_v60 }
 0x2e0   :  { %6433 = vmatpush2.bf16.msra.mxu0 %v8715_v6  ;;  %v8724_v6 = vld [vmem:[#allocation11 + $0x420] ss:$24 sps:$4 sm:$0xff]  }
 0x2e1   :  { %6434 = vmatprep.subr.bf16.mxu0 %v8720_v4 }
 0x2e2   :  { %4492 = vmatpush2.bf16.msra.mxu1 %v8622_v9 }
 0x2e3   :  { %4563 = vmatprep.subr.bf16.mxu1 %v8627_v19  ;;  %v8729_v19 = vld [vmem:[#allocation11 + $0x3f4] ss:$24 sps:$4 sm:$0xff]  }
 0x2e4   :  { %6435 = vmatpush2.bf16.msra.mxu0 %v8718_v37 }
 0x2e5   :  { %4494 = vmatmul.mubr.bf16.vlgmr.msra.gmra.mxu1 %v9475_v46  ;;  %v8634_v46 = vld [vmem:[#allocation8 + $0x6d0] ss:$24 sps:$4 sm:$0xff]  }
 0x2e6   :  { %4503 = vmatprep.mubr.bf16.mxu1 %v9481_v42  ;;  %4564 = vmatpush1.bf16.msra.mxu1 %v8625_v14 }
 0x2e7   :  { %v9627_v35 = vpop.f32.mrf.mxu0  ;;  %4565 = vmatprep.subr.bf16.mxu1 %v8630_v1 }
 0x2e9   :  { %v9629_v28 = vpop.f32.mrf.mxu0 }
 0x2ea   :  { %4566 = vmatpush1.bf16.msra.mxu1 %v8628_v55 }
 0x2eb   :  { %v9631_v24 = vpop.f32.mrf.mxu0  ;;  %4567 = vmatprep.subr.bf16.mxu1 %v8633_v32 }
 0x2ed   :  { %v9633_v26 = vpop.f32.mrf.mxu0  ;;  %4504 = vmatmul.mubr.bf16.gmra.mxu1 %v9484_v29  ;;  %v8654_v29 = vld [vmem:[#allocation8 + $0x644] ss:$24 sps:$4 sm:$0xff]  }
 0x2ee   :  { %4568 = vmatpush1.bf16.msra.mxu1 %v8631_v23  ;;  %4595 = vmatprep.mubr.bf16.mxu1 %v9563_v61  ;;  %v8660_v61 = vld [vmem:[#allocation8 + $0x614] ss:$24 sps:$4 sm:$0xff]  }
 0x2ef   :  { %v9637_v42 = vpop.f32.mrf.mxu0  ;;  %4569 = vmatprep.subr.bf16.mxu1 %v8636_v25  ;;  %v8732_v25 = vld [vmem:[#allocation11 + $0x3c4] ss:$24 sps:$4 sm:$0xff]  }
 0x2f1   :  { %v9639_v62 = vpop.f32.mrf.mxu0 }
 0x2f2   :  { %4570 = vmatpush1.bf16.msra.mxu1 %v8634_v46 }
 0x2f3   :  { %v4356_v0 = vpop.f32.mrf.mxu0  ;;  %4571 = vmatprep.subr.bf16.mxu1 %v8642_v30 }
 0x2f5   :  { %v4357_v54 = vpop.f32.mrf.mxu0 }
 0x2f6   :  { %4572 = vmatpush1.bf16.msra.mxu1 %v8640_v33  ;;  %v8730_v54 = vld [vmem:[#allocation11 + $0x3c0] ss:$24 sps:$4 sm:$0xff]  }
 0x2f7   :  { %4573 = vmatprep.subr.bf16.mxu1 %v8648_v34 }
 0x2fa   :  { %4574 = vmatpush1.bf16.msra.mxu1 %v8646_v49 }
 0x2fb   :  { %4575 = vmatprep.subr.bf16.mxu1 %v8654_v29 }
 0x2fe   :  { %4576 = vmatpush1.bf16.msra.mxu1 %v8652_v16  ;;  %v8735_v16 = vld [vmem:[#allocation11 + $0x394] ss:$24 sps:$4 sm:$0xff]  }
 0x2ff   :  { %4577 = vmatprep.subr.bf16.mxu1 %v8660_v61 }
 0x302   :  { %4578 = vmatpush1.bf16.msra.mxu1 %v8658_v38 }
 0x303   :  { %4579 = vmatprep.subr.bf16.mxu1 %v8666_v59 }
 0x306   :  { %4580 = vmatpush2.bf16.msra.mxu1 %v8664_v43  ;;  %v8819_v43 = vld [vmem:[#allocation11 + $0x754] ss:$24 sps:$4 sm:$0xff]  }
 0x307   :  { %4581 = vmatprep.subr.bf16.mxu1 %v8672_v44  ;;  %6506 = vmatprep.subr.bf16.mxu0 %v8819_v43  ;;  %v8873_v43 = vld [vmem:[#allocation11 + $0x8a4] ss:$24 sps:$4 sm:$0xff]  }
 0x30a   :  { %4582 = vmatpush2.bf16.msra.mxu1 %v8670_v48  ;;  %v8733_v48 = vld [vmem:[#allocation11 + $0x390] ss:$24 sps:$4 sm:$0xff]  }
 0x30b   :  { %4583 = vmatprep.subr.bf16.mxu1 %v8678_v52  ;;  %v8817_v52 = vld [vmem:[#allocation11 + $0x750] ss:$24 sps:$4 sm:$0xff]  }
 0x30e   :  { %4584 = vmatpush2.bf16.msra.mxu1 %v8676_v2 }
 0x30f   :  { %4585 = vmatprep.subr.bf16.mxu1 %v8684_v47 }
 0x312   :  { %4586 = vmatpush2.bf16.msra.mxu1 %v8682_v15  ;;  %v8738_v15 = vld [vmem:[#allocation11 + $0x364] ss:$24 sps:$4 sm:$0xff]  }
 0x313   :  { %4587 = vmatprep.subr.bf16.mxu1 %v8690_v53 }
 0x316   :  { %4588 = vmatpush2.bf16.msra.mxu1 %v8688_v12  ;;  %v8825_v12 = vld [vmem:[#allocation11 + $0x724] ss:$24 sps:$4 sm:$0xff]  }
 0x317   :  { %4589 = vmatprep.subr.bf16.mxu1 %v8696_v10  ;;  %v8736_v10 = vld [vmem:[#allocation11 + $0x360] ss:$24 sps:$4 sm:$0xff]  }
 0x31a   :  { %4590 = vmatpush2.bf16.msra.mxu1 %v8694_v31  ;;  %v8823_v31 = vld [vmem:[#allocation11 + $0x720] ss:$24 sps:$4 sm:$0xff]  }
 0x31b   :  { %4591 = vmatprep.subr.bf16.mxu1 %v8702_v56  ;;  %v8741_v56 = vld [vmem:[#allocation11 + $0x334] ss:$24 sps:$4 sm:$0xff]  }
 0x31e   :  { %4592 = vmatpush2.bf16.msra.mxu1 %v8700_v57 }
 0x31f   :  { %4593 = vmatprep.subr.bf16.mxu1 %v8708_v3  ;;  %v8831_v3 = vld [vmem:[#allocation11 + $0x6f4] ss:$24 sps:$4 sm:$0xff]  }
 0x322   :  { %4594 = vmatpush2.bf16.msra.mxu1 %v8706_v27  ;;  %v8739_v27 = vld [vmem:[#allocation11 + $0x330] ss:$24 sps:$4 sm:$0xff]  }
 0x323   :  { %6455 = vmatprep.subr.bf16.mxu1 %v8723_v13  ;;  %v8829_v13 = vld [vmem:[#allocation11 + $0x6f0] ss:$24 sps:$4 sm:$0xff]  }
 0x325   :  { %4596 = vmatmul.mubr.bf16.vlgmr.msra.gmra.mxu1 %v9565_v39  ;;  %v4291_v60 = vpop.f32.mrf.mxu1  ;;  %v8727_v39 = vld [vmem:[#allocation11 + $0x3f0] ss:$24 sps:$4 sm:$0xff]  }
 0x326   :  { %4605 = vmatprep.mubr.bf16.mxu1 %v9573_v17  ;;  %6456 = vmatpush1.bf16.msra.mxu1 %v8721_v40  ;;  %v4292_v37 = vadd.f32 %v4291_v60, %v9605_v41  ;;  %v8744_v40 = vld [vmem:[#allocation11 + $0x304] ss:$24 sps:$4 sm:$0xff]   ;;  %v8742_v60 = vld [vmem:[#allocation11 + $0x300] ss:$24 sps:$4 sm:$0xff]  }
 0x327   :  { %v9643_v4 = vpop.f32.mrf.mxu0  ;;  %v4293_v9 = vpop.f32.mrf.mxu1  ;;  %6457 = vmatprep.subr.bf16.mxu1 %v8726_v63  ;;  %v8837_v63 = vld [vmem:[#allocation11 + $0x6c4] ss:$24 sps:$4 sm:$0xff]  }
 0x328   :  { %v4294_v55 = vadd.f32 %v4293_v9, %v9609_v36  ;;  %v4614_v46 = vmax.f32 %v4292_v37, 0.0  ;;  %v8747_v9 = vld [vmem:[#allocation11 + $0x5d4] ss:$24 sps:$4 sm:$0xff]   ;;  %v8745_v37 = vld [vmem:[#allocation11 + $0x5d0] ss:$24 sps:$4 sm:$0xff]  }
 0x329   :  { %v9646_v14 = vpop.f32.mrf.mxu0  ;;  %v4295_v1 = vpop.f32.mrf.mxu1 }
 0x32a   :  { %v4296_v32 = vadd.f32 %v4295_v1, %v9612_v11  ;;  %6458 = vmatpush1.bf16.msra.mxu1 %v8724_v6  ;;  %v4615_v34 = vmax.f32 %v4294_v55, 0.0  ;;  %v8835_v6 = vld [vmem:[#allocation11 + $0x6c0] ss:$24 sps:$4 sm:$0xff]   ;;  %v8841_v1 = vld [vmem:[#allocation11 + $0x690] ss:$24 sps:$4 sm:$0xff]  }
 0x32b   :  { %v9650_v23 = vpop.f32.mrf.mxu0  ;;  %v4297_v17 = vpop.f32.mrf.mxu1  ;;  %6459 = vmatprep.subr.bf16.mxu1 %v8729_v19  ;;  %v8843_v19 = vld [vmem:[#allocation11 + $0x694] ss:$24 sps:$4 sm:$0xff]   ;;  %v8750_v55 = vld [vmem:[#allocation11 + $0x5a4] ss:$24 sps:$4 sm:$0xff]  }
 0x32c   :  { %v4620_v30 = vmax.f32 %v4296_v32, 0.0  ;;  %v4298_v33 = vadd.f32 %v4297_v17, %v9616_v22  ;;  %v8849_v32 = vld [vmem:[#allocation11 + $0x664] ss:$24 sps:$4 sm:$0xff]   ;;  %v8847_v17 = vld [vmem:[#allocation11 + $0x660] ss:$24 sps:$4 sm:$0xff]  }
 0x32d   :  { %v9653_v0 = vpop.f32.mrf.mxu0  ;;  %4606 = vmatmul.mubr.bf16.gmra.mxu1 %v9582_v58  ;;  %v4301_v41 = vpop.f32.mrf.mxu1 }
 0x32e   :  { %v9656_v36 = vpack.c.bf16 %v4620_v30, %v4614_v46  ;;  %v4621_v11 = vmax.f32 %v4298_v33, 0.0  ;;  %6460 = vmatpush1.bf16.msra.mxu1 %v8727_v39  ;;  %v4302_v38 = vadd.f32 %v4301_v41, %v9621_v18  ;;  %v8748_v39 = vld [vmem:[#allocation11 + $0x5a0] ss:$24 sps:$4 sm:$0xff]   ;;  %v8855_v46 = vld [vmem:[#allocation11 + $0x634] ss:$24 sps:$4 sm:$0xff]  }
 0x32f   :  { %v9658_v49 = vpop.f32.mrf.mxu0  ;;  %v4303_v29 = vpop.f32.mrf.mxu1  ;;  %6461 = vmatprep.subr.bf16.mxu1 %v8732_v25  ;;  %v8753_v25 = vld [vmem:[#allocation11 + $0x574] ss:$24 sps:$4 sm:$0xff]   ;;  %v8751_v30 = vld [vmem:[#allocation11 + $0x570] ss:$24 sps:$4 sm:$0xff]   ;;  %v8756_v41 = vld [vmem:[#allocation11 + $0x544] ss:$24 sps:$4 sm:$0xff]  }
 0x330   :  { %v9660_v61 = vpack.c.bf16 %v4621_v11, %v4615_v34  ;;  %v4304_v22 = vadd.f32 %v4303_v29, %v9623_v5  ;;  %v4626_v18 = vmax.f32 %v4302_v38, 0.0  ;;  %v8853_v33 = vld [vmem:[#allocation11 + $0x630] ss:$24 sps:$4 sm:$0xff]   ;;  %v8861_v34 = vld [vmem:[#allocation11 + $0x604] ss:$24 sps:$4 sm:$0xff]  }
 0x331   :  { %v9664_v59 = vpop.f32.mrf.mxu0  ;;  %v4305_v58 = vpop.f32.mrf.mxu1  ;;  %v8754_v11 = vld [vmem:[#allocation11 + $0x540] ss:$24 sps:$4 sm:$0xff]   ;;  %v8759_v29 = vld [vmem:[#allocation11 + $0x514] ss:$24 sps:$4 sm:$0xff]   ;;  %v8865_v38 = vld [vmem:[#allocation11 + $0x8d0] ss:$24 sps:$4 sm:$0xff]  }
 0x332   :  { %v4627_v44 = vmax.f32 %v4304_v22, 0.0  ;;  %6436 = vmatprep.mubr.bf16.mxu0 %v9660_v61  ;;  %6462 = vmatpush1.bf16.msra.mxu1 %v8730_v54  ;;  %v9671_v57 = vpack.c.bf16 %v4626_v18, %v4626_v18  ;;  %v8859_v54 = vld [vmem:[#allocation11 + $0x600] ss:$24 sps:$4 sm:$0xff]   ;;  %v8757_v22 = vld [vmem:[#allocation11 + $0x510] ss:$24 sps:$4 sm:$0xff]  }
 0x333   :  { %v4458_v2 = vpop.f32.mrf.mxu0  ;;  %v4306_v47 = vpop.f32.mrf.mxu1  ;;  %6437 = vmatmul.mubr.bf16.vlgmr.msra.gmra.mxu0 %v9656_v36  ;;  %6463 = vmatprep.subr.bf16.mxu1 %v8735_v16  ;;  %v8867_v16 = vld [vmem:[#allocation11 + $0x8d4] ss:$24 sps:$4 sm:$0xff]   ;;  %v8762_v58 = vld [vmem:[#allocation11 + $0x4e4] ss:$24 sps:$4 sm:$0xff]  }
 0x334   :  { %v9668_v53 = vpack.c.bf16 %v4627_v44, %v4627_v44  ;;  %6507 = vmatpush1.bf16.msra.mxu0 %v8817_v52  ;;  %v8760_v44 = vld [vmem:[#allocation11 + $0x4e0] ss:$24 sps:$4 sm:$0xff]   ;;  %v8765_v52 = vld [vmem:[#allocation11 + $0x4b4] ss:$24 sps:$4 sm:$0xff]   ;;  %v8763_v47 = vld [vmem:[#allocation11 + $0x4b0] ss:$24 sps:$4 sm:$0xff]  }
 0x335   :  { %v4459_v5 = vpop.f32.mrf.mxu0  ;;  %6508 = vmatprep.subr.bf16.mxu0 %v8825_v12  ;;  %v8879_v2 = vld [vmem:[#allocation11 + $0x874] ss:$24 sps:$4 sm:$0xff]   ;;  %v8768_v18 = vld [vmem:[#allocation11 + $0x484] ss:$24 sps:$4 sm:$0xff]   ;;  %v8766_v12 = vld [vmem:[#allocation11 + $0x480] ss:$24 sps:$4 sm:$0xff]  }
 0x336   :  { %6446 = vmatprep.mubr.bf16.mxu0 %v9668_v53  ;;  %6464 = vmatpush1.bf16.msra.mxu1 %v8733_v48  ;;  %v8871_v48 = vld [vmem:[#allocation11 + $0x8a0] ss:$24 sps:$4 sm:$0xff]   ;;  %v8885_v5 = vld [vmem:[#allocation11 + $0x844] ss:$24 sps:$4 sm:$0xff]  }
 0x337   :  { %6465 = vmatprep.subr.bf16.mxu1 %v8738_v15  ;;  %v8877_v15 = vld [vmem:[#allocation11 + $0x870] ss:$24 sps:$4 sm:$0xff]  }
 0x338   :  { %6509 = vmatpush1.bf16.msra.mxu0 %v8823_v31  ;;  %v8771_v31 = vld [vmem:[#allocation11 + $0x15c] ss:$24 sps:$4 sm:$0xff]  }
 0x339   :  { %6510 = vmatprep.subr.bf16.mxu0 %v8831_v3  ;;  %v8891_v3 = vld [vmem:[#allocation11 + $0x814] ss:$24 sps:$4 sm:$0xff]  }
 0x33a   :  { %6466 = vmatpush1.bf16.msra.mxu1 %v8736_v10  ;;  %v8883_v10 = vld [vmem:[#allocation11 + $0x840] ss:$24 sps:$4 sm:$0xff]  }
 0x33b   :  { %6447 = vmatmul.mubr.bf16.gmra.mxu0 %v9671_v57  ;;  %6467 = vmatprep.subr.bf16.mxu1 %v8741_v56  ;;  %v2696_v56 = vrot.slane %v9594_v45, %v9491_v8 }
 0x33c   :  { %6511 = vmatpush1.bf16.msra.mxu0 %v8829_v13  ;;  %v8889_v13 = vld [vmem:[#allocation11 + $0x810] ss:$24 sps:$4 sm:$0xff]  }
 0x33d   :  { %6512 = vmatprep.subr.bf16.mxu0 %v8837_v63 }
 0x33e   :  { %6468 = vmatpush1.bf16.msra.mxu1 %v8739_v27  ;;  %v2700_v27 = vrot.slane %v9594_v45, %v9488_v7 }
 0x33f   :  { %6469 = vmatprep.subr.bf16.mxu1 %v8744_v40  ;;  %v4343_v40 = vadd.f32 %v9627_v35, %v2696_v56  ;;  %v8903_v35 = vld [vmem:[#allocation11 + $0x7b4] ss:$24 sps:$4 sm:$0xff]  }
 0x340   :  { %6513 = vmatpush1.bf16.msra.mxu0 %v8835_v6  ;;  %v4345_v6 = vadd.f32 %v9629_v28, %v2700_v27 }
 0x341   :  { %6514 = vmatprep.subr.bf16.mxu0 %v8843_v19  ;;  %v8895_v19 = vld [vmem:[#allocation11 + $0x7e0] ss:$24 sps:$4 sm:$0xff]  }
 0x342   :  { %6470 = vmatpush1.bf16.msra.mxu1 %v8742_v60  ;;  %v8897_v60 = vld [vmem:[#allocation11 + $0x7e4] ss:$24 sps:$4 sm:$0xff]  }
 0x343   :  { %6471 = vmatprep.subr.bf16.mxu1 %v8747_v9 }
 0x344   :  { %6515 = vmatpush1.bf16.msra.mxu0 %v8841_v1 }
 0x345   :  { %6516 = vmatprep.subr.bf16.mxu0 %v8849_v32 }
 0x346   :  { %6472 = vmatpush2.bf16.msra.mxu1 %v8745_v37 }
 0x347   :  { %6473 = vmatprep.subr.bf16.mxu1 %v8750_v55  ;;  %v4347_v55 = vadd.f32 %v9631_v24, %v2696_v56  ;;  %v4353_v24 = vadd.f32 %v9637_v42, %v2696_v56  ;;  %v8774_v56 = vld [vmem:[#allocation11 + $0x12c] ss:$24 sps:$4 sm:$0xff]  }
 0x348   :  { %6517 = vmatpush1.bf16.msra.mxu0 %v8847_v17 }
 0x349   :  { %6518 = vmatprep.subr.bf16.mxu0 %v8855_v46  ;;  %v4349_v46 = vadd.f32 %v9633_v26, %v2700_v27  ;;  %v8909_v26 = vld [vmem:[#allocation11 + $0x784] ss:$24 sps:$4 sm:$0xff]  }
 0x34a   :  { %6474 = vmatpush2.bf16.msra.mxu1 %v8748_v39 }
 0x34b   :  { %6475 = vmatprep.subr.bf16.mxu1 %v8753_v25 }
 0x34c   :  { %6519 = vmatpush1.bf16.msra.mxu0 %v8853_v33  ;;  %v8901_v33 = vld [vmem:[#allocation11 + $0x7b0] ss:$24 sps:$4 sm:$0xff]  }
 0x34d   :  { %6520 = vmatprep.subr.bf16.mxu0 %v8861_v34 }
 0x34e   :  { %6476 = vmatpush2.bf16.msra.mxu1 %v8751_v30 }
 0x34f   :  { %6477 = vmatprep.subr.bf16.mxu1 %v8756_v41 }
 0x350   :  { %6521 = vmatpush1.bf16.msra.mxu0 %v8859_v54  ;;  %v4355_v54 = vadd.f32 %v9639_v62, %v2700_v27 }
 0x351   :  { %6522 = vmatprep.subr.bf16.mxu0 %v8867_v16 }
 0x352   :  { %6478 = vmatpush2.bf16.msra.mxu1 %v8754_v11 }
 0x353   :  { %6479 = vmatprep.subr.bf16.mxu1 %v8759_v29 }
 0x354   :  { %6523 = vmatpush2.bf16.msra.mxu0 %v8865_v38 }
 0x355   :  { %6524 = vmatprep.subr.bf16.mxu0 %v8873_v43  ;;  %v8907_v43 = vld [vmem:[#allocation11 + $0x780] ss:$24 sps:$4 sm:$0xff]  }
 0x356   :  { %6480 = vmatpush2.bf16.msra.mxu1 %v8757_v22 }
 0x357   :  { %6481 = vmatprep.subr.bf16.mxu1 %v8762_v58 }
 0x358   :  { %6525 = vmatpush2.bf16.msra.mxu0 %v8871_v48 }
 0x359   :  { %6526 = vmatprep.subr.bf16.mxu0 %v8879_v2 }
 0x35a   :  { %6482 = vmatpush2.bf16.msra.mxu1 %v8760_v44 }
 0x35b   :  { %6483 = vmatprep.subr.bf16.mxu1 %v8765_v52 }
 0x35c   :  { %6527 = vmatpush2.bf16.msra.mxu0 %v8877_v15 }
 0x35d   :  { %6528 = vmatprep.subr.bf16.mxu0 %v8885_v5 }
 0x35e   :  { %6484 = vmatpush2.bf16.msra.mxu1 %v8763_v47 }
 0x35f   :  { %6485 = vmatprep.subr.bf16.mxu1 %v8768_v18  ;;  %v8915_v18 = vld [vmem:[#allocation11 + $0x45c] ss:$24 sps:$4 sm:$0xff]  }
 0x360   :  { %6529 = vmatpush2.bf16.msra.mxu0 %v8883_v10 }
 0x361   :  { %6530 = vmatprep.subr.bf16.mxu0 %v8891_v3 }
 0x362   :  { %6486 = vmatpush2.bf16.msra.mxu1 %v8766_v12  ;;  %v8769_v12 = vld [vmem:[#allocation11 + $0x158] ss:$24 sps:$4 sm:$0xff]  }
 0x363   :  { %6557 = vmatprep.subr.bf16.mxu1 %v8771_v31 }
 0x364   :  { %6531 = vmatpush2.bf16.msra.mxu0 %v8889_v13  ;;  %v8772_v13 = vld [vmem:[#allocation11 + $0x128] ss:$24 sps:$4 sm:$0xff]  }
 0x365   :  { %v4393_v63 = vpop.f32.mrf.mxu1  ;;  %6532 = vmatprep.subr.bf16.mxu0 %v8897_v60 }
 0x366   :  { %v4394_v9 = vadd.f32 %v4393_v63, %v4343_v40  ;;  %v8775_v63 = vld [vmem:[#allocation11 + $0xf8] ss:$24 sps:$4 sm:$0xff]  }
 0x367   :  { %v4395_v37 = vpop.f32.mrf.mxu1  ;;  %v9680_v1 = vpop.f32.mrf.mxu0 }
 0x368   :  { %v4445_v32 = vadd.f32 %v9643_v4, %v4394_v9  ;;  %v4396_v39 = vadd.f32 %v4395_v37, %v4345_v6  ;;  %6533 = vmatpush2.bf16.msra.mxu0 %v8895_v19  ;;  %v8780_v6 = vld [vmem:[#allocation11 + $0xcc] ss:$24 sps:$4 sm:$0xff]   ;;  %v8778_v9 = vld [vmem:[#allocation11 + $0xc8] ss:$24 sps:$4 sm:$0xff]   ;;  %v8783_v19 = vld [vmem:[#allocation11 + $0x9c] ss:$24 sps:$4 sm:$0xff]  }
 0x369   :  { %v4397_v17 = vpop.f32.mrf.mxu1  ;;  %v9684_v25 = vpop.f32.mrf.mxu0  ;;  %6534 = vmatprep.subr.bf16.mxu0 %v8903_v35  ;;  %v8781_v37 = vld [vmem:[#allocation11 + $0x98] ss:$24 sps:$4 sm:$0xff]   ;;  %v8792_v35 = vld [vmem:[#allocation11 + $0xc] ss:$24 sps:$4 sm:$0xff]  }
 0x36a   :  { %v4447_v28 = vadd.f32 %v9646_v14, %v4396_v39  ;;  %v4398_v30 = vadd.f32 %v4397_v17, %v4347_v55  ;;  %v4616_v22 = vmax.f32 %v4445_v32, 0.0  ;;  %v8786_v55 = vld [vmem:[#allocation11 + $0x6c] ss:$24 sps:$4 sm:$0xff]   ;;  %v8784_v32 = vld [vmem:[#allocation11 + $0x68] ss:$24 sps:$4 sm:$0xff]  }
 0x36b   :  { %v4399_v41 = vpop.f32.mrf.mxu1  ;;  %v9688_v34 = vpop.f32.mrf.mxu0  ;;  %v8789_v39 = vld [vmem:[#allocation11 + $0x3c] ss:$24 sps:$4 sm:$0xff]   ;;  %v8787_v17 = vld [vmem:[#allocation11 + $0x38] ss:$24 sps:$4 sm:$0xff]  }
 0x36c   :  { %v4449_v4 = vadd.f32 %v9650_v23, %v4398_v30  ;;  %v4400_v11 = vadd.f32 %v4399_v41, %v4349_v46  ;;  %6535 = vmatpush2.bf16.msra.mxu0 %v8901_v33  ;;  %v4617_v44 = vmax.f32 %v4447_v28, 0.0  ;;  %v8790_v46 = vld [vmem:[#allocation11 + $0x8] ss:$24 sps:$4 sm:$0xff]   ;;  %v8795_v28 = vld [vmem:[#allocation11 + $0x2dc] ss:$24 sps:$4 sm:$0xff]  }
 0x36d   :  { %v4403_v29 = vpop.f32.mrf.mxu1  ;;  %v9693_v16 = vpop.f32.mrf.mxu0  ;;  %6536 = vmatprep.subr.bf16.mxu0 %v8909_v26  ;;  %v8793_v30 = vld [vmem:[#allocation11 + $0x2d8] ss:$24 sps:$4 sm:$0xff]   ;;  %v8798_v33 = vld [vmem:[#allocation11 + $0x2ac] ss:$24 sps:$4 sm:$0xff]   ;;  %v8796_v41 = vld [vmem:[#allocation11 + $0x2a8] ss:$24 sps:$4 sm:$0xff]  }
 0x36e   :  { %v4622_v14 = vmax.f32 %v4449_v4, 0.0  ;;  %v4451_v38 = vadd.f32 %v9653_v0, %v4400_v11  ;;  %v4404_v58 = vadd.f32 %v4403_v29, %v4353_v24  ;;  %v8801_v24 = vld [vmem:[#allocation11 + $0x27c] ss:$24 sps:$4 sm:$0xff]   ;;  %v8799_v4 = vld [vmem:[#allocation11 + $0x278] ss:$24 sps:$4 sm:$0xff]  }
 0x36f   :  { %v4405_v48 = vpop.f32.mrf.mxu1  ;;  %v9696_v52 = vpop.f32.mrf.mxu0  ;;  %v8804_v11 = vld [vmem:[#allocation11 + $0x24c] ss:$24 sps:$4 sm:$0xff]   ;;  %v8807_v29 = vld [vmem:[#allocation11 + $0x21c] ss:$24 sps:$4 sm:$0xff]   ;;  %v8805_v26 = vld [vmem:[#allocation11 + $0x218] ss:$24 sps:$4 sm:$0xff]  }
 0x370   :  { %v9698_v42 = vpack.c.bf16 %v4622_v14, %v4616_v22  ;;  %v4623_v23 = vmax.f32 %v4451_v38, 0.0  ;;  %v4455_v62 = vadd.f32 %v9658_v49, %v4404_v58  ;;  %v4406_v2 = vadd.f32 %v4405_v48, %v4355_v54  ;;  %6537 = vmatpush2.bf16.msra.mxu0 %v8907_v43  ;;  %v8802_v54 = vld [vmem:[#allocation11 + $0x248] ss:$24 sps:$4 sm:$0xff]   ;;  %v8810_v14 = vld [vmem:[#allocation11 + $0x1ec] ss:$24 sps:$4 sm:$0xff]  }
 0x371   :  { %v4407_v47 = vpop.f32.mrf.mxu1  ;;  %v9701_v15 = vpop.f32.mrf.mxu0  ;;  %6608 = vmatprep.subr.bf16.mxu0 %v8915_v18  ;;  %v9717_v22 = vrot.slane %v9594_v45, %v9517_v50  ;;  %v9106_v38 = vld [vmem:[#allocation10] sm:$0x3f]  ;;  %v8808_v48 = vld [vmem:[#allocation11 + $0x1e8] ss:$24 sps:$4 sm:$0xff]  }
 0x372   :  { %v4457_v0 = vadd.f32 %v9664_v59, %v4406_v2  ;;  %v9704_v5 = vpack.c.bf16 %v4623_v23, %v4617_v44  ;;  %v4628_v40 = vmax.f32 %v4455_v62, 0.0  ;;  %v8777_v59 = vld [vmem:[#allocation11 + $0xfc] ss:$24 sps:$4 sm:$0xff]   ;;  %v9720_v58 = vrot.slane %v9106_v38, %v9520_v51  ;;  %v8811_v18 = vld [vmem:[#allocation11 + $0x1b8] ss:$24 sps:$4 sm:$0xff]  }
 0x373   :  { %v4408_v10 = vpop.f32.mrf.mxu1  ;;  %v4560_v31 = vpop.f32.mrf.mxu0  ;;  %v8813_v62 = vld [vmem:[#allocation11 + $0x1bc] ss:$24 sps:$4 sm:$0xff]   ;;  %v8892_v38 = vld [vmem:[#allocation11 + $0x818] ss:$24 sps:$4 sm:$0xff]  }
 0x374   :  { %v4629_v3 = vmax.f32 %v4457_v0, 0.0  ;;  %6487 = vmatprep.mubr.bf16.mxu1 %v9704_v5  ;;  %v9711_v60 = vpack.c.bf16 %v4628_v40, %v4628_v40  ;;  %v8816_v10 = vld [vmem:[#allocation11 + $0x18c] ss:$24 sps:$4 sm:$0xff]  }
 0x375   :  { %v4561_v27 = vpop.f32.mrf.mxu0  ;;  %6488 = vmatmul.mubr.bf16.vlgmr.msra.gmra.mxu1 %v9698_v42 }
 0x376   :  { %v9708_v49 = vpack.c.bf16 %v4629_v3, %v4629_v3  ;;  %6558 = vmatpush1.bf16.msra.mxu1 %v8769_v12  ;;  %v8814_v3 = vld [vmem:[#allocation11 + $0x188] ss:$24 sps:$4 sm:$0xff]  }
 0x377   :  { %6559 = vmatprep.subr.bf16.mxu1 %v8774_v56 }
 0x378   :  { %6497 = vmatprep.mubr.bf16.mxu1 %v9708_v49 }
 0x37a   :  { %6560 = vmatpush1.bf16.msra.mxu1 %v8772_v13 }
 0x37b   :  { %6561 = vmatprep.subr.bf16.mxu1 %v8777_v59 }
 0x37d   :  { %6498 = vmatmul.mubr.bf16.gmra.mxu1 %v9711_v60 }
 0x37e   :  { %6562 = vmatpush1.bf16.msra.mxu1 %v8775_v63  ;;  %6589 = vmatprep.mubr.bf16.mxu1 %v9660_v61  ;;  %v8828_v63 = vld [vmem:[#allocation11 + $0x72c] ss:$24 sps:$4 sm:$0xff]  }
 0x37f   :  { %6563 = vmatprep.subr.bf16.mxu1 %v8780_v6  ;;  %v8826_v6 = vld [vmem:[#allocation11 + $0x728] ss:$24 sps:$4 sm:$0xff]  }
 0x382   :  { %6564 = vmatpush1.bf16.msra.mxu1 %v8778_v9  ;;  %v8834_v9 = vld [vmem:[#allocation11 + $0x6fc] ss:$24 sps:$4 sm:$0xff]  }
 0x383   :  { %6565 = vmatprep.subr.bf16.mxu1 %v8783_v19  ;;  %v8832_v19 = vld [vmem:[#allocation11 + $0x6f8] ss:$24 sps:$4 sm:$0xff]  }
 0x386   :  { %6566 = vmatpush1.bf16.msra.mxu1 %v8781_v37  ;;  %v8840_v37 = vld [vmem:[#allocation11 + $0x6cc] ss:$24 sps:$4 sm:$0xff]  }
 0x387   :  { %6567 = vmatprep.subr.bf16.mxu1 %v8786_v55  ;;  %v8846_v55 = vld [vmem:[#allocation11 + $0x69c] ss:$24 sps:$4 sm:$0xff]  }
 0x38a   :  { %6568 = vmatpush1.bf16.msra.mxu1 %v8784_v32  ;;  %v8844_v32 = vld [vmem:[#allocation11 + $0x698] ss:$24 sps:$4 sm:$0xff]  }
 0x38b   :  { %6569 = vmatprep.subr.bf16.mxu1 %v8789_v39  ;;  %v8852_v39 = vld [vmem:[#allocation11 + $0x66c] ss:$24 sps:$4 sm:$0xff]  }
 0x38e   :  { %6570 = vmatpush1.bf16.msra.mxu1 %v8787_v17  ;;  %v8850_v17 = vld [vmem:[#allocation11 + $0x668] ss:$24 sps:$4 sm:$0xff]  }
 0x38f   :  { %6571 = vmatprep.subr.bf16.mxu1 %v8792_v35  ;;  %v8858_v35 = vld [vmem:[#allocation11 + $0x63c] ss:$24 sps:$4 sm:$0xff]  }
 0x392   :  { %6572 = vmatpush1.bf16.msra.mxu1 %v8790_v46  ;;  %v8856_v46 = vld [vmem:[#allocation11 + $0x638] ss:$24 sps:$4 sm:$0xff]  }
 0x393   :  { %6573 = vmatprep.subr.bf16.mxu1 %v8795_v28  ;;  %v8864_v28 = vld [vmem:[#allocation11 + $0x60c] ss:$24 sps:$4 sm:$0xff]  }
 0x396   :  { %6574 = vmatpush2.bf16.msra.mxu1 %v8793_v30  ;;  %v8862_v30 = vld [vmem:[#allocation11 + $0x608] ss:$24 sps:$4 sm:$0xff]  }
 0x397   :  { %6575 = vmatprep.subr.bf16.mxu1 %v8798_v33  ;;  %v8870_v33 = vld [vmem:[#allocation11 + $0x8dc] ss:$24 sps:$4 sm:$0xff]  }
 0x39a   :  { %6576 = vmatpush2.bf16.msra.mxu1 %v8796_v41  ;;  %v8868_v41 = vld [vmem:[#allocation11 + $0x8d8] ss:$24 sps:$4 sm:$0xff]  }
 0x39b   :  { %6577 = vmatprep.subr.bf16.mxu1 %v8801_v24  ;;  %v8876_v24 = vld [vmem:[#allocation11 + $0x8ac] ss:$24 sps:$4 sm:$0xff]  }
 0x39e   :  { %6578 = vmatpush2.bf16.msra.mxu1 %v8799_v4  ;;  %v8874_v4 = vld [vmem:[#allocation11 + $0x8a8] ss:$24 sps:$4 sm:$0xff]  }
 0x39f   :  { %6579 = vmatprep.subr.bf16.mxu1 %v8804_v11  ;;  %v8882_v11 = vld [vmem:[#allocation11 + $0x87c] ss:$24 sps:$4 sm:$0xff]  }
 0x3a2   :  { %6580 = vmatpush2.bf16.msra.mxu1 %v8802_v54  ;;  %v8880_v54 = vld [vmem:[#allocation11 + $0x878] ss:$24 sps:$4 sm:$0xff]  }
 0x3a3   :  { %6581 = vmatprep.subr.bf16.mxu1 %v8807_v29  ;;  %v8888_v29 = vld [vmem:[#allocation11 + $0x84c] ss:$24 sps:$4 sm:$0xff]  }
 0x3a5   :  { %v4495_v43 = vpop.f32.mrf.mxu1 }
 0x3a6   :  { %v4496_v44 = vadd.f32 %v4495_v43, %v9717_v22  ;;  %6582 = vmatpush2.bf16.msra.mxu1 %v8805_v26  ;;  %v8886_v26 = vld [vmem:[#allocation11 + $0x848] ss:$24 sps:$4 sm:$0xff]   ;;  %v8900_v43 = vld [vmem:[#allocation11 + $0x7ec] ss:$24 sps:$4 sm:$0xff]  }
 0x3a7   :  { %v4497_v23 = vpop.f32.mrf.mxu1  ;;  %6583 = vmatprep.subr.bf16.mxu1 %v8810_v14  ;;  %v8894_v14 = vld [vmem:[#allocation11 + $0x81c] ss:$24 sps:$4 sm:$0xff]  }
 0x3a8   :  { %v4498_v2 = vadd.f32 %v4497_v23, %v9720_v58  ;;  %v9725_v47 = vadd.f32 %v9680_v1, %v4496_v44  ;;  %v8822_v1 = vld [vmem:[#allocation11 + $0x75c] ss:$24 sps:$4 sm:$0xff]  }
 0x3a9   :  { %v9727_v45 = vpop.f32.mrf.mxu1 }
 0x3aa   :  { %6584 = vmatpush2.bf16.msra.mxu1 %v8808_v48  ;;  %v9730_v0 = vadd.f32 %v9684_v25, %v4498_v2  ;;  %v8820_v25 = vld [vmem:[#allocation11 + $0x758] ss:$24 sps:$4 sm:$0xff]   ;;  %v4500_v44 = vadd.f32 %v9727_v45, %v9717_v22 }
 0x3ab   :  { %v9732_v12 = vpop.f32.mrf.mxu1  ;;  %6585 = vmatprep.subr.bf16.mxu1 %v8813_v62  ;;  %v8898_v62 = vld [vmem:[#allocation11 + $0x7e8] ss:$24 sps:$4 sm:$0xff]  }
 0x3ac   :  { %v4502_v23 = vadd.f32 %v9732_v12, %v9720_v58  ;;  %v8904_v12 = vld [vmem:[#allocation11 + $0x7b8] ss:$24 sps:$4 sm:$0xff]  }
 0x3ad   :  { %v4505_v31 = vpop.f32.mrf.mxu1 }
 0x3ae   :  { %v4506_v56 = vadd.f32 %v4505_v31, %v9717_v22  ;;  %6586 = vmatpush2.bf16.msra.mxu1 %v8811_v18  ;;  %v8906_v18 = vld [vmem:[#allocation11 + $0x7bc] ss:$24 sps:$4 sm:$0xff]   ;;  %v4551_v31 = vadd.f32 %v9688_v34, %v4500_v44  ;;  %v4553_v45 = vadd.f32 %v9693_v16, %v4502_v23  ;;  %v8928_v44 = vld [vmem:[#allocation11 + $0x400] ss:$24 sps:$4 sm:$0xff]  }
 0x3af   :  { %v9735_v27 = vpop.f32.mrf.mxu1  ;;  %6587 = vmatprep.subr.bf16.mxu1 %v8816_v10  ;;  %v8936_v23 = vld [vmem:[#allocation11 + $0x3d4] ss:$24 sps:$4 sm:$0xff]  }
 0x3b0   :  { %v9738_v13 = vadd.f32 %v9696_v52, %v4506_v56  ;;  %v8838_v52 = vld [vmem:[#allocation11 + $0x6c8] ss:$24 sps:$4 sm:$0xff]  }
 0x3b1   :  { %v4509_v40 = vpop.f32.mrf.mxu1 }
 0x3b2   :  { %6588 = vmatpush2.bf16.msra.mxu1 %v8814_v3  ;;  %v4508_v3 = vadd.f32 %v9735_v27, %v9720_v58 }
 0x3b3   :  { %v4510_v59 = vpop.f32.mrf.mxu1  ;;  %6659 = vmatprep.subr.bf16.mxu1 %v8822_v1 }
 0x3b4   :  { %v4559_v58 = vadd.f32 %v9701_v15, %v4508_v3  ;;  %v8937_v3 = vld [vmem:[#allocation11 + $0x398] ss:$24 sps:$4 sm:$0xff]  }
 0x3b5   :  { %6590 = vmatmul.mubr.bf16.vlgmr.msra.gmra.mxu1 %v9656_v36 }
 0x3b6   :  { %6599 = vmatprep.mubr.bf16.mxu1 %v9668_v53  ;;  %6660 = vmatpush1.bf16.msra.mxu1 %v8820_v25  ;;  %v8912_v25 = vld [vmem:[#allocation11 + $0x78c] ss:$24 sps:$4 sm:$0xff]  }
 0x3b7   :  { %6661 = vmatprep.subr.bf16.mxu1 %v8828_v63 }
 0x3ba   :  { %6662 = vmatpush1.bf16.msra.mxu1 %v8826_v6 }
 0x3bb   :  { %6663 = vmatprep.subr.bf16.mxu1 %v8834_v9 }
 0x3bd   :  { %6600 = vmatmul.mubr.bf16.gmra.mxu1 %v9671_v57 }
 0x3be   :  { %6664 = vmatpush1.bf16.msra.mxu1 %v8832_v19 }
 0x3bf   :  { %6665 = vmatprep.subr.bf16.mxu1 %v8840_v37 }
 0x3c2   :  { %6666 = vmatpush1.bf16.msra.mxu1 %v8838_v52  ;;  %v8913_v52 = vld [vmem:[#allocation11 + $0x458] ss:$24 sps:$4 sm:$0xff]  }
 0x3c3   :  { %6667 = vmatprep.subr.bf16.mxu1 %v8846_v55  ;;  %v8918_v55 = vld [vmem:[#allocation11 + $0x464] ss:$24 sps:$4 sm:$0xff]  }
 0x3c6   :  { %6668 = vmatpush1.bf16.msra.mxu1 %v8844_v32 }
 0x3c7   :  { %6669 = vmatprep.subr.bf16.mxu1 %v8852_v39 }
 0x3ca   :  { %6670 = vmatpush1.bf16.msra.mxu1 %v8850_v17  ;;  %v8921_v17 = vld [vmem:[#allocation11 + $0x42c] ss:$24 sps:$4 sm:$0xff]  }
 0x3cb   :  { %6671 = vmatprep.subr.bf16.mxu1 %v8858_v35 }
 0x3ce   :  { %6672 = vmatpush1.bf16.msra.mxu1 %v8856_v46  ;;  %v8916_v46 = vld [vmem:[#allocation11 + $0x460] ss:$24 sps:$4 sm:$0xff]  }
 0x3cf   :  { %6673 = vmatprep.subr.bf16.mxu1 %v8864_v28 }
 0x3d2   :  { %6674 = vmatpush1.bf16.msra.mxu1 %v8862_v30  ;;  %v8924_v30 = vld [vmem:[#allocation11 + $0x434] ss:$24 sps:$4 sm:$0xff]  }
 0x3d3   :  { %6675 = vmatprep.subr.bf16.mxu1 %v8870_v33 }
 0x3d6   :  { %6676 = vmatpush2.bf16.msra.mxu1 %v8868_v41 }
 0x3d7   :  { %6677 = vmatprep.subr.bf16.mxu1 %v8876_v24 }
 0x3da   :  { %6678 = vmatpush2.bf16.msra.mxu1 %v8874_v4  ;;  %v8927_v4 = vld [vmem:[#allocation11 + $0x3fc] ss:$24 sps:$4 sm:$0xff]  }
 0x3db   :  { %6679 = vmatprep.subr.bf16.mxu1 %v8882_v11  ;;  %v8922_v11 = vld [vmem:[#allocation11 + $0x430] ss:$24 sps:$4 sm:$0xff]  }
 0x3de   :  { %6680 = vmatpush2.bf16.msra.mxu1 %v8880_v54 }
 0x3df   :  { %6681 = vmatprep.subr.bf16.mxu1 %v8888_v29  ;;  %v8930_v29 = vld [vmem:[#allocation11 + $0x404] ss:$24 sps:$4 sm:$0xff]  }
 0x3e2   :  { %6682 = vmatpush2.bf16.msra.mxu1 %v8886_v26  ;;  %v8925_v26 = vld [vmem:[#allocation11 + $0x3f8] ss:$24 sps:$4 sm:$0xff]  }
 0x3e3   :  { %6683 = vmatprep.subr.bf16.mxu1 %v8894_v14 }
 0x3e5   :  { %v4597_v48 = vpop.f32.mrf.mxu1 }
 0x3e6   :  { %6684 = vmatpush2.bf16.msra.mxu1 %v8892_v38  ;;  %v4598_v10 = vadd.f32 %v4597_v48, %v9725_v47 }
 0x3e7   :  { %v4599_v2 = vpop.f32.mrf.mxu1  ;;  %6685 = vmatprep.subr.bf16.mxu1 %v8900_v43  ;;  %v8933_v43 = vld [vmem:[#allocation11 + $0x3cc] ss:$24 sps:$4 sm:$0xff]  }
 0x3e8   :  { %v4600_v1 = vadd.f32 %v4599_v2, %v9730_v0  ;;  %v4618_v59 = vmax.f32 %v4598_v10, 0.0  ;;  %v8910_v0 = vld [vmem:[#allocation11 + $0x788] ss:$24 sps:$4 sm:$0xff]  }
 0x3e9   :  { %v4601_v56 = vpop.f32.mrf.mxu1  ;;  %v8934_v10 = vld [vmem:[#allocation11 + $0x3d0] ss:$24 sps:$4 sm:$0xff]  }
 0x3ea   :  { %v4602_v22 = vadd.f32 %v4601_v56, %v4551_v31  ;;  %6686 = vmatpush2.bf16.msra.mxu1 %v8898_v62  ;;  %v4619_v9 = vmax.f32 %v4600_v1, 0.0  ;;  %v8931_v62 = vld [vmem:[#allocation11 + $0x3c8] ss:$24 sps:$4 sm:$0xff]   ;;  %v8942_v56 = vld [vmem:[#allocation11 + $0x3a4] ss:$24 sps:$4 sm:$0xff]  }
 0x3eb   :  { %v4603_v40 = vpop.f32.mrf.mxu1  ;;  %6687 = vmatprep.subr.bf16.mxu1 %v8906_v18  ;;  %v8939_v18 = vld [vmem:[#allocation11 + $0x39c] ss:$24 sps:$4 sm:$0xff]  }
 0x3ec   :  { %v4624_v63 = vmax.f32 %v4602_v22, 0.0  ;;  %v4604_v6 = vadd.f32 %v4603_v40, %v4553_v45  ;;  %v8945_v22 = vld [vmem:[#allocation11 + $0x36c] ss:$24 sps:$4 sm:$0xff]   ;;  %v8940_v45 = vld [vmem:[#allocation11 + $0x3a0] ss:$24 sps:$4 sm:$0xff]  }
 0x3ed   :  { %v4607_v47 = vpop.f32.mrf.mxu1  ;;  %v8943_v40 = vld [vmem:[#allocation11 + $0x368] ss:$24 sps:$4 sm:$0xff]  }
 0x3ee   :  { %v9753_v34 = vpack.c.bf16 %v4624_v63, %v4618_v59  ;;  %v4625_v19 = vmax.f32 %v4604_v6, 0.0  ;;  %6688 = vmatpush2.bf16.msra.mxu1 %v8904_v12  ;;  %v4608_v32 = vadd.f32 %v4607_v47, %v9738_v13  ;;  %v8919_v13 = vld [vmem:[#allocation11 + $0x428] ss:$24 sps:$4 sm:$0xff]   ;;  %v8948_v12 = vld [vmem:[#allocation11 + $0x374] ss:$24 sps:$4 sm:$0xff]  }
 0x3ef   :  { %v4609_v27 = vpop.f32.mrf.mxu1  ;;  %6689 = vmatprep.subr.bf16.mxu1 %v8912_v25  ;;  %v8951_v25 = vld [vmem:[#allocation11 + $0x33c] ss:$24 sps:$4 sm:$0xff]   ;;  %v8946_v59 = vld [vmem:[#allocation11 + $0x370] ss:$24 sps:$4 sm:$0xff]   ;;  %v8957_v6 = vld [vmem:[#allocation11 + $0x30c] ss:$24 sps:$4 sm:$0xff]  }
 0x3f0   :  { %v9756_v37 = vpack.c.bf16 %v4625_v19, %v4619_v9  ;;  %v4610_v16 = vadd.f32 %v4609_v27, %v4559_v58  ;;  %v4630_v41 = vmax.f32 %v4608_v32, 0.0  ;;  %v8949_v63 = vld [vmem:[#allocation11 + $0x338] ss:$24 sps:$4 sm:$0xff]   ;;  %v8960_v9 = vld [vmem:[#allocation11 + $0x314] ss:$24 sps:$4 sm:$0xff]  }
 0x3f1   :  { %v4611_v39 = vpop.f32.mrf.mxu1  ;;  %v8952_v47 = vld [vmem:[#allocation11 + $0x340] ss:$24 sps:$4 sm:$0xff]   ;;  %v8963_v58 = vld [vmem:[#allocation11 + $0x5dc] ss:$24 sps:$4 sm:$0xff]  }
 0x3f2   :  { %v4631_v35 = vmax.f32 %v4610_v16, 0.0  ;;  %6690 = vmatpush2.bf16.msra.mxu1 %v8910_v0  ;;  %6538 = vmatprep.mubr.bf16.mxu0 %v9756_v37  ;;  %v9773_v14 = vpack.c.bf16 %v4630_v41, %v4630_v41  ;;  %v8955_v19 = vld [vmem:[#allocation11 + $0x308] ss:$24 sps:$4 sm:$0xff]   ;;  %v8966_v27 = vld [vmem:[#allocation11 + $0x5e4] ss:$24 sps:$4 sm:$0xff]  }
 0x3f3   :  { %6691 = vmatprep.mubr.bf16.mxu1 %v9756_v37  ;;  %v4612_v15 = vpop.f32.mrf.mxu1  ;;  %6539 = vmatmul.mubr.bf16.vlgmr.msra.gmra.mxu0 %v9753_v34  ;;  %v9762_v28 = vpop.f32.mrf.mxu0  ;;  %v8958_v0 = vld [vmem:[#allocation11 + $0x310] ss:$24 sps:$4 sm:$0xff]   ;;  %v8972_v32 = vld [vmem:[#allocation11 + $0x5b4] ss:$24 sps:$4 sm:$0xff]  }
 0x3f4   :  { %v9764_v33 = vpack.c.bf16 %v4631_v35, %v4631_v35  ;;  %6609 = vmatpush1.bf16.msra.mxu0 %v8913_v52  ;;  %6761 = vmatprep.subr.bf16.mxu1 %v8918_v55  ;;  %v8961_v16 = vld [vmem:[#allocation11 + $0x5d8] ss:$24 sps:$4 sm:$0xff]   ;;  %v8969_v52 = vld [vmem:[#allocation11 + $0x5ac] ss:$24 sps:$4 sm:$0xff]   ;;  %v8967_v39 = vld [vmem:[#allocation11 + $0x5a8] ss:$24 sps:$4 sm:$0xff]  }
 0x3f5   :  { %6692 = vmatmul.mubr.bf16.vlgmr.msra.gmra.mxu1 %v9753_v34  ;;  %v9767_v24 = vpop.f32.mrf.mxu0  ;;  %6610 = vmatprep.subr.bf16.mxu0 %v8921_v17  ;;  %v8964_v55 = vld [vmem:[#allocation11 + $0x5e0] ss:$24 sps:$4 sm:$0xff]   ;;  %v8975_v17 = vld [vmem:[#allocation11 + $0x57c] ss:$24 sps:$4 sm:$0xff]   ;;  %v8970_v35 = vld [vmem:[#allocation11 + $0x5b0] ss:$24 sps:$4 sm:$0xff]  }
 0x3f6   :  { %6762 = vmatpush1.bf16.msra.mxu1 %v8916_v46  ;;  %6548 = vmatprep.mubr.bf16.mxu0 %v9764_v33  ;;  %v8978_v46 = vld [vmem:[#allocation11 + $0x584] ss:$24 sps:$4 sm:$0xff]   ;;  %v8973_v15 = vld [vmem:[#allocation11 + $0x578] ss:$24 sps:$4 sm:$0xff]   ;;  %v8984_v41 = vld [vmem:[#allocation11 + $0x554] ss:$24 sps:$4 sm:$0xff]  }
 0x3f7   :  { %6701 = vmatprep.mubr.bf16.mxu1 %v9764_v33  ;;  %v9771_v54 = vpop.f32.mrf.mxu0  ;;  %6763 = vmatprep.subr.bf16.mxu1 %v8924_v30  ;;  %v8981_v30 = vld [vmem:[#allocation11 + $0x54c] ss:$24 sps:$4 sm:$0xff]  }
 0x3f8   :  { %6611 = vmatpush1.bf16.msra.mxu0 %v8919_v13  ;;  %v8976_v13 = vld [vmem:[#allocation11 + $0x580] ss:$24 sps:$4 sm:$0xff]  }
 0x3f9   :  { %v9775_v38 = vpop.f32.mrf.mxu0  ;;  %6612 = vmatprep.subr.bf16.mxu0 %v8927_v4  ;;  %v8979_v4 = vld [vmem:[#allocation11 + $0x548] ss:$24 sps:$4 sm:$0xff]  }
 0x3fa   :  { %6764 = vmatpush1.bf16.msra.mxu1 %v8922_v11  ;;  %v8987_v11 = vld [vmem:[#allocation11 + $0x51c] ss:$24 sps:$4 sm:$0xff]  }
 0x3fb   :  { %6549 = vmatmul.mubr.bf16.gmra.mxu0 %v9773_v14  ;;  %v9778_v48 = vpop.f32.mrf.mxu0  ;;  %6765 = vmatprep.subr.bf16.mxu1 %v8930_v29  ;;  %v8982_v29 = vld [vmem:[#allocation11 + $0x550] ss:$24 sps:$4 sm:$0xff]  }
 0x3fc   :  { %6613 = vmatpush1.bf16.msra.mxu0 %v8925_v26  ;;  %6640 = vmatprep.mubr.bf16.mxu0 %v9704_v5  ;;  %v8990_v26 = vld [vmem:[#allocation11 + $0x524] ss:$24 sps:$4 sm:$0xff]  }
 0x3fd   :  { %6702 = vmatmul.mubr.bf16.gmra.mxu1 %v9773_v14  ;;  %v9782_v2 = vpop.f32.mrf.mxu0  ;;  %6614 = vmatprep.subr.bf16.mxu0 %v8933_v43  ;;  %v8985_v43 = vld [vmem:[#allocation11 + $0x518] ss:$24 sps:$4 sm:$0xff]  }
 0x3fe   :  { %6766 = vmatpush1.bf16.msra.mxu1 %v8928_v44  ;;  %6793 = vmatprep.mubr.bf16.mxu1 %v9704_v5  ;;  %v8954_v5 = vld [vmem:[#allocation11 + $0x344] ss:$24 sps:$4 sm:$0xff]  }
 0x3ff   :  { %v6452_v31 = vpop.f32.mrf.mxu0  ;;  %6767 = vmatprep.subr.bf16.mxu1 %v8936_v23  ;;  %v8993_v44 = vld [vmem:[#allocation11 + $0x4ec] ss:$24 sps:$4 sm:$0xff]   ;;  %v8988_v23 = vld [vmem:[#allocation11 + $0x520] ss:$24 sps:$4 sm:$0xff]  }
 0x400   :  { %6615 = vmatpush1.bf16.msra.mxu0 %v8931_v62  ;;  %v8996_v62 = vld [vmem:[#allocation11 + $0x4f4] ss:$24 sps:$4 sm:$0xff]   ;;  %v8994_v31 = vld [vmem:[#allocation11 + $0x4f0] ss:$24 sps:$4 sm:$0xff]  }
 0x401   :  { %v6453_v1 = vpop.f32.mrf.mxu0  ;;  %6616 = vmatprep.subr.bf16.mxu0 %v8939_v18  ;;  %v8991_v18 = vld [vmem:[#allocation11 + $0x4e8] ss:$24 sps:$4 sm:$0xff]  }
 0x402   :  { %6768 = vmatpush1.bf16.msra.mxu1 %v8934_v10  ;;  %v8999_v10 = vld [vmem:[#allocation11 + $0x4bc] ss:$24 sps:$4 sm:$0xff]   ;;  %v9005_v1 = vld [vmem:[#allocation11 + $0x48c] ss:$24 sps:$4 sm:$0xff]  }
 0x403   :  { %6769 = vmatprep.subr.bf16.mxu1 %v8942_v56  ;;  %v9002_v56 = vld [vmem:[#allocation11 + $0x4c4] ss:$24 sps:$4 sm:$0xff]  }
 0x404   :  { %6617 = vmatpush1.bf16.msra.mxu0 %v8937_v3  ;;  %v8997_v3 = vld [vmem:[#allocation11 + $0x4b8] ss:$24 sps:$4 sm:$0xff]  }
 0x405   :  { %6618 = vmatprep.subr.bf16.mxu0 %v8945_v22  ;;  %v9000_v22 = vld [vmem:[#allocation11 + $0x4c0] ss:$24 sps:$4 sm:$0xff]  }
 0x406   :  { %6770 = vmatpush1.bf16.msra.mxu1 %v8940_v45  ;;  %v9008_v45 = vld [vmem:[#allocation11 + $0x494] ss:$24 sps:$4 sm:$0xff]  }
 0x407   :  { %6771 = vmatprep.subr.bf16.mxu1 %v8948_v12  ;;  %v9003_v12 = vld [vmem:[#allocation11 + $0x488] ss:$24 sps:$4 sm:$0xff]  }
 0x408   :  { %6619 = vmatpush1.bf16.msra.mxu0 %v8943_v40  ;;  %v9785_v40 = vld [vmem:[#allocation13] sm:$0x3f] }
 0x409   :  { %6620 = vmatprep.subr.bf16.mxu0 %v8951_v25  ;;  %v9011_v25 = vld [vmem:[#allocation11 + $0x164] ss:$24 sps:$4 sm:$0xff]  }
 0x40a   :  { %6772 = vmatpush1.bf16.msra.mxu1 %v8946_v59  ;;  %v9006_v59 = vld [vmem:[#allocation11 + $0x490] ss:$24 sps:$4 sm:$0xff]  }
 0x40b   :  { %6773 = vmatprep.subr.bf16.mxu1 %v8954_v5  ;;  %v9787_v5 = vld [vmem:[#allocation11 + $0x764] ss:$24 sps:$4 sm:$0xff]  }
 0x40c   :  { %6621 = vmatpush1.bf16.msra.mxu0 %v8949_v63  ;;  %v4937_v63 = vrot.slane %v9785_v40, %v9442_v21  ;;  %v9015_v21 = vld [vmem:[#allocation11 + $0x130] ss:$24 sps:$4 sm:$0xff]  }
 0x40d   :  { %6622 = vmatprep.subr.bf16.mxu0 %v8957_v6  ;;  %v9009_v6 = vld [vmem:[#allocation11 + $0x160] ss:$24 sps:$4 sm:$0xff]  }
 0x40e   :  { %6774 = vmatpush1.bf16.msra.mxu1 %v8952_v47  ;;  %v9017_v47 = vld [vmem:[#allocation11 + $0x134] ss:$24 sps:$4 sm:$0xff]  }
 0x40f   :  { %6775 = vmatprep.subr.bf16.mxu1 %v8960_v9  ;;  %v4941_v9 = vrot.slane %v9785_v40, %v9439_v20  ;;  %v9023_v20 = vld [vmem:[#allocation11 + $0x104] ss:$24 sps:$4 sm:$0xff]  }
 0x410   :  { %6623 = vmatpush1.bf16.msra.mxu0 %v8955_v19  ;;  %v9793_v19 = vld [vmem:[#allocation11 + $0x760] ss:$24 sps:$4 sm:$0xff]  }
 0x411   :  { %6624 = vmatprep.subr.bf16.mxu0 %v8963_v58  ;;  %v9797_v58 = vld [vmem:[#allocation11 + $0x734] ss:$24 sps:$4 sm:$0xff]  }
 0x412   :  { %6776 = vmatpush1.bf16.msra.mxu1 %v8958_v0  ;;  %v6439_v0 = vadd.f32 %v9762_v28, %v4937_v63 }
 0x413   :  { %6777 = vmatprep.subr.bf16.mxu1 %v8966_v27 }
 0x414   :  { %6625 = vmatpush2.bf16.msra.mxu0 %v8961_v16  ;;  %v6441_v16 = vadd.f32 %v9767_v24, %v4941_v9 }
 0x415   :  { %6626 = vmatprep.subr.bf16.mxu0 %v8969_v52 }
 0x416   :  { %6778 = vmatpush2.bf16.msra.mxu1 %v8964_v55  ;;  %v9807_v55 = vld [vmem:[#allocation11 + $0x730] ss:$24 sps:$4 sm:$0xff]  }
 0x417   :  { %6779 = vmatprep.subr.bf16.mxu1 %v8972_v32  ;;  %v9810_v32 = vld [vmem:[#allocation11 + $0x704] ss:$24 sps:$4 sm:$0xff]  }
 0x418   :  { %6627 = vmatpush2.bf16.msra.mxu0 %v8967_v39 }
 0x419   :  { %6628 = vmatprep.subr.bf16.mxu0 %v8975_v17  ;;  %v9021_v17 = vld [vmem:[#allocation11 + $0x100] ss:$24 sps:$4 sm:$0xff]  }
 0x41a   :  { %6780 = vmatpush2.bf16.msra.mxu1 %v8970_v35  ;;  %v9029_v35 = vld [vmem:[#allocation11 + $0xd4] ss:$24 sps:$4 sm:$0xff]  }
 0x41b   :  { %6781 = vmatprep.subr.bf16.mxu1 %v8978_v46 }
 0x41c   :  { %6629 = vmatpush2.bf16.msra.mxu0 %v8973_v15  ;;  %v9819_v15 = vld [vmem:[#allocation11 + $0x700] ss:$24 sps:$4 sm:$0xff]  }
 0x41d   :  { %6630 = vmatprep.subr.bf16.mxu0 %v8981_v30 }
 0x41e   :  { %6782 = vmatpush2.bf16.msra.mxu1 %v8976_v13  ;;  %v6449_v13 = vadd.f32 %v9778_v48, %v4937_v63  ;;  %v9835_v48 = vld [vmem:[#allocation11 + $0x6d0] ss:$24 sps:$4 sm:$0xff]  }
 0x41f   :  { %6783 = vmatprep.subr.bf16.mxu1 %v8984_v41 }
 0x420   :  { %6631 = vmatpush2.bf16.msra.mxu0 %v8979_v4 }
 0x421   :  { %6632 = vmatprep.subr.bf16.mxu0 %v8987_v11  ;;  %v9035_v11 = vld [vmem:[#allocation11 + $0xa4] ss:$24 sps:$4 sm:$0xff]  }
 0x422   :  { %6784 = vmatpush2.bf16.msra.mxu1 %v8982_v29  ;;  %v6451_v29 = vadd.f32 %v9782_v2, %v4941_v9  ;;  %v9041_v2 = vld [vmem:[#allocation11 + $0x74] ss:$24 sps:$4 sm:$0xff]  }
 0x423   :  { %6785 = vmatprep.subr.bf16.mxu1 %v8990_v26 }
 0x424   :  { %6633 = vmatpush2.bf16.msra.mxu0 %v8985_v43 }
 0x425   :  { %6634 = vmatprep.subr.bf16.mxu0 %v8993_v44 }
 0x426   :  { %6786 = vmatpush2.bf16.msra.mxu1 %v8988_v23 }
 0x427   :  { %6787 = vmatprep.subr.bf16.mxu1 %v8996_v62  ;;  %v9843_v62 = vld [vmem:[#allocation11 + $0x6a0] ss:$24 sps:$4 sm:$0xff]  }
 0x428   :  { %6635 = vmatpush2.bf16.msra.mxu0 %v8991_v18 }
 0x429   :  { %6636 = vmatprep.subr.bf16.mxu0 %v8999_v10  ;;  %v9039_v10 = vld [vmem:[#allocation11 + $0x70] ss:$24 sps:$4 sm:$0xff]  }
 0x42a   :  { %6788 = vmatpush2.bf16.msra.mxu1 %v8994_v31  ;;  %v9047_v31 = vld [vmem:[#allocation11 + $0x44] ss:$24 sps:$4 sm:$0xff]  }
 0x42b   :  { %6789 = vmatprep.subr.bf16.mxu1 %v9002_v56  ;;  %v9849_v56 = vld [vmem:[#allocation11 + $0x670] ss:$24 sps:$4 sm:$0xff]  }
 0x42c   :  { %6637 = vmatpush2.bf16.msra.mxu0 %v8997_v3  ;;  %v9852_v3 = vld [vmem:[#allocation11 + $0x644] ss:$24 sps:$4 sm:$0xff]  }
 0x42d   :  { %6638 = vmatprep.subr.bf16.mxu0 %v9005_v1  ;;  %v9045_v1 = vld [vmem:[#allocation11 + $0x40] ss:$24 sps:$4 sm:$0xff]  }
 0x42e   :  { %6790 = vmatpush2.bf16.msra.mxu1 %v9000_v22  ;;  %v9053_v22 = vld [vmem:[#allocation11 + $0x14] ss:$24 sps:$4 sm:$0xff]  }
 0x42f   :  { %6791 = vmatprep.subr.bf16.mxu1 %v9008_v45  ;;  %v9855_v45 = vld [vmem:[#allocation11 + $0x640] ss:$24 sps:$4 sm:$0xff]  }
 0x430   :  { %6639 = vmatpush2.bf16.msra.mxu0 %v9003_v12  ;;  %v9858_v12 = vld [vmem:[#allocation11 + $0x614] ss:$24 sps:$4 sm:$0xff]  }
 0x431   :  { %6710 = vmatprep.subr.bf16.mxu0 %v9011_v25  ;;  %v9051_v25 = vld [vmem:[#allocation11 + $0x10] ss:$24 sps:$4 sm:$0xff]  }
 0x432   :  { %6792 = vmatpush2.bf16.msra.mxu1 %v9006_v59  ;;  %v9059_v59 = vld [vmem:[#allocation11 + $0x2e4] ss:$24 sps:$4 sm:$0xff]  }
 0x433   :  { %6641 = vmatmul.mubr.bf16.vlgmr.msra.gmra.mxu0 %v9698_v42  ;;  %7765 = vmatprep.subr.bf16.mxu1 %v9787_v5 }
 0x434   :  { %6650 = vmatprep.mubr.bf16.mxu0 %v9708_v49  ;;  %6711 = vmatpush1.bf16.msra.mxu0 %v9009_v6  ;;  %v9864_v6 = vld [vmem:[#allocation11 + $0x8e4] ss:$24 sps:$4 sm:$0xff]  }
 0x435   :  { %6794 = vmatmul.mubr.bf16.vlgmr.msra.gmra.mxu1 %v9698_v42  ;;  %v6489_v27 = vpop.f32.mrf.mxu1  ;;  %6712 = vmatprep.subr.bf16.mxu0 %v9017_v47  ;;  %v6443_v42 = vadd.f32 %v9771_v54, %v4937_v63  ;;  %v9823_v54 = vld [vmem:[#allocation11 + $0x6d4] ss:$24 sps:$4 sm:$0xff]   ;;  %v9861_v63 = vld [vmem:[#allocation11 + $0x610] ss:$24 sps:$4 sm:$0xff]   ;;  %v9057_v47 = vld [vmem:[#allocation11 + $0x2e0] ss:$24 sps:$4 sm:$0xff]  }
 0x436   :  { %v9803_v52 = vadd.f32 %v6489_v27, %v6439_v0  ;;  %6803 = vmatprep.mubr.bf16.mxu1 %v9708_v49  ;;  %7781 = vmatpush1.bf16.msra.mxu1 %v9793_v19  ;;  %v6445_v49 = vadd.f32 %v9775_v38, %v4941_v9  ;;  %v9027_v38 = vld [vmem:[#allocation11 + $0xd0] ss:$24 sps:$4 sm:$0xff]   ;;  %v9065_v9 = vld [vmem:[#allocation11 + $0x2b4] ss:$24 sps:$4 sm:$0xff]   ;;  %v9867_v0 = vld [vmem:[#allocation11 + $0x8e0] ss:$24 sps:$4 sm:$0xff]  }
 0x437   :  { %v6491_v28 = vpop.f32.mrf.mxu1  ;;  %7766 = vmatprep.subr.bf16.mxu1 %v9797_v58  ;;  %v9063_v27 = vld [vmem:[#allocation11 + $0x2b0] ss:$24 sps:$4 sm:$0xff]  }
 0x438   :  { %v9813_v39 = vadd.f32 %v6491_v28, %v6441_v16  ;;  %6713 = vmatpush1.bf16.msra.mxu0 %v9015_v21  ;;  %v9870_v21 = vld [vmem:[#allocation11 + $0x8b4] ss:$24 sps:$4 sm:$0xff]   ;;  %v9873_v16 = vld [vmem:[#allocation11 + $0x8b0] ss:$24 sps:$4 sm:$0xff]   ;;  %v9876_v28 = vld [vmem:[#allocation11 + $0x884] ss:$24 sps:$4 sm:$0xff]  }
 0x439   :  { %v6493_v24 = vpop.f32.mrf.mxu1  ;;  %6714 = vmatprep.subr.bf16.mxu0 %v9023_v20  ;;  %v9071_v20 = vld [vmem:[#allocation11 + $0x284] ss:$24 sps:$4 sm:$0xff]  }
 0x43a   :  { %v9816_v46 = vadd.f32 %v6493_v24, %v6443_v42  ;;  %7782 = vmatpush1.bf16.msra.mxu1 %v9807_v55  ;;  %v9069_v42 = vld [vmem:[#allocation11 + $0x280] ss:$24 sps:$4 sm:$0xff]  }
 0x43b   :  { %6651 = vmatmul.mubr.bf16.gmra.mxu0 %v9711_v60  ;;  %v6495_v30 = vpop.f32.mrf.mxu1  ;;  %7767 = vmatprep.subr.bf16.mxu1 %v9810_v32  ;;  %v9879_v24 = vld [vmem:[#allocation11 + $0x880] ss:$24 sps:$4 sm:$0xff]  }
 0x43c   :  { %v9826_v41 = vadd.f32 %v6495_v30, %v6445_v49  ;;  %6715 = vmatpush1.bf16.msra.mxu0 %v9021_v17  ;;  %6742 = vmatprep.mubr.bf16.mxu0 %v9660_v61  ;;  %v9838_v61 = vld [vmem:[#allocation11 + $0x6a4] ss:$24 sps:$4 sm:$0xff]   ;;  %v9077_v17 = vld [vmem:[#allocation11 + $0x254] ss:$24 sps:$4 sm:$0xff]   ;;  %v9075_v49 = vld [vmem:[#allocation11 + $0x250] ss:$24 sps:$4 sm:$0xff]  }
 0x43d   :  { %6804 = vmatmul.mubr.bf16.gmra.mxu1 %v9711_v60  ;;  %v6499_v4 = vpop.f32.mrf.mxu1  ;;  %6716 = vmatprep.subr.bf16.mxu0 %v9029_v35  ;;  %v9033_v60 = vld [vmem:[#allocation11 + $0xa0] ss:$24 sps:$4 sm:$0xff]   ;;  %v9882_v35 = vld [vmem:[#allocation11 + $0x854] ss:$24 sps:$4 sm:$0xff]   ;;  %v9083_v30 = vld [vmem:[#allocation11 + $0x224] ss:$24 sps:$4 sm:$0xff]  }
 0x43e   :  { %v9831_v26 = vadd.f32 %v6499_v4, %v6449_v13  ;;  %7783 = vmatpush1.bf16.msra.mxu1 %v9819_v15  ;;  %6854 = vmatprep.mubr.bf16.mxu1 %v9764_v33  ;;  %v9846_v33 = vld [vmem:[#allocation11 + $0x674] ss:$24 sps:$4 sm:$0xff]   ;;  %v9885_v13 = vld [vmem:[#allocation11 + $0x850] ss:$24 sps:$4 sm:$0xff]   ;;  %v9081_v4 = vld [vmem:[#allocation11 + $0x220] ss:$24 sps:$4 sm:$0xff]  }
 0x43f   :  { %v6501_v43 = vpop.f32.mrf.mxu1  ;;  %7768 = vmatprep.subr.bf16.mxu1 %v9823_v54 }
 0x440   :  { %v9840_v44 = vadd.f32 %v6501_v43, %v6451_v29  ;;  %6717 = vmatpush1.bf16.msra.mxu0 %v9027_v38  ;;  %v9888_v38 = vld [vmem:[#allocation11 + $0x824] ss:$24 sps:$4 sm:$0xff]   ;;  %v9891_v29 = vld [vmem:[#allocation11 + $0x820] ss:$24 sps:$4 sm:$0xff]   ;;  %v9894_v43 = vld [vmem:[#allocation11 + $0x7f4] ss:$24 sps:$4 sm:$0xff]  }
 0x441   :  { %v6503_v23 = vpop.f32.mrf.mxu1  ;;  %6718 = vmatprep.subr.bf16.mxu0 %v9035_v11  ;;  %v9089_v11 = vld [vmem:[#allocation11 + $0x1f4] ss:$24 sps:$4 sm:$0xff]  }
 0x442   :  { %7784 = vmatpush1.bf16.msra.mxu1 %v9835_v48  ;;  %v9095_v23 = vld [vmem:[#allocation11 + $0x1c4] ss:$24 sps:$4 sm:$0xff]  }
 0x443   :  { %v6504_v18 = vpop.f32.mrf.mxu1  ;;  %7769 = vmatprep.subr.bf16.mxu1 %v9838_v61 }
 0x444   :  { %6719 = vmatpush1.bf16.msra.mxu0 %v9033_v60  ;;  %v9087_v60 = vld [vmem:[#allocation11 + $0x1f0] ss:$24 sps:$4 sm:$0xff]   ;;  %v9098_v18 = vld [vmem:[#allocation11 + $0x7c4] ss:$24 sps:$4 sm:$0xff]  }
 0x445   :  { %6720 = vmatprep.subr.bf16.mxu0 %v9041_v2  ;;  %v9090_v2 = vld [vmem:[#allocation11 + $0x7f0] ss:$24 sps:$4 sm:$0xff]  }
 0x446   :  { %7785 = vmatpush1.bf16.msra.mxu1 %v9843_v62 }
 0x447   :  { %7770 = vmatprep.subr.bf16.mxu1 %v9846_v33 }
 0x448   :  { %6721 = vmatpush1.bf16.msra.mxu0 %v9039_v10  ;;  %v9093_v10 = vld [vmem:[#allocation11 + $0x1c0] ss:$24 sps:$4 sm:$0xff]  }
 0x449   :  { %6722 = vmatprep.subr.bf16.mxu0 %v9047_v31  ;;  %v9101_v31 = vld [vmem:[#allocation11 + $0x194] ss:$24 sps:$4 sm:$0xff]  }
 0x44a   :  { %7786 = vmatpush1.bf16.msra.mxu1 %v9849_v56 }
 0x44b   :  { %7771 = vmatprep.subr.bf16.mxu1 %v9852_v3 }
 0x44c   :  { %6723 = vmatpush1.bf16.msra.mxu0 %v9045_v1  ;;  %v9096_v1 = vld [vmem:[#allocation11 + $0x7c0] ss:$24 sps:$4 sm:$0xff]  }
 0x44d   :  { %6724 = vmatprep.subr.bf16.mxu0 %v9053_v22  ;;  %v9104_v22 = vld [vmem:[#allocation11 + $0x794] ss:$24 sps:$4 sm:$0xff]  }
 0x44e   :  { %7787 = vmatpush1.bf16.msra.mxu1 %v9855_v45 }
 0x44f   :  { %7772 = vmatprep.subr.bf16.mxu1 %v9858_v12 }
 0x450   :  { %6725 = vmatpush1.bf16.msra.mxu0 %v9051_v25  ;;  %v9099_v25 = vld [vmem:[#allocation11 + $0x190] ss:$24 sps:$4 sm:$0xff]  }
 0x451   :  { %6726 = vmatprep.subr.bf16.mxu0 %v9059_v59  ;;  %v9102_v59 = vld [vmem:[#allocation11 + $0x790] ss:$24 sps:$4 sm:$0xff]  }
 0x452   :  { %7788 = vmatpush1.bf16.msra.mxu1 %v9861_v63 }
 0x453   :  { %7773 = vmatprep.subr.bf16.mxu1 %v9864_v6 }
 0x454   :  { %6727 = vmatpush2.bf16.msra.mxu0 %v9057_v47 }
 0x455   :  { %6728 = vmatprep.subr.bf16.mxu0 %v9065_v9 }
 0x456   :  { %7789 = vmatpush2.bf16.msra.mxu1 %v9867_v0 }
 0x457   :  { %7774 = vmatprep.subr.bf16.mxu1 %v9870_v21 }
 0x458   :  { %6729 = vmatpush2.bf16.msra.mxu0 %v9063_v27 }
 0x459   :  { %6730 = vmatprep.subr.bf16.mxu0 %v9071_v20 }
 0x45a   :  { %7790 = vmatpush2.bf16.msra.mxu1 %v9873_v16 }
 0x45b   :  { %7775 = vmatprep.subr.bf16.mxu1 %v9876_v28 }
 0x45c   :  { %6731 = vmatpush2.bf16.msra.mxu0 %v9069_v42 }
 0x45d   :  { %6732 = vmatprep.subr.bf16.mxu0 %v9077_v17 }
 0x45e   :  { %7791 = vmatpush2.bf16.msra.mxu1 %v9879_v24 }
 0x45f   :  { %7776 = vmatprep.subr.bf16.mxu1 %v9882_v35 }
 0x460   :  { %6733 = vmatpush2.bf16.msra.mxu0 %v9075_v49 }
 0x461   :  { %6734 = vmatprep.subr.bf16.mxu0 %v9083_v30 }
 0x462   :  { %7792 = vmatpush2.bf16.msra.mxu1 %v9885_v13 }
 0x463   :  { %7777 = vmatprep.subr.bf16.mxu1 %v9888_v38 }
 0x464   :  { %6735 = vmatpush2.bf16.msra.mxu0 %v9081_v4 }
 0x465   :  { %6736 = vmatprep.subr.bf16.mxu0 %v9089_v11 }
 0x466   :  { %7793 = vmatpush2.bf16.msra.mxu1 %v9891_v29 }
 0x467   :  { %7778 = vmatprep.subr.bf16.mxu1 %v9894_v43 }
 0x468   :  { %6737 = vmatpush2.bf16.msra.mxu0 %v9087_v60 }
 0x469   :  { %6738 = vmatprep.subr.bf16.mxu0 %v9095_v23 }
 0x46a   :  { %7794 = vmatpush2.bf16.msra.mxu1 %v9090_v2 }
 0x46b   :  { %7779 = vmatprep.subr.bf16.mxu1 %v9098_v18 }
 0x46c   :  { %6739 = vmatpush2.bf16.msra.mxu0 %v9093_v10 }
 0x46d   :  { %6740 = vmatprep.subr.bf16.mxu0 %v9101_v31 }
 0x46e   :  { %7795 = vmatpush2.bf16.msra.mxu1 %v9096_v1 }
 0x46f   :  { %7780 = vmatprep.subr.bf16.mxu1 %v9104_v22 }
 0x470   :  { %6741 = vmatpush2.bf16.msra.mxu0 %v9099_v25 }
 0x471   :  { %6812 = vmatprep.subr.bf16.mxu0 %v9787_v5 }
 0x472   :  { %7796 = vmatpush2.bf16.msra.mxu1 %v9102_v59 }
 0x473   :  { %6743 = vmatmul.mubr.bf16.vlgmr.msra.gmra.mxu0 %v9656_v36 }
 0x474   :  { %6752 = vmatprep.mubr.bf16.mxu0 %v9668_v53  ;;  %6813 = vmatpush1.bf16.msra.mxu0 %v9793_v19 }
 0x475   :  { %v9902_v47 = vpop.f32.mrf.mxu1  ;;  %6855 = vmatmul.mubr.bf16.vlgmr.msra.gmra.mxu1 %v9773_v14  ;;  %6814 = vmatprep.subr.bf16.mxu0 %v9797_v58 }
 0x477   :  { %v9906_v9 = vpop.f32.mrf.mxu1 }
 0x478   :  { %6815 = vmatpush1.bf16.msra.mxu0 %v9807_v55 }
 0x479   :  { %v9909_v27 = vpop.f32.mrf.mxu1  ;;  %6816 = vmatprep.subr.bf16.mxu0 %v9810_v32 }
 0x47b   :  { %v9912_v5 = vpop.f32.mrf.mxu1  ;;  %6753 = vmatmul.mubr.bf16.gmra.mxu0 %v9671_v57 }
 0x47c   :  { %6817 = vmatpush1.bf16.msra.mxu0 %v9819_v15  ;;  %6844 = vmatprep.mubr.bf16.mxu0 %v9756_v37 }
 0x47d   :  { %v9917_v36 = vpop.f32.mrf.mxu1  ;;  %6818 = vmatprep.subr.bf16.mxu0 %v9823_v54 }
 0x47f   :  { %v9920_v53 = vpop.f32.mrf.mxu1 }
 0x480   :  { %6819 = vmatpush1.bf16.msra.mxu0 %v9835_v48 }
 0x481   :  { %v6605_v14 = vpop.f32.mrf.mxu1  ;;  %6820 = vmatprep.subr.bf16.mxu0 %v9838_v61 }
 0x483   :  { %v6606_v19 = vpop.f32.mrf.mxu1 }
 0x484   :  { %6821 = vmatpush1.bf16.msra.mxu0 %v9843_v62 }
 0x485   :  { %6822 = vmatprep.subr.bf16.mxu0 %v9846_v33 }
 0x488   :  { %6823 = vmatpush1.bf16.msra.mxu0 %v9849_v56 }
 0x489   :  { %6824 = vmatprep.subr.bf16.mxu0 %v9852_v3 }
 0x48c   :  { %6825 = vmatpush1.bf16.msra.mxu0 %v9855_v45 }
 0x48d   :  { %6826 = vmatprep.subr.bf16.mxu0 %v9858_v12 }
 0x490   :  { %6827 = vmatpush1.bf16.msra.mxu0 %v9861_v63 }
 0x491   :  { %6828 = vmatprep.subr.bf16.mxu0 %v9864_v6 }
 0x494   :  { %6829 = vmatpush2.bf16.msra.mxu0 %v9867_v0 }
 0x495   :  { %6830 = vmatprep.subr.bf16.mxu0 %v9870_v21  ;;  %v4945_v21 = vrot.slane %v9785_v40, %v9491_v8 }
 0x497   :  { %v6592_v20 = vadd.f32 %v9902_v47, %v4945_v21  ;;  %v6596_v17 = vadd.f32 %v9909_v27, %v4945_v21  ;;  %v6602_v11 = vadd.f32 %v9917_v36, %v4945_v21 }
 0x498   :  { %6831 = vmatpush2.bf16.msra.mxu0 %v9873_v16 }
 0x499   :  { %6832 = vmatprep.subr.bf16.mxu0 %v9876_v28 }
 0x49c   :  { %6833 = vmatpush2.bf16.msra.mxu0 %v9879_v24 }
 0x49d   :  { %6834 = vmatprep.subr.bf16.mxu0 %v9882_v35 }
 0x4a0   :  { %6835 = vmatpush2.bf16.msra.mxu0 %v9885_v13 }
 0x4a1   :  { %6836 = vmatprep.subr.bf16.mxu0 %v9888_v38 }
 0x4a4   :  { %6837 = vmatpush2.bf16.msra.mxu0 %v9891_v29 }
 0x4a5   :  { %6838 = vmatprep.subr.bf16.mxu0 %v9894_v43 }
 0x4a8   :  { %6839 = vmatpush2.bf16.msra.mxu0 %v9090_v2 }
 0x4a9   :  { %6840 = vmatprep.subr.bf16.mxu0 %v9098_v18 }
 0x4ac   :  { %6841 = vmatpush2.bf16.msra.mxu0 %v9096_v1 }
 0x4ad   :  { %6842 = vmatprep.subr.bf16.mxu0 %v9104_v22 }
 0x4b0   :  { %6843 = vmatpush2.bf16.msra.mxu0 %v9102_v59 }
 0x4b3   :  { %6845 = vmatmul.mubr.bf16.vlgmr.msra.gmra.mxu0 %v9753_v34  ;;  %v6540_v57 = vpop.f32.mrf.mxu0 }
 0x4b4   :  { %v6541_v37 = vadd.f32 %v6540_v57, %v9803_v52 }
 0x4b5   :  { %v6693_v58 = vpop.f32.mrf.mxu1  ;;  %v6542_v55 = vpop.f32.mrf.mxu0 }
 0x4b6   :  { %6863 = vst [vmem:[#allocation14] sm:$0xff] %v6541_v37  ;;  %v6543_v32 = vadd.f32 %v6542_v55, %v9813_v39 }
 0x4b7   :  { %v6695_v15 = vpop.f32.mrf.mxu1  ;;  %v6544_v54 = vpop.f32.mrf.mxu0 }
 0x4b8   :  { %6864 = vst [vmem:[#allocation14 + $0x8] sm:$0xff] %v6543_v32  ;;  %v6545_v48 = vadd.f32 %v6544_v54, %v9816_v46  ;;  %v4953_v32 = vrot.slane %v9785_v40, %v9517_v50 }
 0x4b9   :  { %v6697_v61 = vpop.f32.mrf.mxu1  ;;  %v6546_v62 = vpop.f32.mrf.mxu0 }
 0x4ba   :  { %6869 = vst [vmem:[#allocation14 + $0x30] sm:$0xff] %v6545_v48  ;;  %v6547_v33 = vadd.f32 %v6546_v62, %v9826_v41  ;;  %v4949_v41 = vrot.slane %v9785_v40, %v9488_v7  ;;  %v4957_v48 = vrot.slane %v9785_v40, %v9520_v51 }
 0x4bb   :  { %v6699_v56 = vpop.f32.mrf.mxu1  ;;  %v6550_v34 = vpop.f32.mrf.mxu0 }
 0x4bc   :  { %6870 = vst [vmem:[#allocation14 + $0x38] sm:$0xff] %v6547_v33  ;;  %v6551_v52 = vadd.f32 %v6550_v34, %v9831_v26  ;;  %v6594_v16 = vadd.f32 %v9906_v9, %v4949_v41  ;;  %v6598_v13 = vadd.f32 %v9912_v5, %v4949_v41  ;;  %v6604_v2 = vadd.f32 %v9920_v53, %v4949_v41 }
 0x4bd   :  { %v6703_v3 = vpop.f32.mrf.mxu1  ;;  %v6552_v45 = vpop.f32.mrf.mxu0 }
 0x4be   :  { %6875 = vst [vmem:[#allocation14 + $0x60] sm:$0xf] %v6551_v52  ;;  %v6553_v39 = vadd.f32 %v6552_v45, %v9840_v44 }
 0x4bf   :  { %v6705_v12 = vpop.f32.mrf.mxu1  ;;  %v6554_v63 = vpop.f32.mrf.mxu0 }
 0x4c0   :  { %6876 = vst [vmem:[#allocation14 + $0x68] sm:$0xf] %v6553_v39 }
 0x4c1   :  { %v6707_v6 = vpop.f32.mrf.mxu1  ;;  %v6555_v46 = vpop.f32.mrf.mxu0 }
 0x4c3   :  { %v6708_v0 = vpop.f32.mrf.mxu1 }
 0x4f3   :  { %v6642_v26 = vpop.f32.mrf.mxu0 }
 0x4f4   :  { %v6643_v28 = vadd.f32 %v6642_v26, %v6592_v20 }
 0x4f5   :  { %v6644_v42 = vpop.f32.mrf.mxu0  ;;  %v6795_v44 = vpop.f32.mrf.mxu1 }
 0x4f6   :  { %v6694_v24 = vadd.f32 %v6693_v58, %v6643_v28  ;;  %v6645_v35 = vadd.f32 %v6644_v42, %v6594_v16 }
 0x4f7   :  { %v6646_v49 = vpop.f32.mrf.mxu0  ;;  %v6797_v30 = vpop.f32.mrf.mxu1 }
 0x4f8   :  { %6865 = vst [vmem:[#allocation14 + $0x10] sm:$0xff] %v6694_v24  ;;  %v6696_v8 = vadd.f32 %v6695_v15, %v6645_v35  ;;  %v6647_v38 = vadd.f32 %v6646_v49, %v6596_v17 }
 0x4f9   :  { %v6648_v7 = vpop.f32.mrf.mxu0  ;;  %v6799_v4 = vpop.f32.mrf.mxu1 }
 0x4fa   :  { %6866 = vst [vmem:[#allocation14 + $0x18] sm:$0xff] %v6696_v8  ;;  %v6698_v29 = vadd.f32 %v6697_v61, %v6647_v38  ;;  %v6649_v43 = vadd.f32 %v6648_v7, %v6598_v13 }
 0x4fb   :  { %v6652_v60 = vpop.f32.mrf.mxu0  ;;  %v6801_v23 = vpop.f32.mrf.mxu1 }
 0x4fc   :  { %6871 = vst [vmem:[#allocation14 + $0x40] sm:$0xff] %v6698_v29  ;;  %v6700_v18 = vadd.f32 %v6699_v56, %v6649_v43  ;;  %v6653_v10 = vadd.f32 %v6652_v60, %v6602_v11 }
 0x4fd   :  { %v6654_v31 = vpop.f32.mrf.mxu0  ;;  %v6805_v1 = vpop.f32.mrf.mxu1 }
 0x4fe   :  { %6872 = vst [vmem:[#allocation14 + $0x48] sm:$0xff] %v6700_v18  ;;  %v6704_v22 = vadd.f32 %v6703_v3, %v6653_v10  ;;  %v6655_v25 = vadd.f32 %v6654_v31, %v6604_v2 }
 0x4ff   :  { %v6656_v59 = vpop.f32.mrf.mxu0  ;;  %v6807_v47 = vpop.f32.mrf.mxu1 }
 0x500   :  { %6877 = vst [vmem:[#allocation14 + $0x70] sm:$0xf] %v6704_v22  ;;  %v6706_v9 = vadd.f32 %v6705_v12, %v6655_v25 }
 0x501   :  { %v6657_v27 = vpop.f32.mrf.mxu0  ;;  %v6809_v5 = vpop.f32.mrf.mxu1 }
 0x502   :  { %6878 = vst [vmem:[#allocation14 + $0x78] sm:$0xf] %v6706_v9 }
 0x503   :  { %v6810_v36 = vpop.f32.mrf.mxu1 }
 0x533   :  { %v6744_v14 = vpop.f32.mrf.mxu0 }
 0x534   :  { %v6745_v12 = vadd.f32 %v6744_v14, %v4953_v32 }
 0x535   :  { %v6746_v19 = vpop.f32.mrf.mxu0  ;;  %v6856_v57 = vpop.f32.mrf.mxu1 }
 0x536   :  { %v6747_v63 = vadd.f32 %v6746_v19, %v4957_v48  ;;  %v6796_v50 = vadd.f32 %v6795_v44, %v6745_v12 }
 0x537   :  { %v6748_v53 = vpop.f32.mrf.mxu0  ;;  %v6858_v37 = vpop.f32.mrf.mxu1 }
 0x538   :  { %v6749_v6 = vadd.f32 %v6748_v53, %v4953_v32  ;;  %v6798_v41 = vadd.f32 %v6797_v30, %v6747_v63 }
 0x539   :  { %v6750_v58 = vpop.f32.mrf.mxu0  ;;  %v6860_v55 = vpop.f32.mrf.mxu1 }
 0x53a   :  { %v6751_v0 = vadd.f32 %v6750_v58, %v4957_v48  ;;  %v6800_v20 = vadd.f32 %v6799_v4, %v6749_v6 }
 0x53b   :  { %v6754_v15 = vpop.f32.mrf.mxu0  ;;  %v6861_v54 = vpop.f32.mrf.mxu1 }
 0x53c   :  { %v6755_v61 = vadd.f32 %v6754_v15, %v4953_v32  ;;  %v6802_v28 = vadd.f32 %v6801_v23, %v6751_v0 }
 0x53d   :  { %v6756_v62 = vpop.f32.mrf.mxu0 }
 0x53e   :  { %v6806_v33 = vadd.f32 %v6805_v1, %v6755_v61  ;;  %v6757_v56 = vadd.f32 %v6756_v62, %v4957_v48 }
 0x53f   :  { %v6758_v34 = vpop.f32.mrf.mxu0 }
 0x540   :  { %v6857_v52 = vadd.f32 %v6856_v57, %v6806_v33  ;;  %v6808_v3 = vadd.f32 %v6807_v47, %v6757_v56 }
 0x541   :  { %v6759_v45 = vpop.f32.mrf.mxu0 }
 0x542   :  { %6879 = vst [vmem:[#allocation14 + $0x80] sm:$0xf] %v6857_v52  ;;  %v6859_v39 = vadd.f32 %v6858_v37, %v6808_v3 }
 0x544   :  { %6880 = vst [vmem:[#allocation14 + $0x88] sm:$0xf] %v6859_v39 }
 0x573   :  { %v6846_v46 = vpop.f32.mrf.mxu0 }
 0x574   :  { %v6847_v21 = vadd.f32 %v6846_v46, %v6796_v50 }
 0x575   :  { %v6848_v51 = vpop.f32.mrf.mxu0 }
 0x576   :  { %6867 = vst [vmem:[#allocation14 + $0x20] sm:$0xff] %v6847_v21  ;;  %v6849_v40 = vadd.f32 %v6848_v51, %v6798_v41 }
 0x577   :  { %v6850_v26 = vpop.f32.mrf.mxu0 }
 0x578   :  { %6868 = vst [vmem:[#allocation14 + $0x28] sm:$0xff] %v6849_v40  ;;  %v6851_v16 = vadd.f32 %v6850_v26, %v6800_v20 }
 0x579   :  { %v6852_v42 = vpop.f32.mrf.mxu0 }
 0x57a   :  { %6873 = vst [vmem:[#allocation14 + $0x50] sm:$0xff] %v6851_v16  ;;  %v6853_v17 = vadd.f32 %v6852_v42, %v6802_v28 }
 0x57c   :  { %6874 = vst [vmem:[#allocation14 + $0x58] sm:$0xff] %v6853_v17 }
 0x57d   :  { %9258 = shalt.err (!%p9255_p11)
}
 0x57e   :  { %6892 = dma.vmem_to_hbm [thread:$0]  %s6887_s6, 2304, %s9976_s7, [#allocation4], %s9283_s3, %s9283_s3, %s9284_s20  }
 0x57f   :  { %9275 = dma.done.wait [#allocation4], 2304  }
 0x580   :  { %9276 = vsyncadd [#allocation4], 4294964992 }
 0x581   :  { %6896 = vsyncpa [#allocation3], 1 }
 0x582   :  { %6897 = vsyncpa [#allocation6], 1 }
 0x583   :  { %6898 = vsyncpa [#allocation9], 1 }
 0x584   :  { %6899 = vsyncpa [#allocation12], 1 }
 0x585   :  { %6900 = vsyncpa [#allocation4], 1 }

</bundles_post_ra>
